<compile_context>
chip_gen: v5e
topology: v5e:2x2
jax: 0.10.0
libtpu: 0.0.40
codegen_flags: <defaults>
</compile_context>

<pallas_src>
import functools

import jax
import jax.numpy as jnp
from jax.experimental import pallas as pl
from jax.experimental.pallas import tpu as pltpu

NEG_SLOPE = 0.01   # LeakyReLU negative_slope
EPS = 1e-5         # InstanceNorm eps
LANE = 128
SUBLANE = 8


def _round_up(x, m):
    return (x + m - 1) // m * m


def _vmem_budgets():
    """Generation-aware (tile-selection budget, scoped vmem limit)."""
    cap = 64 << 20                      # conservative default = v7x physical VMEM
    try:
        info = pltpu.get_tpu_info()
        cap = int(getattr(info, "vmem_capacity_bytes", cap)) or cap
    except Exception:
        pass
    limit = min(cap * 3 // 4, 100 << 20)    # v7x -> 48 MiB, v5e/v6e -> 96..100 MiB
    budget = min(int(cap * 0.35), 44 << 20)  # working-set target used for tile selection
    return budget, limit


def _pick_tile_d(Do, K, KKCin, Cout8, HoWo, budget_bytes, max_unroll=32):
    """Largest divisor of Do whose padded, double-buffered phase-1 working set fits."""
    kk_s = _round_up(KKCin, 16)             # bf16 sublane padding of the activation tap
    hw_l = _round_up(HoWo, LANE)
    co_s = _round_up(Cout8, 16)
    w_bytes = K * co_s * _round_up(KKCin, LANE) * 2
    best = None
    for td in range(1, min(Do, max_unroll) + 1):
        if Do % td:
            continue
        if (td * HoWo) % LANE:
            continue
        if K > 1 and td % (K - 1) and td < K - 1:
            continue                         # halo window not expressible for this tile
        halo = (K - 1) if (K > 1 and td % (K - 1) == 0) else td
        xa = td * kk_s * hw_l * 2            # bulk input block (bf16)
        xb = halo * kk_s * hw_l * 2          # halo input block (bf16)
        y = co_s * td * HoWo * 2             # bf16 conv-tile output block
        stats = 2 * Cout8 * LANE * 4
        yf = Cout8 * td * HoWo * 4           # f32 stats scratch (single-buffered)
        if 2 * (xa + xb + w_bytes + y + stats) + yf <= budget_bytes:
            best = td
    return best


def _pick_tile_s2(S, tile_sd, Cout8, out_itemsize, budget_bytes):
    """Largest multiple of the phase-1 spatial tile dividing S that fits phase 2's working set."""
    n = S // tile_sd
    co_s = _round_up(Cout8, 16)
    best = tile_sd
    for g in range(1, n + 1):
        if n % g:
            continue
        ts = g * tile_sd
        foot = 2 * (co_s * ts * 2 + Cout8 * ts * out_itemsize + 2 * Cout8 * LANE * 4)
        if foot <= budget_bytes:
            best = ts
    return best


def conv_block_forward(x, weight, bias, gamma, beta, *, stride=1, padding=1, tile_d=None):
    """x: (N, Cin, D, H, W) NCDHW, weight: (Cout, Cin, K, K, K) -> (N, Cout, Do, Ho, Wo)."""
    # Conv bias is exactly cancelled by InstanceNorm's mean subtraction (and does not change
    # the variance), so it is dropped from the fused kernel path.
    del bias
    # TODO(synk): Dropout3d is stochastic only in train mode; eval-mode identity here.

    N, Cin, D, H, W = x.shape
    Cout, _, K, _, _ = weight.shape
    if stride != 1:
        # TODO(synk): generalize the tap expansion / halo windows to stride > 1.
        raise NotImplementedError("Pallas ConvBlock path implements stride=1.")
    Do = D + 2 * padding - K + 1
    Ho = H + 2 * padding - K + 1
    Wo = W + 2 * padding - K + 1
    HoWo = Ho * Wo
    S = Do * HoWo
    KKCin = K * K * Cin                      # contraction width (kh, kw, cin) per kd tap
    Cout8 = _round_up(Cout, SUBLANE)         # sublane-padded output channels (sliced off at end)

    budget, vmem_limit = _vmem_budgets()
    if tile_d is None:
        tile_d = _pick_tile_d(Do, K, KKCin, Cout8, HoWo, budget)
    assert tile_d is not None and Do % tile_d == 0, "no valid depth tile for this shape"
    assert (tile_d * HoWo) % LANE == 0, "tile_d * Ho * Wo must be a multiple of 128"
    nDt = Do // tile_d
    TILE_SD = tile_d * HoWo

    if K > 1 and tile_d % (K - 1) == 0:
        halo = K - 1                         # exact halo window
    else:
        assert tile_d >= K - 1, "tile_d must be >= K-1 or a multiple of K-1"
        halo = tile_d                        # over-read fallback (still no HBM duplication pass)
    halo_step = tile_d // halo
    Dp_need = Do + halo

    # ---------------- wrapper-side layout prep (one cheap XLA pass) ----------------
    p = padding
    x_pad = jnp.pad(x, ((0, 0), (0, 0), (p, p), (p, p), (p, p)))       # (N, Cin, Dp, Hp, Wp)
    taps = [x_pad[:, :, :, kh:kh + Ho, kw:kw + Wo]                     # (N, Cin, Dp, Ho, Wo)
            for kh in range(K) for kw in range(K)]
    xe = jnp.stack(taps, axis=1)                                       # (N, K*K, Cin, Dp, Ho, Wo)
    xe = jnp.transpose(xe, (0, 3, 1, 2, 4, 5))                         # (N, Dp, K*K, Cin, Ho, Wo)
    Dp = D + 2 * p
    xe = xe.reshape(N, Dp, KKCin, HoWo).astype(jnp.bfloat16)
    if Dp_need > Dp:
        xe = jnp.pad(xe, ((0, 0), (0, Dp_need - Dp), (0, 0), (0, 0)))

    # weight (Cout, Cin, kd, kh, kw) -> (kd, Cout8, (kh, kw, cin)), zero-padded channels, bf16.
    w_r = jnp.transpose(weight, (2, 0, 3, 4, 1)).reshape(K, Cout, KKCin)
    w_r = jnp.pad(w_r, ((0, 0), (0, Cout8 - Cout), (0, 0))).astype(jnp.bfloat16)

    # ---------------- phase 1: conv tiles (bf16, channel-major) + per-tile (sum, M2) ----------
    def conv_stats_kernel(xa_ref, xb_ref, w_ref, y_ref, sum_ref, m2_ref, yf_ref):
        for dd in range(tile_d):
            acc = jnp.zeros((Cout8, HoWo), jnp.float32)        # ~2 vregs, stays in registers
            for kd in range(K):
                r = dd + kd
                tap = xa_ref[0, r] if r < tile_d else xb_ref[0, r - tile_d]   # (KKCin, HoWo)
                acc = acc + jnp.dot(w_ref[kd], tap, preferred_element_type=jnp.float32)
            yf_ref[:, dd * HoWo:(dd + 1) * HoWo] = acc
        yt = yf_ref[...]                                       # (Cout8, TILE_SD) f32
        y_ref[0] = yt.astype(y_ref.dtype)                      # lane-dense bf16 store
        s = jnp.sum(yt, axis=1, keepdims=True)                 # (Cout8, 1)
        mu = s * (1.0 / TILE_SD)
        d = yt - mu
        sum_ref[0, 0] = s
        m2_ref[0, 0] = jnp.sum(d * d, axis=1, keepdims=True)   # tile-local M2 (no cancellation)

    yconv, tsum, tm2 = pl.pallas_call(
        conv_stats_kernel,
        out_shape=(jax.ShapeDtypeStruct((N, Cout8, S), jnp.bfloat16),
                   jax.ShapeDtypeStruct((N, nDt, Cout8, 1), jnp.float32),
                   jax.ShapeDtypeStruct((N, nDt, Cout8, 1), jnp.float32)),
        grid_spec=pltpu.PrefetchScalarGridSpec(
            num_scalar_prefetch=0,
            grid=(N, nDt),
            in_specs=[
                # bulk depth rows of this tile
                pl.BlockSpec((1, tile_d, KKCin, HoWo), lambda n, d: (n, d, 0, 0)),
                # halo rows: second view of the SAME array, no wrapper-side duplication
                pl.BlockSpec((1, halo, KKCin, HoWo),
                             lambda n, d: (n, (d + 1) * halo_step, 0, 0)),
                # constant index -> the small weight block stays VMEM-resident
                pl.BlockSpec((K, Cout8, KKCin), lambda n, d: (0, 0, 0)),
            ],
            out_specs=[
                pl.BlockSpec((1, Cout8, TILE_SD), lambda n, d: (n, 0, d)),
                pl.BlockSpec((1, 1, Cout8, 1), lambda n, d: (n, d, 0, 0)),
                pl.BlockSpec((1, 1, Cout8, 1), lambda n, d: (n, d, 0, 0)),
            ],
            scratch_shapes=[pltpu.VMEM((Cout8, TILE_SD), jnp.float32)]),
        compiler_params=pltpu.CompilerParams(
            dimension_semantics=("parallel", "parallel"),
            vmem_limit_bytes=vmem_limit),
    )(xe, xe, w_r)

    # -------- tiny per-(sample, channel) Chan combine + fused scale/shift (plain XLA) --------
    s_td = tsum[..., 0]                                        # (N, nDt, Cout8)
    m2_td = tm2[..., 0]
    mean_t = s_td * (1.0 / TILE_SD)
    mean = jnp.sum(s_td, axis=1) * (1.0 / S)                   # (N, Cout8)
    dm = mean_t - mean[:, None, :]
    m2 = jnp.sum(m2_td, axis=1) + float(TILE_SD) * jnp.sum(dm * dm, axis=1)
    var = m2 * (1.0 / S)                                       # biased, like InstanceNorm3d
    rstd = jax.lax.rsqrt(var + EPS)
    gamma_p = jnp.zeros((Cout8,), jnp.float32).at[:Cout].set(gamma.astype(jnp.float32))
    beta_p = jnp.zeros((Cout8,), jnp.float32).at[:Cout].set(beta.astype(jnp.float32))
    scale = (gamma_p[None, :] * rstd)[:, :, None]              # (N, Cout8, 1)
    shift = (beta_p[None, :] - mean * gamma_p[None, :] * rstd)[:, :, None]

    # ---------------- phase 2: normalize (one mul+add) + LeakyReLU, streaming ----------------
    out_dtype = x.dtype
    TS2 = _pick_tile_s2(S, TILE_SD, Cout8, jnp.dtype(out_dtype).itemsize, budget)
    nS2 = S // TS2

    def norm_act_kernel(y_ref, sc_ref, sh_ref, o_ref):
        z = y_ref[0].astype(jnp.float32) * sc_ref[0] + sh_ref[0]   # (Cout8, TS2)
        o_ref[0] = jnp.where(z >= 0, z, NEG_SLOPE * z).astype(o_ref.dtype)

    out_p = pl.pallas_call(
        norm_act_kernel,
        out_shape=jax.ShapeDtypeStruct((N, Cout8, S), out_dtype),
        grid_spec=pltpu.PrefetchScalarGridSpec(
            num_scalar_prefetch=0,
            grid=(N, nS2),
            in_specs=[
                pl.BlockSpec((1, Cout8, TS2), lambda n, j: (n, 0, j)),
                pl.BlockSpec((1, Cout8, 1), lambda n, j: (n, 0, 0)),
                pl.BlockSpec((1, Cout8, 1), lambda n, j: (n, 0, 0)),
            ],
            out_specs=pl.BlockSpec((1, Cout8, TS2), lambda n, j: (n, 0, j))),
        compiler_params=pltpu.CompilerParams(
            dimension_semantics=("parallel", "parallel"),
            vmem_limit_bytes=vmem_limit),
    )(yconv, scale, shift)

    # channel-major throughout: the NCDHW result is just a slice + reshape (no transpose).
    return out_p[:, :Cout, :].reshape(N, Cout, Do, Ho, Wo)


def reference_forward(x, weight, bias, gamma, beta, *, stride=1, padding=1):
    """Plain-JAX reference matching the PyTorch forward (eval-mode dropout)."""
    y = jax.lax.conv_general_dilated(
        x, weight, window_strides=(stride,) * 3,
        padding=[(padding, padding)] * 3,
        dimension_numbers=('NCDHW', 'OIDHW', 'NCDHW'),
        precision=jax.lax.Precision.HIGHEST)
    y = y + bias.reshape(1, -1, 1, 1, 1)
    mean = jnp.mean(y, axis=(2, 3, 4), keepdims=True)
    var = jnp.mean((y - mean) ** 2, axis=(2, 3, 4), keepdims=True)
    yn = (y - mean) * jax.lax.rsqrt(var + EPS)
    yn = yn * gamma.reshape(1, -1, 1, 1, 1) + beta.reshape(1, -1, 1, 1, 1)
    return jnp.where(yn >= 0, yn, NEG_SLOPE * yn)


if __name__ == "__main__":
    # Small shapes consistent with ConvBlock(4, 8, kernel_size=3, stride=1, padding=1)
    N, Cin, Cout, D, H, W, K = 2, 4, 8, 16, 16, 16, 3
    key = jax.random.PRNGKey(0)
    kx, kw, kb, kg, kbeta = jax.random.split(key, 5)

    x = jax.random.normal(kx, (N, Cin, D, H, W), dtype=jnp.float32)
    weight = jax.random.normal(kw, (Cout, Cin, K, K, K), dtype=jnp.float32) * 0.1
    bias = jax.random.normal(kb, (Cout,), dtype=jnp.float32) * 0.1
    gamma = 1.0 + 0.1 * jax.random.normal(kg, (Cout,), dtype=jnp.float32)
    beta = 0.1 * jax.random.normal(kbeta, (Cout,), dtype=jnp.float32)

    fwd = jax.jit(functools.partial(conv_block_forward, stride=1, padding=1))
    out = jax.block_until_ready(fwd(x, weight, bias, gamma, beta))
    assert out.shape == (N, Cout, D, H, W), out.shape
    assert bool(jnp.all(jnp.isfinite(out)))

    # f32 reference (matches the PyTorch forward); tolerance covers the intentional bf16
    # matmul operands and bf16 intermediate conv volume.
    ref = reference_forward(x, weight, bias, gamma, beta, stride=1, padding=1)
    max_err = float(jnp.max(jnp.abs(out - ref)))
    assert jnp.allclose(out, ref, atol=3e-2, rtol=3e-2), max_err

    print("KERNEL_OK")
</pallas_src>

<mosaic_0001>
module attributes {stable_mosaic.version = 11 : i64} {
  func.func @conv_stats_kernel(%arg0: i32, %arg1: i32, %arg2: memref<1x16x36x256xbf16, #tpu.memory_space<vmem>>, %arg3: memref<1x2x36x256xbf16, #tpu.memory_space<vmem>>, %arg4: memref<3x8x36xbf16, #tpu.memory_space<vmem>>, %arg5: memref<1x8x4096xbf16, #tpu.memory_space<vmem>>, %arg6: memref<1x1x8x1xf32, #tpu.memory_space<vmem>>, %arg7: memref<1x1x8x1xf32, #tpu.memory_space<vmem>>, %arg8: memref<8x4096xf32, #tpu.memory_space<vmem>>) attributes {dimension_semantics = [#tpu.dimension_semantics<parallel>, #tpu.dimension_semantics<parallel>], iteration_bounds = array<i64: 2, 1>, scalar_prefetch = 0 : i64, scratch_operands = 1 : i64, tpu.core_type = #tpu.core_type<tc>, window_params = [{transform_indices = @transform_0, window_bounds = array<i64: 1, 16, 36, 256>}, {transform_indices = @transform_1, window_bounds = array<i64: 1, 2, 36, 256>}, {pipeline_mode = #tpu.pipeline_mode<synchronous>, transform_indices = @transform_2, window_bounds = array<i64: 3, 8, 36>}, {transform_indices = @transform_3, window_bounds = array<i64: 1, 8, 4096>}, {transform_indices = @transform_4, window_bounds = array<i64: 1, 1, 8, 1>}, {transform_indices = @transform_5, window_bounds = array<i64: 1, 1, 8, 1>}]} {
    %cst = arith.constant 0.000000e+00 : f32
    %0 = vector.broadcast %cst : f32 to vector<8x256xf32>
    %c0 = arith.constant 0 : index
    %c0_0 = arith.constant 0 : index
    %c0_1 = arith.constant 0 : index
    %c0_2 = arith.constant 0 : index
    %1 = vector.load %arg2[%c0, %c0_0, %c0_1, %c0_2] : memref<1x16x36x256xbf16, #tpu.memory_space<vmem>>, vector<1x1x36x256xbf16>
    %2 = vector.shape_cast %1 : vector<1x1x36x256xbf16> to vector<36x256xbf16>
    %c0_3 = arith.constant 0 : index
    %c0_4 = arith.constant 0 : index
    %c0_5 = arith.constant 0 : index
    %3 = vector.load %arg4[%c0_3, %c0_4, %c0_5] : memref<3x8x36xbf16, #tpu.memory_space<vmem>>, vector<1x8x36xbf16>
    %4 = vector.shape_cast %3 : vector<1x8x36xbf16> to vector<8x36xbf16>
    %cst_6 = arith.constant dense<0.000000e+00> : vector<8x256xf32>
    %5 = tpu.matmul %4, %2, %cst_6 {dimension_numbers = #tpu.dot_dimension_numbers<[1], [0], [0], [1], [0, 0, 1, 1], [], []>} : vector<8x36xbf16>, vector<36x256xbf16>, vector<8x256xf32> -> vector<8x256xf32>
    %6 = arith.addf %0, %5 : vector<8x256xf32>
    %c0_7 = arith.constant 0 : index
    %c1 = arith.constant 1 : index
    %c0_8 = arith.constant 0 : index
    %c0_9 = arith.constant 0 : index
    %7 = vector.load %arg2[%c0_7, %c1, %c0_8, %c0_9] : memref<1x16x36x256xbf16, #tpu.memory_space<vmem>>, vector<1x1x36x256xbf16>
    %8 = vector.shape_cast %7 : vector<1x1x36x256xbf16> to vector<36x256xbf16>
    %c1_10 = arith.constant 1 : index
    %c0_11 = arith.constant 0 : index
    %c0_12 = arith.constant 0 : index
    %9 = vector.load %arg4[%c1_10, %c0_11, %c0_12] : memref<3x8x36xbf16, #tpu.memory_space<vmem>>, vector<1x8x36xbf16>
    %10 = vector.shape_cast %9 : vector<1x8x36xbf16> to vector<8x36xbf16>
    %cst_13 = arith.constant dense<0.000000e+00> : vector<8x256xf32>
    %11 = tpu.matmul %10, %8, %cst_13 {dimension_numbers = #tpu.dot_dimension_numbers<[1], [0], [0], [1], [0, 0, 1, 1], [], []>} : vector<8x36xbf16>, vector<36x256xbf16>, vector<8x256xf32> -> vector<8x256xf32>
    %12 = arith.addf %6, %11 : vector<8x256xf32>
    %c0_14 = arith.constant 0 : index
    %c2 = arith.constant 2 : index
    %c0_15 = arith.constant 0 : index
    %c0_16 = arith.constant 0 : index
    %13 = vector.load %arg2[%c0_14, %c2, %c0_15, %c0_16] : memref<1x16x36x256xbf16, #tpu.memory_space<vmem>>, vector<1x1x36x256xbf16>
    %14 = vector.shape_cast %13 : vector<1x1x36x256xbf16> to vector<36x256xbf16>
    %c2_17 = arith.constant 2 : index
    %c0_18 = arith.constant 0 : index
    %c0_19 = arith.constant 0 : index
    %15 = vector.load %arg4[%c2_17, %c0_18, %c0_19] : memref<3x8x36xbf16, #tpu.memory_space<vmem>>, vector<1x8x36xbf16>
    %16 = vector.shape_cast %15 : vector<1x8x36xbf16> to vector<8x36xbf16>
    %cst_20 = arith.constant dense<0.000000e+00> : vector<8x256xf32>
    %17 = tpu.matmul %16, %14, %cst_20 {dimension_numbers = #tpu.dot_dimension_numbers<[1], [0], [0], [1], [0, 0, 1, 1], [], []>} : vector<8x36xbf16>, vector<36x256xbf16>, vector<8x256xf32> -> vector<8x256xf32>
    %18 = arith.addf %12, %17 : vector<8x256xf32>
    %c0_21 = arith.constant 0 : index
    %c0_22 = arith.constant 0 : index
    %19 = vector.load %arg8[%c0_21, %c0_22] : memref<8x4096xf32, #tpu.memory_space<vmem>>, vector<8x256xf32>
    tpu.vector_store %arg8[%c0_21, %c0_22], %18 {strides = array<i32>} : memref<8x4096xf32, #tpu.memory_space<vmem>>, vector<8x256xf32>,
    %cst_23 = arith.constant 0.000000e+00 : f32
    %20 = vector.broadcast %cst_23 : f32 to vector<8x256xf32>
    %c0_24 = arith.constant 0 : index
    %c1_25 = arith.constant 1 : index
    %c0_26 = arith.constant 0 : index
    %c0_27 = arith.constant 0 : index
    %21 = vector.load %arg2[%c0_24, %c1_25, %c0_26, %c0_27] : memref<1x16x36x256xbf16, #tpu.memory_space<vmem>>, vector<1x1x36x256xbf16>
    %22 = vector.shape_cast %21 : vector<1x1x36x256xbf16> to vector<36x256xbf16>
    %c0_28 = arith.constant 0 : index
    %c0_29 = arith.constant 0 : index
    %c0_30 = arith.constant 0 : index
    %23 = vector.load %arg4[%c0_28, %c0_29, %c0_30] : memref<3x8x36xbf16, #tpu.memory_space<vmem>>, vector<1x8x36xbf16>
    %24 = vector.shape_cast %23 : vector<1x8x36xbf16> to vector<8x36xbf16>
    %cst_31 = arith.constant dense<0.000000e+00> : vector<8x256xf32>
    %25 = tpu.matmul %24, %22, %cst_31 {dimension_numbers = #tpu.dot_dimension_numbers<[1], [0], [0], [1], [0, 0, 1, 1], [], []>} : vector<8x36xbf16>, vector<36x256xbf16>, vector<8x256xf32> -> vector<8x256xf32>
    %26 = arith.addf %20, %25 : vector<8x256xf32>
    %c0_32 = arith.constant 0 : index
    %c2_33 = arith.constant 2 : index
    %c0_34 = arith.constant 0 : index
    %c0_35 = arith.constant 0 : index
    %27 = vector.load %arg2[%c0_32, %c2_33, %c0_34, %c0_35] : memref<1x16x36x256xbf16, #tpu.memory_space<vmem>>, vector<1x1x36x256xbf16>
    %28 = vector.shape_cast %27 : vector<1x1x36x256xbf16> to vector<36x256xbf16>
    %c1_36 = arith.constant 1 : index
    %c0_37 = arith.constant 0 : index
    %c0_38 = arith.constant 0 : index
    %29 = vector.load %arg4[%c1_36, %c0_37, %c0_38] : memref<3x8x36xbf16, #tpu.memory_space<vmem>>, vector<1x8x36xbf16>
    %30 = vector.shape_cast %29 : vector<1x8x36xbf16> to vector<8x36xbf16>
    %cst_39 = arith.constant dense<0.000000e+00> : vector<8x256xf32>
    %31 = tpu.matmul %30, %28, %cst_39 {dimension_numbers = #tpu.dot_dimension_numbers<[1], [0], [0], [1], [0, 0, 1, 1], [], []>} : vector<8x36xbf16>, vector<36x256xbf16>, vector<8x256xf32> -> vector<8x256xf32>
    %32 = arith.addf %26, %31 : vector<8x256xf32>
    %c0_40 = arith.constant 0 : index
    %c3 = arith.constant 3 : index
    %c0_41 = arith.constant 0 : index
    %c0_42 = arith.constant 0 : index
    %33 = vector.load %arg2[%c0_40, %c3, %c0_41, %c0_42] : memref<1x16x36x256xbf16, #tpu.memory_space<vmem>>, vector<1x1x36x256xbf16>
    %34 = vector.shape_cast %33 : vector<1x1x36x256xbf16> to vector<36x256xbf16>
    %c2_43 = arith.constant 2 : index
    %c0_44 = arith.constant 0 : index
    %c0_45 = arith.constant 0 : index
    %35 = vector.load %arg4[%c2_43, %c0_44, %c0_45] : memref<3x8x36xbf16, #tpu.memory_space<vmem>>, vector<1x8x36xbf16>
    %36 = vector.shape_cast %35 : vector<1x8x36xbf16> to vector<8x36xbf16>
    %cst_46 = arith.constant dense<0.000000e+00> : vector<8x256xf32>
    %37 = tpu.matmul %36, %34, %cst_46 {dimension_numbers = #tpu.dot_dimension_numbers<[1], [0], [0], [1], [0, 0, 1, 1], [], []>} : vector<8x36xbf16>, vector<36x256xbf16>, vector<8x256xf32> -> vector<8x256xf32>
    %38 = arith.addf %32, %37 : vector<8x256xf32>
    %c0_47 = arith.constant 0 : index
    %c256 = arith.constant 256 : index
    %39 = vector.load %arg8[%c0_47, %c256] : memref<8x4096xf32, #tpu.memory_space<vmem>>, vector<8x256xf32>
    tpu.vector_store %arg8[%c0_47, %c256], %38 {strides = array<i32>} : memref<8x4096xf32, #tpu.memory_space<vmem>>, vector<8x256xf32>,
    %cst_48 = arith.constant 0.000000e+00 : f32
    %40 = vector.broadcast %cst_48 : f32 to vector<8x256xf32>
    %c0_49 = arith.constant 0 : index
    %c2_50 = arith.constant 2 : index
    %c0_51 = arith.constant 0 : index
    %c0_52 = arith.constant 0 : index
    %41 = vector.load %arg2[%c0_49, %c2_50, %c0_51, %c0_52] : memref<1x16x36x256xbf16, #tpu.memory_space<vmem>>, vector<1x1x36x256xbf16>
    %42 = vector.shape_cast %41 : vector<1x1x36x256xbf16> to vector<36x256xbf16>
    %c0_53 = arith.constant 0 : index
    %c0_54 = arith.constant 0 : index
    %c0_55 = arith.constant 0 : index
    %43 = vector.load %arg4[%c0_53, %c0_54, %c0_55] : memref<3x8x36xbf16, #tpu.memory_space<vmem>>, vector<1x8x36xbf16>
    %44 = vector.shape_cast %43 : vector<1x8x36xbf16> to vector<8x36xbf16>
    %cst_56 = arith.constant dense<0.000000e+00> : vector<8x256xf32>
    %45 = tpu.matmul %44, %42, %cst_56 {dimension_numbers = #tpu.dot_dimension_numbers<[1], [0], [0], [1], [0, 0, 1, 1], [], []>} : vector<8x36xbf16>, vector<36x256xbf16>, vector<8x256xf32> -> vector<8x256xf32>
    %46 = arith.addf %40, %45 : vector<8x256xf32>
    %c0_57 = arith.constant 0 : index
    %c3_58 = arith.constant 3 : index
    %c0_59 = arith.constant 0 : index
    %c0_60 = arith.constant 0 : index
    %47 = vector.load %arg2[%c0_57, %c3_58, %c0_59, %c0_60] : memref<1x16x36x256xbf16, #tpu.memory_space<vmem>>, vector<1x1x36x256xbf16>
    %48 = vector.shape_cast %47 : vector<1x1x36x256xbf16> to vector<36x256xbf16>
    %c1_61 = arith.constant 1 : index
    %c0_62 = arith.constant 0 : index
    %c0_63 = arith.constant 0 : index
    %49 = vector.load %arg4[%c1_61, %c0_62, %c0_63] : memref<3x8x36xbf16, #tpu.memory_space<vmem>>, vector<1x8x36xbf16>
    %50 = vector.shape_cast %49 : vector<1x8x36xbf16> to vector<8x36xbf16>
    %cst_64 = arith.constant dense<0.000000e+00> : vector<8x256xf32>
    %51 = tpu.matmul %50, %48, %cst_64 {dimension_numbers = #tpu.dot_dimension_numbers<[1], [0], [0], [1], [0, 0, 1, 1], [], []>} : vector<8x36xbf16>, vector<36x256xbf16>, vector<8x256xf32> -> vector<8x256xf32>
    %52 = arith.addf %46, %51 : vector<8x256xf32>
    %c0_65 = arith.constant 0 : index
    %c4 = arith.constant 4 : index
    %c0_66 = arith.constant 0 : index
    %c0_67 = arith.constant 0 : index
    %53 = vector.load %arg2[%c0_65, %c4, %c0_66, %c0_67] : memref<1x16x36x256xbf16, #tpu.memory_space<vmem>>, vector<1x1x36x256xbf16>
    %54 = vector.shape_cast %53 : vector<1x1x36x256xbf16> to vector<36x256xbf16>
    %c2_68 = arith.constant 2 : index
    %c0_69 = arith.constant 0 : index
    %c0_70 = arith.constant 0 : index
    %55 = vector.load %arg4[%c2_68, %c0_69, %c0_70] : memref<3x8x36xbf16, #tpu.memory_space<vmem>>, vector<1x8x36xbf16>
    %56 = vector.shape_cast %55 : vector<1x8x36xbf16> to vector<8x36xbf16>
    %cst_71 = arith.constant dense<0.000000e+00> : vector<8x256xf32>
    %57 = tpu.matmul %56, %54, %cst_71 {dimension_numbers = #tpu.dot_dimension_numbers<[1], [0], [0], [1], [0, 0, 1, 1], [], []>} : vector<8x36xbf16>, vector<36x256xbf16>, vector<8x256xf32> -> vector<8x256xf32>
    %58 = arith.addf %52, %57 : vector<8x256xf32>
    %c0_72 = arith.constant 0 : index
    %c512 = arith.constant 512 : index
    %59 = vector.load %arg8[%c0_72, %c512] : memref<8x4096xf32, #tpu.memory_space<vmem>>, vector<8x256xf32>
    tpu.vector_store %arg8[%c0_72, %c512], %58 {strides = array<i32>} : memref<8x4096xf32, #tpu.memory_space<vmem>>, vector<8x256xf32>,
    %cst_73 = arith.constant 0.000000e+00 : f32
    %60 = vector.broadcast %cst_73 : f32 to vector<8x256xf32>
    %c0_74 = arith.constant 0 : index
    %c3_75 = arith.constant 3 : index
    %c0_76 = arith.constant 0 : index
    %c0_77 = arith.constant 0 : index
    %61 = vector.load %arg2[%c0_74, %c3_75, %c0_76, %c0_77] : memref<1x16x36x256xbf16, #tpu.memory_space<vmem>>, vector<1x1x36x256xbf16>
    %62 = vector.shape_cast %61 : vector<1x1x36x256xbf16> to vector<36x256xbf16>
    %c0_78 = arith.constant 0 : index
    %c0_79 = arith.constant 0 : index
    %c0_80 = arith.constant 0 : index
    %63 = vector.load %arg4[%c0_78, %c0_79, %c0_80] : memref<3x8x36xbf16, #tpu.memory_space<vmem>>, vector<1x8x36xbf16>
    %64 = vector.shape_cast %63 : vector<1x8x36xbf16> to vector<8x36xbf16>
    %cst_81 = arith.constant dense<0.000000e+00> : vector<8x256xf32>
    %65 = tpu.matmul %64, %62, %cst_81 {dimension_numbers = #tpu.dot_dimension_numbers<[1], [0], [0], [1], [0, 0, 1, 1], [], []>} : vector<8x36xbf16>, vector<36x256xbf16>, vector<8x256xf32> -> vector<8x256xf32>
    %66 = arith.addf %60, %65 : vector<8x256xf32>
    %c0_82 = arith.constant 0 : index
    %c4_83 = arith.constant 4 : index
    %c0_84 = arith.constant 0 : index
    %c0_85 = arith.constant 0 : index
    %67 = vector.load %arg2[%c0_82, %c4_83, %c0_84, %c0_85] : memref<1x16x36x256xbf16, #tpu.memory_space<vmem>>, vector<1x1x36x256xbf16>
    %68 = vector.shape_cast %67 : vector<1x1x36x256xbf16> to vector<36x256xbf16>
    %c1_86 = arith.constant 1 : index
    %c0_87 = arith.constant 0 : index
    %c0_88 = arith.constant 0 : index
    %69 = vector.load %arg4[%c1_86, %c0_87, %c0_88] : memref<3x8x36xbf16, #tpu.memory_space<vmem>>, vector<1x8x36xbf16>
    %70 = vector.shape_cast %69 : vector<1x8x36xbf16> to vector<8x36xbf16>
    %cst_89 = arith.constant dense<0.000000e+00> : vector<8x256xf32>
    %71 = tpu.matmul %70, %68, %cst_89 {dimension_numbers = #tpu.dot_dimension_numbers<[1], [0], [0], [1], [0, 0, 1, 1], [], []>} : vector<8x36xbf16>, vector<36x256xbf16>, vector<8x256xf32> -> vector<8x256xf32>
    %72 = arith.addf %66, %71 : vector<8x256xf32>
    %c0_90 = arith.constant 0 : index
    %c5 = arith.constant 5 : index
    %c0_91 = arith.constant 0 : index
    %c0_92 = arith.constant 0 : index
    %73 = vector.load %arg2[%c0_90, %c5, %c0_91, %c0_92] : memref<1x16x36x256xbf16, #tpu.memory_space<vmem>>, vector<1x1x36x256xbf16>
    %74 = vector.shape_cast %73 : vector<1x1x36x256xbf16> to vector<36x256xbf16>
    %c2_93 = arith.constant 2 : index
    %c0_94 = arith.constant 0 : index
    %c0_95 = arith.constant 0 : index
    %75 = vector.load %arg4[%c2_93, %c0_94, %c0_95] : memref<3x8x36xbf16, #tpu.memory_space<vmem>>, vector<1x8x36xbf16>
    %76 = vector.shape_cast %75 : vector<1x8x36xbf16> to vector<8x36xbf16>
    %cst_96 = arith.constant dense<0.000000e+00> : vector<8x256xf32>
    %77 = tpu.matmul %76, %74, %cst_96 {dimension_numbers = #tpu.dot_dimension_numbers<[1], [0], [0], [1], [0, 0, 1, 1], [], []>} : vector<8x36xbf16>, vector<36x256xbf16>, vector<8x256xf32> -> vector<8x256xf32>
    %78 = arith.addf %72, %77 : vector<8x256xf32>
    %c0_97 = arith.constant 0 : index
    %c768 = arith.constant 768 : index
    %79 = vector.load %arg8[%c0_97, %c768] : memref<8x4096xf32, #tpu.memory_space<vmem>>, vector<8x256xf32>
    tpu.vector_store %arg8[%c0_97, %c768], %78 {strides = array<i32>} : memref<8x4096xf32, #tpu.memory_space<vmem>>, vector<8x256xf32>,
    %cst_98 = arith.constant 0.000000e+00 : f32
    %80 = vector.broadcast %cst_98 : f32 to vector<8x256xf32>
    %c0_99 = arith.constant 0 : index
    %c4_100 = arith.constant 4 : index
    %c0_101 = arith.constant 0 : index
    %c0_102 = arith.constant 0 : index
    %81 = vector.load %arg2[%c0_99, %c4_100, %c0_101, %c0_102] : memref<1x16x36x256xbf16, #tpu.memory_space<vmem>>, vector<1x1x36x256xbf16>
    %82 = vector.shape_cast %81 : vector<1x1x36x256xbf16> to vector<36x256xbf16>
    %c0_103 = arith.constant 0 : index
    %c0_104 = arith.constant 0 : index
    %c0_105 = arith.constant 0 : index
    %83 = vector.load %arg4[%c0_103, %c0_104, %c0_105] : memref<3x8x36xbf16, #tpu.memory_space<vmem>>, vector<1x8x36xbf16>
    %84 = vector.shape_cast %83 : vector<1x8x36xbf16> to vector<8x36xbf16>
    %cst_106 = arith.constant dense<0.000000e+00> : vector<8x256xf32>
    %85 = tpu.matmul %84, %82, %cst_106 {dimension_numbers = #tpu.dot_dimension_numbers<[1], [0], [0], [1], [0, 0, 1, 1], [], []>} : vector<8x36xbf16>, vector<36x256xbf16>, vector<8x256xf32> -> vector<8x256xf32>
    %86 = arith.addf %80, %85 : vector<8x256xf32>
    %c0_107 = arith.constant 0 : index
    %c5_108 = arith.constant 5 : index
    %c0_109 = arith.constant 0 : index
    %c0_110 = arith.constant 0 : index
    %87 = vector.load %arg2[%c0_107, %c5_108, %c0_109, %c0_110] : memref<1x16x36x256xbf16, #tpu.memory_space<vmem>>, vector<1x1x36x256xbf16>
    %88 = vector.shape_cast %87 : vector<1x1x36x256xbf16> to vector<36x256xbf16>
    %c1_111 = arith.constant 1 : index
    %c0_112 = arith.constant 0 : index
    %c0_113 = arith.constant 0 : index
    %89 = vector.load %arg4[%c1_111, %c0_112, %c0_113] : memref<3x8x36xbf16, #tpu.memory_space<vmem>>, vector<1x8x36xbf16>
    %90 = vector.shape_cast %89 : vector<1x8x36xbf16> to vector<8x36xbf16>
    %cst_114 = arith.constant dense<0.000000e+00> : vector<8x256xf32>
    %91 = tpu.matmul %90, %88, %cst_114 {dimension_numbers = #tpu.dot_dimension_numbers<[1], [0], [0], [1], [0, 0, 1, 1], [], []>} : vector<8x36xbf16>, vector<36x256xbf16>, vector<8x256xf32> -> vector<8x256xf32>
    %92 = arith.addf %86, %91 : vector<8x256xf32>
    %c0_115 = arith.constant 0 : index
    %c6 = arith.constant 6 : index
    %c0_116 = arith.constant 0 : index
    %c0_117 = arith.constant 0 : index
    %93 = vector.load %arg2[%c0_115, %c6, %c0_116, %c0_117] : memref<1x16x36x256xbf16, #tpu.memory_space<vmem>>, vector<1x1x36x256xbf16>
    %94 = vector.shape_cast %93 : vector<1x1x36x256xbf16> to vector<36x256xbf16>
    %c2_118 = arith.constant 2 : index
    %c0_119 = arith.constant 0 : index
    %c0_120 = arith.constant 0 : index
    %95 = vector.load %arg4[%c2_118, %c0_119, %c0_120] : memref<3x8x36xbf16, #tpu.memory_space<vmem>>, vector<1x8x36xbf16>
    %96 = vector.shape_cast %95 : vector<1x8x36xbf16> to vector<8x36xbf16>
    %cst_121 = arith.constant dense<0.000000e+00> : vector<8x256xf32>
    %97 = tpu.matmul %96, %94, %cst_121 {dimension_numbers = #tpu.dot_dimension_numbers<[1], [0], [0], [1], [0, 0, 1, 1], [], []>} : vector<8x36xbf16>, vector<36x256xbf16>, vector<8x256xf32> -> vector<8x256xf32>
    %98 = arith.addf %92, %97 : vector<8x256xf32>
    %c0_122 = arith.constant 0 : index
    %c1024 = arith.constant 1024 : index
    %99 = vector.load %arg8[%c0_122, %c1024] : memref<8x4096xf32, #tpu.memory_space<vmem>>, vector<8x256xf32>
    tpu.vector_store %arg8[%c0_122, %c1024], %98 {strides = array<i32>} : memref<8x4096xf32, #tpu.memory_space<vmem>>, vector<8x256xf32>,
    %cst_123 = arith.constant 0.000000e+00 : f32
    %100 = vector.broadcast %cst_123 : f32 to vector<8x256xf32>
    %c0_124 = arith.constant 0 : index
    %c5_125 = arith.constant 5 : index
    %c0_126 = arith.constant 0 : index
    %c0_127 = arith.constant 0 : index
    %101 = vector.load %arg2[%c0_124, %c5_125, %c0_126, %c0_127] : memref<1x16x36x256xbf16, #tpu.memory_space<vmem>>, vector<1x1x36x256xbf16>
    %102 = vector.shape_cast %101 : vector<1x1x36x256xbf16> to vector<36x256xbf16>
    %c0_128 = arith.constant 0 : index
    %c0_129 = arith.constant 0 : index
    %c0_130 = arith.constant 0 : index
    %103 = vector.load %arg4[%c0_128, %c0_129, %c0_130] : memref<3x8x36xbf16, #tpu.memory_space<vmem>>, vector<1x8x36xbf16>
    %104 = vector.shape_cast %103 : vector<1x8x36xbf16> to vector<8x36xbf16>
    %cst_131 = arith.constant dense<0.000000e+00> : vector<8x256xf32>
    %105 = tpu.matmul %104, %102, %cst_131 {dimension_numbers = #tpu.dot_dimension_numbers<[1], [0], [0], [1], [0, 0, 1, 1], [], []>} : vector<8x36xbf16>, vector<36x256xbf16>, vector<8x256xf32> -> vector<8x256xf32>
    %106 = arith.addf %100, %105 : vector<8x256xf32>
    %c0_132 = arith.constant 0 : index
    %c6_133 = arith.constant 6 : index
    %c0_134 = arith.constant 0 : index
    %c0_135 = arith.constant 0 : index
    %107 = vector.load %arg2[%c0_132, %c6_133, %c0_134, %c0_135] : memref<1x16x36x256xbf16, #tpu.memory_space<vmem>>, vector<1x1x36x256xbf16>
    %108 = vector.shape_cast %107 : vector<1x1x36x256xbf16> to vector<36x256xbf16>
    %c1_136 = arith.constant 1 : index
    %c0_137 = arith.constant 0 : index
    %c0_138 = arith.constant 0 : index
    %109 = vector.load %arg4[%c1_136, %c0_137, %c0_138] : memref<3x8x36xbf16, #tpu.memory_space<vmem>>, vector<1x8x36xbf16>
    %110 = vector.shape_cast %109 : vector<1x8x36xbf16> to vector<8x36xbf16>
    %cst_139 = arith.constant dense<0.000000e+00> : vector<8x256xf32>
    %111 = tpu.matmul %110, %108, %cst_139 {dimension_numbers = #tpu.dot_dimension_numbers<[1], [0], [0], [1], [0, 0, 1, 1], [], []>} : vector<8x36xbf16>, vector<36x256xbf16>, vector<8x256xf32> -> vector<8x256xf32>
    %112 = arith.addf %106, %111 : vector<8x256xf32>
    %c0_140 = arith.constant 0 : index
    %c7 = arith.constant 7 : index
    %c0_141 = arith.constant 0 : index
    %c0_142 = arith.constant 0 : index
    %113 = vector.load %arg2[%c0_140, %c7, %c0_141, %c0_142] : memref<1x16x36x256xbf16, #tpu.memory_space<vmem>>, vector<1x1x36x256xbf16>
    %114 = vector.shape_cast %113 : vector<1x1x36x256xbf16> to vector<36x256xbf16>
    %c2_143 = arith.constant 2 : index
    %c0_144 = arith.constant 0 : index
    %c0_145 = arith.constant 0 : index
    %115 = vector.load %arg4[%c2_143, %c0_144, %c0_145] : memref<3x8x36xbf16, #tpu.memory_space<vmem>>, vector<1x8x36xbf16>
    %116 = vector.shape_cast %115 : vector<1x8x36xbf16> to vector<8x36xbf16>
    %cst_146 = arith.constant dense<0.000000e+00> : vector<8x256xf32>
    %117 = tpu.matmul %116, %114, %cst_146 {dimension_numbers = #tpu.dot_dimension_numbers<[1], [0], [0], [1], [0, 0, 1, 1], [], []>} : vector<8x36xbf16>, vector<36x256xbf16>, vector<8x256xf32> -> vector<8x256xf32>
    %118 = arith.addf %112, %117 : vector<8x256xf32>
    %c0_147 = arith.constant 0 : index
    %c1280 = arith.constant 1280 : index
    %119 = vector.load %arg8[%c0_147, %c1280] : memref<8x4096xf32, #tpu.memory_space<vmem>>, vector<8x256xf32>
    tpu.vector_store %arg8[%c0_147, %c1280], %118 {strides = array<i32>} : memref<8x4096xf32, #tpu.memory_space<vmem>>, vector<8x256xf32>,
    %cst_148 = arith.constant 0.000000e+00 : f32
    %120 = vector.broadcast %cst_148 : f32 to vector<8x256xf32>
    %c0_149 = arith.constant 0 : index
    %c6_150 = arith.constant 6 : index
    %c0_151 = arith.constant 0 : index
    %c0_152 = arith.constant 0 : index
    %121 = vector.load %arg2[%c0_149, %c6_150, %c0_151, %c0_152] : memref<1x16x36x256xbf16, #tpu.memory_space<vmem>>, vector<1x1x36x256xbf16>
    %122 = vector.shape_cast %121 : vector<1x1x36x256xbf16> to vector<36x256xbf16>
    %c0_153 = arith.constant 0 : index
    %c0_154 = arith.constant 0 : index
    %c0_155 = arith.constant 0 : index
    %123 = vector.load %arg4[%c0_153, %c0_154, %c0_155] : memref<3x8x36xbf16, #tpu.memory_space<vmem>>, vector<1x8x36xbf16>
    %124 = vector.shape_cast %123 : vector<1x8x36xbf16> to vector<8x36xbf16>
    %cst_156 = arith.constant dense<0.000000e+00> : vector<8x256xf32>
    %125 = tpu.matmul %124, %122, %cst_156 {dimension_numbers = #tpu.dot_dimension_numbers<[1], [0], [0], [1], [0, 0, 1, 1], [], []>} : vector<8x36xbf16>, vector<36x256xbf16>, vector<8x256xf32> -> vector<8x256xf32>
    %126 = arith.addf %120, %125 : vector<8x256xf32>
    %c0_157 = arith.constant 0 : index
    %c7_158 = arith.constant 7 : index
    %c0_159 = arith.constant 0 : index
    %c0_160 = arith.constant 0 : index
    %127 = vector.load %arg2[%c0_157, %c7_158, %c0_159, %c0_160] : memref<1x16x36x256xbf16, #tpu.memory_space<vmem>>, vector<1x1x36x256xbf16>
    %128 = vector.shape_cast %127 : vector<1x1x36x256xbf16> to vector<36x256xbf16>
    %c1_161 = arith.constant 1 : index
    %c0_162 = arith.constant 0 : index
    %c0_163 = arith.constant 0 : index
    %129 = vector.load %arg4[%c1_161, %c0_162, %c0_163] : memref<3x8x36xbf16, #tpu.memory_space<vmem>>, vector<1x8x36xbf16>
    %130 = vector.shape_cast %129 : vector<1x8x36xbf16> to vector<8x36xbf16>
    %cst_164 = arith.constant dense<0.000000e+00> : vector<8x256xf32>
    %131 = tpu.matmul %130, %128, %cst_164 {dimension_numbers = #tpu.dot_dimension_numbers<[1], [0], [0], [1], [0, 0, 1, 1], [], []>} : vector<8x36xbf16>, vector<36x256xbf16>, vector<8x256xf32> -> vector<8x256xf32>
    %132 = arith.addf %126, %131 : vector<8x256xf32>
    %c0_165 = arith.constant 0 : index
    %c8 = arith.constant 8 : index
    %c0_166 = arith.constant 0 : index
    %c0_167 = arith.constant 0 : index
    %133 = vector.load %arg2[%c0_165, %c8, %c0_166, %c0_167] : memref<1x16x36x256xbf16, #tpu.memory_space<vmem>>, vector<1x1x36x256xbf16>
    %134 = vector.shape_cast %133 : vector<1x1x36x256xbf16> to vector<36x256xbf16>
    %c2_168 = arith.constant 2 : index
    %c0_169 = arith.constant 0 : index
    %c0_170 = arith.constant 0 : index
    %135 = vector.load %arg4[%c2_168, %c0_169, %c0_170] : memref<3x8x36xbf16, #tpu.memory_space<vmem>>, vector<1x8x36xbf16>
    %136 = vector.shape_cast %135 : vector<1x8x36xbf16> to vector<8x36xbf16>
    %cst_171 = arith.constant dense<0.000000e+00> : vector<8x256xf32>
    %137 = tpu.matmul %136, %134, %cst_171 {dimension_numbers = #tpu.dot_dimension_numbers<[1], [0], [0], [1], [0, 0, 1, 1], [], []>} : vector<8x36xbf16>, vector<36x256xbf16>, vector<8x256xf32> -> vector<8x256xf32>
    %138 = arith.addf %132, %137 : vector<8x256xf32>
    %c0_172 = arith.constant 0 : index
    %c1536 = arith.constant 1536 : index
    %139 = vector.load %arg8[%c0_172, %c1536] : memref<8x4096xf32, #tpu.memory_space<vmem>>, vector<8x256xf32>
    tpu.vector_store %arg8[%c0_172, %c1536], %138 {strides = array<i32>} : memref<8x4096xf32, #tpu.memory_space<vmem>>, vector<8x256xf32>,
    %cst_173 = arith.constant 0.000000e+00 : f32
    %140 = vector.broadcast %cst_173 : f32 to vector<8x256xf32>
    %c0_174 = arith.constant 0 : index
    %c7_175 = arith.constant 7 : index
    %c0_176 = arith.constant 0 : index
    %c0_177 = arith.constant 0 : index
    %141 = vector.load %arg2[%c0_174, %c7_175, %c0_176, %c0_177] : memref<1x16x36x256xbf16, #tpu.memory_space<vmem>>, vector<1x1x36x256xbf16>
    %142 = vector.shape_cast %141 : vector<1x1x36x256xbf16> to vector<36x256xbf16>
    %c0_178 = arith.constant 0 : index
    %c0_179 = arith.constant 0 : index
    %c0_180 = arith.constant 0 : index
    %143 = vector.load %arg4[%c0_178, %c0_179, %c0_180] : memref<3x8x36xbf16, #tpu.memory_space<vmem>>, vector<1x8x36xbf16>
    %144 = vector.shape_cast %143 : vector<1x8x36xbf16> to vector<8x36xbf16>
    %cst_181 = arith.constant dense<0.000000e+00> : vector<8x256xf32>
    %145 = tpu.matmul %144, %142, %cst_181 {dimension_numbers = #tpu.dot_dimension_numbers<[1], [0], [0], [1], [0, 0, 1, 1], [], []>} : vector<8x36xbf16>, vector<36x256xbf16>, vector<8x256xf32> -> vector<8x256xf32>
    %146 = arith.addf %140, %145 : vector<8x256xf32>
    %c0_182 = arith.constant 0 : index
    %c8_183 = arith.constant 8 : index
    %c0_184 = arith.constant 0 : index
    %c0_185 = arith.constant 0 : index
    %147 = vector.load %arg2[%c0_182, %c8_183, %c0_184, %c0_185] : memref<1x16x36x256xbf16, #tpu.memory_space<vmem>>, vector<1x1x36x256xbf16>
    %148 = vector.shape_cast %147 : vector<1x1x36x256xbf16> to vector<36x256xbf16>
    %c1_186 = arith.constant 1 : index
    %c0_187 = arith.constant 0 : index
    %c0_188 = arith.constant 0 : index
    %149 = vector.load %arg4[%c1_186, %c0_187, %c0_188] : memref<3x8x36xbf16, #tpu.memory_space<vmem>>, vector<1x8x36xbf16>
    %150 = vector.shape_cast %149 : vector<1x8x36xbf16> to vector<8x36xbf16>
    %cst_189 = arith.constant dense<0.000000e+00> : vector<8x256xf32>
    %151 = tpu.matmul %150, %148, %cst_189 {dimension_numbers = #tpu.dot_dimension_numbers<[1], [0], [0], [1], [0, 0, 1, 1], [], []>} : vector<8x36xbf16>, vector<36x256xbf16>, vector<8x256xf32> -> vector<8x256xf32>
    %152 = arith.addf %146, %151 : vector<8x256xf32>
    %c0_190 = arith.constant 0 : index
    %c9 = arith.constant 9 : index
    %c0_191 = arith.constant 0 : index
    %c0_192 = arith.constant 0 : index
    %153 = vector.load %arg2[%c0_190, %c9, %c0_191, %c0_192] : memref<1x16x36x256xbf16, #tpu.memory_space<vmem>>, vector<1x1x36x256xbf16>
    %154 = vector.shape_cast %153 : vector<1x1x36x256xbf16> to vector<36x256xbf16>
    %c2_193 = arith.constant 2 : index
    %c0_194 = arith.constant 0 : index
    %c0_195 = arith.constant 0 : index
    %155 = vector.load %arg4[%c2_193, %c0_194, %c0_195] : memref<3x8x36xbf16, #tpu.memory_space<vmem>>, vector<1x8x36xbf16>
    %156 = vector.shape_cast %155 : vector<1x8x36xbf16> to vector<8x36xbf16>
    %cst_196 = arith.constant dense<0.000000e+00> : vector<8x256xf32>
    %157 = tpu.matmul %156, %154, %cst_196 {dimension_numbers = #tpu.dot_dimension_numbers<[1], [0], [0], [1], [0, 0, 1, 1], [], []>} : vector<8x36xbf16>, vector<36x256xbf16>, vector<8x256xf32> -> vector<8x256xf32>
    %158 = arith.addf %152, %157 : vector<8x256xf32>
    %c0_197 = arith.constant 0 : index
    %c1792 = arith.constant 1792 : index
    %159 = vector.load %arg8[%c0_197, %c1792] : memref<8x4096xf32, #tpu.memory_space<vmem>>, vector<8x256xf32>
    tpu.vector_store %arg8[%c0_197, %c1792], %158 {strides = array<i32>} : memref<8x4096xf32, #tpu.memory_space<vmem>>, vector<8x256xf32>,
    %cst_198 = arith.constant 0.000000e+00 : f32
    %160 = vector.broadcast %cst_198 : f32 to vector<8x256xf32>
    %c0_199 = arith.constant 0 : index
    %c8_200 = arith.constant 8 : index
    %c0_201 = arith.constant 0 : index
    %c0_202 = arith.constant 0 : index
    %161 = vector.load %arg2[%c0_199, %c8_200, %c0_201, %c0_202] : memref<1x16x36x256xbf16, #tpu.memory_space<vmem>>, vector<1x1x36x256xbf16>
    %162 = vector.shape_cast %161 : vector<1x1x36x256xbf16> to vector<36x256xbf16>
    %c0_203 = arith.constant 0 : index
    %c0_204 = arith.constant 0 : index
    %c0_205 = arith.constant 0 : index
    %163 = vector.load %arg4[%c0_203, %c0_204, %c0_205] : memref<3x8x36xbf16, #tpu.memory_space<vmem>>, vector<1x8x36xbf16>
    %164 = vector.shape_cast %163 : vector<1x8x36xbf16> to vector<8x36xbf16>
    %cst_206 = arith.constant dense<0.000000e+00> : vector<8x256xf32>
    %165 = tpu.matmul %164, %162, %cst_206 {dimension_numbers = #tpu.dot_dimension_numbers<[1], [0], [0], [1], [0, 0, 1, 1], [], []>} : vector<8x36xbf16>, vector<36x256xbf16>, vector<8x256xf32> -> vector<8x256xf32>
    %166 = arith.addf %160, %165 : vector<8x256xf32>
    %c0_207 = arith.constant 0 : index
    %c9_208 = arith.constant 9 : index
    %c0_209 = arith.constant 0 : index
    %c0_210 = arith.constant 0 : index
    %167 = vector.load %arg2[%c0_207, %c9_208, %c0_209, %c0_210] : memref<1x16x36x256xbf16, #tpu.memory_space<vmem>>, vector<1x1x36x256xbf16>
    %168 = vector.shape_cast %167 : vector<1x1x36x256xbf16> to vector<36x256xbf16>
    %c1_211 = arith.constant 1 : index
    %c0_212 = arith.constant 0 : index
    %c0_213 = arith.constant 0 : index
    %169 = vector.load %arg4[%c1_211, %c0_212, %c0_213] : memref<3x8x36xbf16, #tpu.memory_space<vmem>>, vector<1x8x36xbf16>
    %170 = vector.shape_cast %169 : vector<1x8x36xbf16> to vector<8x36xbf16>
    %cst_214 = arith.constant dense<0.000000e+00> : vector<8x256xf32>
    %171 = tpu.matmul %170, %168, %cst_214 {dimension_numbers = #tpu.dot_dimension_numbers<[1], [0], [0], [1], [0, 0, 1, 1], [], []>} : vector<8x36xbf16>, vector<36x256xbf16>, vector<8x256xf32> -> vector<8x256xf32>
    %172 = arith.addf %166, %171 : vector<8x256xf32>
    %c0_215 = arith.constant 0 : index
    %c10 = arith.constant 10 : index
    %c0_216 = arith.constant 0 : index
    %c0_217 = arith.constant 0 : index
    %173 = vector.load %arg2[%c0_215, %c10, %c0_216, %c0_217] : memref<1x16x36x256xbf16, #tpu.memory_space<vmem>>, vector<1x1x36x256xbf16>
    %174 = vector.shape_cast %173 : vector<1x1x36x256xbf16> to vector<36x256xbf16>
    %c2_218 = arith.constant 2 : index
    %c0_219 = arith.constant 0 : index
    %c0_220 = arith.constant 0 : index
    %175 = vector.load %arg4[%c2_218, %c0_219, %c0_220] : memref<3x8x36xbf16, #tpu.memory_space<vmem>>, vector<1x8x36xbf16>
    %176 = vector.shape_cast %175 : vector<1x8x36xbf16> to vector<8x36xbf16>
    %cst_221 = arith.constant dense<0.000000e+00> : vector<8x256xf32>
    %177 = tpu.matmul %176, %174, %cst_221 {dimension_numbers = #tpu.dot_dimension_numbers<[1], [0], [0], [1], [0, 0, 1, 1], [], []>} : vector<8x36xbf16>, vector<36x256xbf16>, vector<8x256xf32> -> vector<8x256xf32>
    %178 = arith.addf %172, %177 : vector<8x256xf32>
    %c0_222 = arith.constant 0 : index
    %c2048 = arith.constant 2048 : index
    %179 = vector.load %arg8[%c0_222, %c2048] : memref<8x4096xf32, #tpu.memory_space<vmem>>, vector<8x256xf32>
    tpu.vector_store %arg8[%c0_222, %c2048], %178 {strides = array<i32>} : memref<8x4096xf32, #tpu.memory_space<vmem>>, vector<8x256xf32>,
    %cst_223 = arith.constant 0.000000e+00 : f32
    %180 = vector.broadcast %cst_223 : f32 to vector<8x256xf32>
    %c0_224 = arith.constant 0 : index
    %c9_225 = arith.constant 9 : index
    %c0_226 = arith.constant 0 : index
    %c0_227 = arith.constant 0 : index
    %181 = vector.load %arg2[%c0_224, %c9_225, %c0_226, %c0_227] : memref<1x16x36x256xbf16, #tpu.memory_space<vmem>>, vector<1x1x36x256xbf16>
    %182 = vector.shape_cast %181 : vector<1x1x36x256xbf16> to vector<36x256xbf16>
    %c0_228 = arith.constant 0 : index
    %c0_229 = arith.constant 0 : index
    %c0_230 = arith.constant 0 : index
    %183 = vector.load %arg4[%c0_228, %c0_229, %c0_230] : memref<3x8x36xbf16, #tpu.memory_space<vmem>>, vector<1x8x36xbf16>
    %184 = vector.shape_cast %183 : vector<1x8x36xbf16> to vector<8x36xbf16>
    %cst_231 = arith.constant dense<0.000000e+00> : vector<8x256xf32>
    %185 = tpu.matmul %184, %182, %cst_231 {dimension_numbers = #tpu.dot_dimension_numbers<[1], [0], [0], [1], [0, 0, 1, 1], [], []>} : vector<8x36xbf16>, vector<36x256xbf16>, vector<8x256xf32> -> vector<8x256xf32>
    %186 = arith.addf %180, %185 : vector<8x256xf32>
    %c0_232 = arith.constant 0 : index
    %c10_233 = arith.constant 10 : index
    %c0_234 = arith.constant 0 : index
    %c0_235 = arith.constant 0 : index
    %187 = vector.load %arg2[%c0_232, %c10_233, %c0_234, %c0_235] : memref<1x16x36x256xbf16, #tpu.memory_space<vmem>>, vector<1x1x36x256xbf16>
    %188 = vector.shape_cast %187 : vector<1x1x36x256xbf16> to vector<36x256xbf16>
    %c1_236 = arith.constant 1 : index
    %c0_237 = arith.constant 0 : index
    %c0_238 = arith.constant 0 : index
    %189 = vector.load %arg4[%c1_236, %c0_237, %c0_238] : memref<3x8x36xbf16, #tpu.memory_space<vmem>>, vector<1x8x36xbf16>
    %190 = vector.shape_cast %189 : vector<1x8x36xbf16> to vector<8x36xbf16>
    %cst_239 = arith.constant dense<0.000000e+00> : vector<8x256xf32>
    %191 = tpu.matmul %190, %188, %cst_239 {dimension_numbers = #tpu.dot_dimension_numbers<[1], [0], [0], [1], [0, 0, 1, 1], [], []>} : vector<8x36xbf16>, vector<36x256xbf16>, vector<8x256xf32> -> vector<8x256xf32>
    %192 = arith.addf %186, %191 : vector<8x256xf32>
    %c0_240 = arith.constant 0 : index
    %c11 = arith.constant 11 : index
    %c0_241 = arith.constant 0 : index
    %c0_242 = arith.constant 0 : index
    %193 = vector.load %arg2[%c0_240, %c11, %c0_241, %c0_242] : memref<1x16x36x256xbf16, #tpu.memory_space<vmem>>, vector<1x1x36x256xbf16>
    %194 = vector.shape_cast %193 : vector<1x1x36x256xbf16> to vector<36x256xbf16>
    %c2_243 = arith.constant 2 : index
    %c0_244 = arith.constant 0 : index
    %c0_245 = arith.constant 0 : index
    %195 = vector.load %arg4[%c2_243, %c0_244, %c0_245] : memref<3x8x36xbf16, #tpu.memory_space<vmem>>, vector<1x8x36xbf16>
    %196 = vector.shape_cast %195 : vector<1x8x36xbf16> to vector<8x36xbf16>
    %cst_246 = arith.constant dense<0.000000e+00> : vector<8x256xf32>
    %197 = tpu.matmul %196, %194, %cst_246 {dimension_numbers = #tpu.dot_dimension_numbers<[1], [0], [0], [1], [0, 0, 1, 1], [], []>} : vector<8x36xbf16>, vector<36x256xbf16>, vector<8x256xf32> -> vector<8x256xf32>
    %198 = arith.addf %192, %197 : vector<8x256xf32>
    %c0_247 = arith.constant 0 : index
    %c2304 = arith.constant 2304 : index
    %199 = vector.load %arg8[%c0_247, %c2304] : memref<8x4096xf32, #tpu.memory_space<vmem>>, vector<8x256xf32>
    tpu.vector_store %arg8[%c0_247, %c2304], %198 {strides = array<i32>} : memref<8x4096xf32, #tpu.memory_space<vmem>>, vector<8x256xf32>,
    %cst_248 = arith.constant 0.000000e+00 : f32
    %200 = vector.broadcast %cst_248 : f32 to vector<8x256xf32>
    %c0_249 = arith.constant 0 : index
    %c10_250 = arith.constant 10 : index
    %c0_251 = arith.constant 0 : index
    %c0_252 = arith.constant 0 : index
    %201 = vector.load %arg2[%c0_249, %c10_250, %c0_251, %c0_252] : memref<1x16x36x256xbf16, #tpu.memory_space<vmem>>, vector<1x1x36x256xbf16>
    %202 = vector.shape_cast %201 : vector<1x1x36x256xbf16> to vector<36x256xbf16>
    %c0_253 = arith.constant 0 : index
    %c0_254 = arith.constant 0 : index
    %c0_255 = arith.constant 0 : index
    %203 = vector.load %arg4[%c0_253, %c0_254, %c0_255] : memref<3x8x36xbf16, #tpu.memory_space<vmem>>, vector<1x8x36xbf16>
    %204 = vector.shape_cast %203 : vector<1x8x36xbf16> to vector<8x36xbf16>
    %cst_256 = arith.constant dense<0.000000e+00> : vector<8x256xf32>
    %205 = tpu.matmul %204, %202, %cst_256 {dimension_numbers = #tpu.dot_dimension_numbers<[1], [0], [0], [1], [0, 0, 1, 1], [], []>} : vector<8x36xbf16>, vector<36x256xbf16>, vector<8x256xf32> -> vector<8x256xf32>
    %206 = arith.addf %200, %205 : vector<8x256xf32>
    %c0_257 = arith.constant 0 : index
    %c11_258 = arith.constant 11 : index
    %c0_259 = arith.constant 0 : index
    %c0_260 = arith.constant 0 : index
    %207 = vector.load %arg2[%c0_257, %c11_258, %c0_259, %c0_260] : memref<1x16x36x256xbf16, #tpu.memory_space<vmem>>, vector<1x1x36x256xbf16>
    %208 = vector.shape_cast %207 : vector<1x1x36x256xbf16> to vector<36x256xbf16>
    %c1_261 = arith.constant 1 : index
    %c0_262 = arith.constant 0 : index
    %c0_263 = arith.constant 0 : index
    %209 = vector.load %arg4[%c1_261, %c0_262, %c0_263] : memref<3x8x36xbf16, #tpu.memory_space<vmem>>, vector<1x8x36xbf16>
    %210 = vector.shape_cast %209 : vector<1x8x36xbf16> to vector<8x36xbf16>
    %cst_264 = arith.constant dense<0.000000e+00> : vector<8x256xf32>
    %211 = tpu.matmul %210, %208, %cst_264 {dimension_numbers = #tpu.dot_dimension_numbers<[1], [0], [0], [1], [0, 0, 1, 1], [], []>} : vector<8x36xbf16>, vector<36x256xbf16>, vector<8x256xf32> -> vector<8x256xf32>
    %212 = arith.addf %206, %211 : vector<8x256xf32>
    %c0_265 = arith.constant 0 : index
    %c12 = arith.constant 12 : index
    %c0_266 = arith.constant 0 : index
    %c0_267 = arith.constant 0 : index
    %213 = vector.load %arg2[%c0_265, %c12, %c0_266, %c0_267] : memref<1x16x36x256xbf16, #tpu.memory_space<vmem>>, vector<1x1x36x256xbf16>
    %214 = vector.shape_cast %213 : vector<1x1x36x256xbf16> to vector<36x256xbf16>
    %c2_268 = arith.constant 2 : index
    %c0_269 = arith.constant 0 : index
    %c0_270 = arith.constant 0 : index
    %215 = vector.load %arg4[%c2_268, %c0_269, %c0_270] : memref<3x8x36xbf16, #tpu.memory_space<vmem>>, vector<1x8x36xbf16>
    %216 = vector.shape_cast %215 : vector<1x8x36xbf16> to vector<8x36xbf16>
    %cst_271 = arith.constant dense<0.000000e+00> : vector<8x256xf32>
    %217 = tpu.matmul %216, %214, %cst_271 {dimension_numbers = #tpu.dot_dimension_numbers<[1], [0], [0], [1], [0, 0, 1, 1], [], []>} : vector<8x36xbf16>, vector<36x256xbf16>, vector<8x256xf32> -> vector<8x256xf32>
    %218 = arith.addf %212, %217 : vector<8x256xf32>
    %c0_272 = arith.constant 0 : index
    %c2560 = arith.constant 2560 : index
    %219 = vector.load %arg8[%c0_272, %c2560] : memref<8x4096xf32, #tpu.memory_space<vmem>>, vector<8x256xf32>
    tpu.vector_store %arg8[%c0_272, %c2560], %218 {strides = array<i32>} : memref<8x4096xf32, #tpu.memory_space<vmem>>, vector<8x256xf32>,
    %cst_273 = arith.constant 0.000000e+00 : f32
    %220 = vector.broadcast %cst_273 : f32 to vector<8x256xf32>
    %c0_274 = arith.constant 0 : index
    %c11_275 = arith.constant 11 : index
    %c0_276 = arith.constant 0 : index
    %c0_277 = arith.constant 0 : index
    %221 = vector.load %arg2[%c0_274, %c11_275, %c0_276, %c0_277] : memref<1x16x36x256xbf16, #tpu.memory_space<vmem>>, vector<1x1x36x256xbf16>
    %222 = vector.shape_cast %221 : vector<1x1x36x256xbf16> to vector<36x256xbf16>
    %c0_278 = arith.constant 0 : index
    %c0_279 = arith.constant 0 : index
    %c0_280 = arith.constant 0 : index
    %223 = vector.load %arg4[%c0_278, %c0_279, %c0_280] : memref<3x8x36xbf16, #tpu.memory_space<vmem>>, vector<1x8x36xbf16>
    %224 = vector.shape_cast %223 : vector<1x8x36xbf16> to vector<8x36xbf16>
    %cst_281 = arith.constant dense<0.000000e+00> : vector<8x256xf32>
    %225 = tpu.matmul %224, %222, %cst_281 {dimension_numbers = #tpu.dot_dimension_numbers<[1], [0], [0], [1], [0, 0, 1, 1], [], []>} : vector<8x36xbf16>, vector<36x256xbf16>, vector<8x256xf32> -> vector<8x256xf32>
    %226 = arith.addf %220, %225 : vector<8x256xf32>
    %c0_282 = arith.constant 0 : index
    %c12_283 = arith.constant 12 : index
    %c0_284 = arith.constant 0 : index
    %c0_285 = arith.constant 0 : index
    %227 = vector.load %arg2[%c0_282, %c12_283, %c0_284, %c0_285] : memref<1x16x36x256xbf16, #tpu.memory_space<vmem>>, vector<1x1x36x256xbf16>
    %228 = vector.shape_cast %227 : vector<1x1x36x256xbf16> to vector<36x256xbf16>
    %c1_286 = arith.constant 1 : index
    %c0_287 = arith.constant 0 : index
    %c0_288 = arith.constant 0 : index
    %229 = vector.load %arg4[%c1_286, %c0_287, %c0_288] : memref<3x8x36xbf16, #tpu.memory_space<vmem>>, vector<1x8x36xbf16>
    %230 = vector.shape_cast %229 : vector<1x8x36xbf16> to vector<8x36xbf16>
    %cst_289 = arith.constant dense<0.000000e+00> : vector<8x256xf32>
    %231 = tpu.matmul %230, %228, %cst_289 {dimension_numbers = #tpu.dot_dimension_numbers<[1], [0], [0], [1], [0, 0, 1, 1], [], []>} : vector<8x36xbf16>, vector<36x256xbf16>, vector<8x256xf32> -> vector<8x256xf32>
    %232 = arith.addf %226, %231 : vector<8x256xf32>
    %c0_290 = arith.constant 0 : index
    %c13 = arith.constant 13 : index
    %c0_291 = arith.constant 0 : index
    %c0_292 = arith.constant 0 : index
    %233 = vector.load %arg2[%c0_290, %c13, %c0_291, %c0_292] : memref<1x16x36x256xbf16, #tpu.memory_space<vmem>>, vector<1x1x36x256xbf16>
    %234 = vector.shape_cast %233 : vector<1x1x36x256xbf16> to vector<36x256xbf16>
    %c2_293 = arith.constant 2 : index
    %c0_294 = arith.constant 0 : index
    %c0_295 = arith.constant 0 : index
    %235 = vector.load %arg4[%c2_293, %c0_294, %c0_295] : memref<3x8x36xbf16, #tpu.memory_space<vmem>>, vector<1x8x36xbf16>
    %236 = vector.shape_cast %235 : vector<1x8x36xbf16> to vector<8x36xbf16>
    %cst_296 = arith.constant dense<0.000000e+00> : vector<8x256xf32>
    %237 = tpu.matmul %236, %234, %cst_296 {dimension_numbers = #tpu.dot_dimension_numbers<[1], [0], [0], [1], [0, 0, 1, 1], [], []>} : vector<8x36xbf16>, vector<36x256xbf16>, vector<8x256xf32> -> vector<8x256xf32>
    %238 = arith.addf %232, %237 : vector<8x256xf32>
    %c0_297 = arith.constant 0 : index
    %c2816 = arith.constant 2816 : index
    %239 = vector.load %arg8[%c0_297, %c2816] : memref<8x4096xf32, #tpu.memory_space<vmem>>, vector<8x256xf32>
    tpu.vector_store %arg8[%c0_297, %c2816], %238 {strides = array<i32>} : memref<8x4096xf32, #tpu.memory_space<vmem>>, vector<8x256xf32>,
    %cst_298 = arith.constant 0.000000e+00 : f32
    %240 = vector.broadcast %cst_298 : f32 to vector<8x256xf32>
    %c0_299 = arith.constant 0 : index
    %c12_300 = arith.constant 12 : index
    %c0_301 = arith.constant 0 : index
    %c0_302 = arith.constant 0 : index
    %241 = vector.load %arg2[%c0_299, %c12_300, %c0_301, %c0_302] : memref<1x16x36x256xbf16, #tpu.memory_space<vmem>>, vector<1x1x36x256xbf16>
    %242 = vector.shape_cast %241 : vector<1x1x36x256xbf16> to vector<36x256xbf16>
    %c0_303 = arith.constant 0 : index
    %c0_304 = arith.constant 0 : index
    %c0_305 = arith.constant 0 : index
    %243 = vector.load %arg4[%c0_303, %c0_304, %c0_305] : memref<3x8x36xbf16, #tpu.memory_space<vmem>>, vector<1x8x36xbf16>
    %244 = vector.shape_cast %243 : vector<1x8x36xbf16> to vector<8x36xbf16>
    %cst_306 = arith.constant dense<0.000000e+00> : vector<8x256xf32>
    %245 = tpu.matmul %244, %242, %cst_306 {dimension_numbers = #tpu.dot_dimension_numbers<[1], [0], [0], [1], [0, 0, 1, 1], [], []>} : vector<8x36xbf16>, vector<36x256xbf16>, vector<8x256xf32> -> vector<8x256xf32>
    %246 = arith.addf %240, %245 : vector<8x256xf32>
    %c0_307 = arith.constant 0 : index
    %c13_308 = arith.constant 13 : index
    %c0_309 = arith.constant 0 : index
    %c0_310 = arith.constant 0 : index
    %247 = vector.load %arg2[%c0_307, %c13_308, %c0_309, %c0_310] : memref<1x16x36x256xbf16, #tpu.memory_space<vmem>>, vector<1x1x36x256xbf16>
    %248 = vector.shape_cast %247 : vector<1x1x36x256xbf16> to vector<36x256xbf16>
    %c1_311 = arith.constant 1 : index
    %c0_312 = arith.constant 0 : index
    %c0_313 = arith.constant 0 : index
    %249 = vector.load %arg4[%c1_311, %c0_312, %c0_313] : memref<3x8x36xbf16, #tpu.memory_space<vmem>>, vector<1x8x36xbf16>
    %250 = vector.shape_cast %249 : vector<1x8x36xbf16> to vector<8x36xbf16>
    %cst_314 = arith.constant dense<0.000000e+00> : vector<8x256xf32>
    %251 = tpu.matmul %250, %248, %cst_314 {dimension_numbers = #tpu.dot_dimension_numbers<[1], [0], [0], [1], [0, 0, 1, 1], [], []>} : vector<8x36xbf16>, vector<36x256xbf16>, vector<8x256xf32> -> vector<8x256xf32>
    %252 = arith.addf %246, %251 : vector<8x256xf32>
    %c0_315 = arith.constant 0 : index
    %c14 = arith.constant 14 : index
    %c0_316 = arith.constant 0 : index
    %c0_317 = arith.constant 0 : index
    %253 = vector.load %arg2[%c0_315, %c14, %c0_316, %c0_317] : memref<1x16x36x256xbf16, #tpu.memory_space<vmem>>, vector<1x1x36x256xbf16>
    %254 = vector.shape_cast %253 : vector<1x1x36x256xbf16> to vector<36x256xbf16>
    %c2_318 = arith.constant 2 : index
    %c0_319 = arith.constant 0 : index
    %c0_320 = arith.constant 0 : index
    %255 = vector.load %arg4[%c2_318, %c0_319, %c0_320] : memref<3x8x36xbf16, #tpu.memory_space<vmem>>, vector<1x8x36xbf16>
    %256 = vector.shape_cast %255 : vector<1x8x36xbf16> to vector<8x36xbf16>
    %cst_321 = arith.constant dense<0.000000e+00> : vector<8x256xf32>
    %257 = tpu.matmul %256, %254, %cst_321 {dimension_numbers = #tpu.dot_dimension_numbers<[1], [0], [0], [1], [0, 0, 1, 1], [], []>} : vector<8x36xbf16>, vector<36x256xbf16>, vector<8x256xf32> -> vector<8x256xf32>
    %258 = arith.addf %252, %257 : vector<8x256xf32>
    %c0_322 = arith.constant 0 : index
    %c3072 = arith.constant 3072 : index
    %259 = vector.load %arg8[%c0_322, %c3072] : memref<8x4096xf32, #tpu.memory_space<vmem>>, vector<8x256xf32>
    tpu.vector_store %arg8[%c0_322, %c3072], %258 {strides = array<i32>} : memref<8x4096xf32, #tpu.memory_space<vmem>>, vector<8x256xf32>,
    %cst_323 = arith.constant 0.000000e+00 : f32
    %260 = vector.broadcast %cst_323 : f32 to vector<8x256xf32>
    %c0_324 = arith.constant 0 : index
    %c13_325 = arith.constant 13 : index
    %c0_326 = arith.constant 0 : index
    %c0_327 = arith.constant 0 : index
    %261 = vector.load %arg2[%c0_324, %c13_325, %c0_326, %c0_327] : memref<1x16x36x256xbf16, #tpu.memory_space<vmem>>, vector<1x1x36x256xbf16>
    %262 = vector.shape_cast %261 : vector<1x1x36x256xbf16> to vector<36x256xbf16>
    %c0_328 = arith.constant 0 : index
    %c0_329 = arith.constant 0 : index
    %c0_330 = arith.constant 0 : index
    %263 = vector.load %arg4[%c0_328, %c0_329, %c0_330] : memref<3x8x36xbf16, #tpu.memory_space<vmem>>, vector<1x8x36xbf16>
    %264 = vector.shape_cast %263 : vector<1x8x36xbf16> to vector<8x36xbf16>
    %cst_331 = arith.constant dense<0.000000e+00> : vector<8x256xf32>
    %265 = tpu.matmul %264, %262, %cst_331 {dimension_numbers = #tpu.dot_dimension_numbers<[1], [0], [0], [1], [0, 0, 1, 1], [], []>} : vector<8x36xbf16>, vector<36x256xbf16>, vector<8x256xf32> -> vector<8x256xf32>
    %266 = arith.addf %260, %265 : vector<8x256xf32>
    %c0_332 = arith.constant 0 : index
    %c14_333 = arith.constant 14 : index
    %c0_334 = arith.constant 0 : index
    %c0_335 = arith.constant 0 : index
    %267 = vector.load %arg2[%c0_332, %c14_333, %c0_334, %c0_335] : memref<1x16x36x256xbf16, #tpu.memory_space<vmem>>, vector<1x1x36x256xbf16>
    %268 = vector.shape_cast %267 : vector<1x1x36x256xbf16> to vector<36x256xbf16>
    %c1_336 = arith.constant 1 : index
    %c0_337 = arith.constant 0 : index
    %c0_338 = arith.constant 0 : index
    %269 = vector.load %arg4[%c1_336, %c0_337, %c0_338] : memref<3x8x36xbf16, #tpu.memory_space<vmem>>, vector<1x8x36xbf16>
    %270 = vector.shape_cast %269 : vector<1x8x36xbf16> to vector<8x36xbf16>
    %cst_339 = arith.constant dense<0.000000e+00> : vector<8x256xf32>
    %271 = tpu.matmul %270, %268, %cst_339 {dimension_numbers = #tpu.dot_dimension_numbers<[1], [0], [0], [1], [0, 0, 1, 1], [], []>} : vector<8x36xbf16>, vector<36x256xbf16>, vector<8x256xf32> -> vector<8x256xf32>
    %272 = arith.addf %266, %271 : vector<8x256xf32>
    %c0_340 = arith.constant 0 : index
    %c15 = arith.constant 15 : index
    %c0_341 = arith.constant 0 : index
    %c0_342 = arith.constant 0 : index
    %273 = vector.load %arg2[%c0_340, %c15, %c0_341, %c0_342] : memref<1x16x36x256xbf16, #tpu.memory_space<vmem>>, vector<1x1x36x256xbf16>
    %274 = vector.shape_cast %273 : vector<1x1x36x256xbf16> to vector<36x256xbf16>
    %c2_343 = arith.constant 2 : index
    %c0_344 = arith.constant 0 : index
    %c0_345 = arith.constant 0 : index
    %275 = vector.load %arg4[%c2_343, %c0_344, %c0_345] : memref<3x8x36xbf16, #tpu.memory_space<vmem>>, vector<1x8x36xbf16>
    %276 = vector.shape_cast %275 : vector<1x8x36xbf16> to vector<8x36xbf16>
    %cst_346 = arith.constant dense<0.000000e+00> : vector<8x256xf32>
    %277 = tpu.matmul %276, %274, %cst_346 {dimension_numbers = #tpu.dot_dimension_numbers<[1], [0], [0], [1], [0, 0, 1, 1], [], []>} : vector<8x36xbf16>, vector<36x256xbf16>, vector<8x256xf32> -> vector<8x256xf32>
    %278 = arith.addf %272, %277 : vector<8x256xf32>
    %c0_347 = arith.constant 0 : index
    %c3328 = arith.constant 3328 : index
    %279 = vector.load %arg8[%c0_347, %c3328] : memref<8x4096xf32, #tpu.memory_space<vmem>>, vector<8x256xf32>
    tpu.vector_store %arg8[%c0_347, %c3328], %278 {strides = array<i32>} : memref<8x4096xf32, #tpu.memory_space<vmem>>, vector<8x256xf32>,
    %cst_348 = arith.constant 0.000000e+00 : f32
    %280 = vector.broadcast %cst_348 : f32 to vector<8x256xf32>
    %c0_349 = arith.constant 0 : index
    %c14_350 = arith.constant 14 : index
    %c0_351 = arith.constant 0 : index
    %c0_352 = arith.constant 0 : index
    %281 = vector.load %arg2[%c0_349, %c14_350, %c0_351, %c0_352] : memref<1x16x36x256xbf16, #tpu.memory_space<vmem>>, vector<1x1x36x256xbf16>
    %282 = vector.shape_cast %281 : vector<1x1x36x256xbf16> to vector<36x256xbf16>
    %c0_353 = arith.constant 0 : index
    %c0_354 = arith.constant 0 : index
    %c0_355 = arith.constant 0 : index
    %283 = vector.load %arg4[%c0_353, %c0_354, %c0_355] : memref<3x8x36xbf16, #tpu.memory_space<vmem>>, vector<1x8x36xbf16>
    %284 = vector.shape_cast %283 : vector<1x8x36xbf16> to vector<8x36xbf16>
    %cst_356 = arith.constant dense<0.000000e+00> : vector<8x256xf32>
    %285 = tpu.matmul %284, %282, %cst_356 {dimension_numbers = #tpu.dot_dimension_numbers<[1], [0], [0], [1], [0, 0, 1, 1], [], []>} : vector<8x36xbf16>, vector<36x256xbf16>, vector<8x256xf32> -> vector<8x256xf32>
    %286 = arith.addf %280, %285 : vector<8x256xf32>
    %c0_357 = arith.constant 0 : index
    %c15_358 = arith.constant 15 : index
    %c0_359 = arith.constant 0 : index
    %c0_360 = arith.constant 0 : index
    %287 = vector.load %arg2[%c0_357, %c15_358, %c0_359, %c0_360] : memref<1x16x36x256xbf16, #tpu.memory_space<vmem>>, vector<1x1x36x256xbf16>
    %288 = vector.shape_cast %287 : vector<1x1x36x256xbf16> to vector<36x256xbf16>
    %c1_361 = arith.constant 1 : index
    %c0_362 = arith.constant 0 : index
    %c0_363 = arith.constant 0 : index
    %289 = vector.load %arg4[%c1_361, %c0_362, %c0_363] : memref<3x8x36xbf16, #tpu.memory_space<vmem>>, vector<1x8x36xbf16>
    %290 = vector.shape_cast %289 : vector<1x8x36xbf16> to vector<8x36xbf16>
    %cst_364 = arith.constant dense<0.000000e+00> : vector<8x256xf32>
    %291 = tpu.matmul %290, %288, %cst_364 {dimension_numbers = #tpu.dot_dimension_numbers<[1], [0], [0], [1], [0, 0, 1, 1], [], []>} : vector<8x36xbf16>, vector<36x256xbf16>, vector<8x256xf32> -> vector<8x256xf32>
    %292 = arith.addf %286, %291 : vector<8x256xf32>
    %c0_365 = arith.constant 0 : index
    %c0_366 = arith.constant 0 : index
    %c0_367 = arith.constant 0 : index
    %c0_368 = arith.constant 0 : index
    %293 = vector.load %arg3[%c0_365, %c0_366, %c0_367, %c0_368] : memref<1x2x36x256xbf16, #tpu.memory_space<vmem>>, vector<1x1x36x256xbf16>
    %294 = vector.shape_cast %293 : vector<1x1x36x256xbf16> to vector<36x256xbf16>
    %c2_369 = arith.constant 2 : index
    %c0_370 = arith.constant 0 : index
    %c0_371 = arith.constant 0 : index
    %295 = vector.load %arg4[%c2_369, %c0_370, %c0_371] : memref<3x8x36xbf16, #tpu.memory_space<vmem>>, vector<1x8x36xbf16>
    %296 = vector.shape_cast %295 : vector<1x8x36xbf16> to vector<8x36xbf16>
    %cst_372 = arith.constant dense<0.000000e+00> : vector<8x256xf32>
    %297 = tpu.matmul %296, %294, %cst_372 {dimension_numbers = #tpu.dot_dimension_numbers<[1], [0], [0], [1], [0, 0, 1, 1], [], []>} : vector<8x36xbf16>, vector<36x256xbf16>, vector<8x256xf32> -> vector<8x256xf32>
    %298 = arith.addf %292, %297 : vector<8x256xf32>
    %c0_373 = arith.constant 0 : index
    %c3584 = arith.constant 3584 : index
    %299 = vector.load %arg8[%c0_373, %c3584] : memref<8x4096xf32, #tpu.memory_space<vmem>>, vector<8x256xf32>
    tpu.vector_store %arg8[%c0_373, %c3584], %298 {strides = array<i32>} : memref<8x4096xf32, #tpu.memory_space<vmem>>, vector<8x256xf32>,
    %cst_374 = arith.constant 0.000000e+00 : f32
    %300 = vector.broadcast %cst_374 : f32 to vector<8x256xf32>
    %c0_375 = arith.constant 0 : index
    %c15_376 = arith.constant 15 : index
    %c0_377 = arith.constant 0 : index
    %c0_378 = arith.constant 0 : index
    %301 = vector.load %arg2[%c0_375, %c15_376, %c0_377, %c0_378] : memref<1x16x36x256xbf16, #tpu.memory_space<vmem>>, vector<1x1x36x256xbf16>
    %302 = vector.shape_cast %301 : vector<1x1x36x256xbf16> to vector<36x256xbf16>
    %c0_379 = arith.constant 0 : index
    %c0_380 = arith.constant 0 : index
    %c0_381 = arith.constant 0 : index
    %303 = vector.load %arg4[%c0_379, %c0_380, %c0_381] : memref<3x8x36xbf16, #tpu.memory_space<vmem>>, vector<1x8x36xbf16>
    %304 = vector.shape_cast %303 : vector<1x8x36xbf16> to vector<8x36xbf16>
    %cst_382 = arith.constant dense<0.000000e+00> : vector<8x256xf32>
    %305 = tpu.matmul %304, %302, %cst_382 {dimension_numbers = #tpu.dot_dimension_numbers<[1], [0], [0], [1], [0, 0, 1, 1], [], []>} : vector<8x36xbf16>, vector<36x256xbf16>, vector<8x256xf32> -> vector<8x256xf32>
    %306 = arith.addf %300, %305 : vector<8x256xf32>
    %c0_383 = arith.constant 0 : index
    %c0_384 = arith.constant 0 : index
    %c0_385 = arith.constant 0 : index
    %c0_386 = arith.constant 0 : index
    %307 = vector.load %arg3[%c0_383, %c0_384, %c0_385, %c0_386] : memref<1x2x36x256xbf16, #tpu.memory_space<vmem>>, vector<1x1x36x256xbf16>
    %308 = vector.shape_cast %307 : vector<1x1x36x256xbf16> to vector<36x256xbf16>
    %c1_387 = arith.constant 1 : index
    %c0_388 = arith.constant 0 : index
    %c0_389 = arith.constant 0 : index
    %309 = vector.load %arg4[%c1_387, %c0_388, %c0_389] : memref<3x8x36xbf16, #tpu.memory_space<vmem>>, vector<1x8x36xbf16>
    %310 = vector.shape_cast %309 : vector<1x8x36xbf16> to vector<8x36xbf16>
    %cst_390 = arith.constant dense<0.000000e+00> : vector<8x256xf32>
    %311 = tpu.matmul %310, %308, %cst_390 {dimension_numbers = #tpu.dot_dimension_numbers<[1], [0], [0], [1], [0, 0, 1, 1], [], []>} : vector<8x36xbf16>, vector<36x256xbf16>, vector<8x256xf32> -> vector<8x256xf32>
    %312 = arith.addf %306, %311 : vector<8x256xf32>
    %c0_391 = arith.constant 0 : index
    %c1_392 = arith.constant 1 : index
    %c0_393 = arith.constant 0 : index
    %c0_394 = arith.constant 0 : index
    %313 = vector.load %arg3[%c0_391, %c1_392, %c0_393, %c0_394] : memref<1x2x36x256xbf16, #tpu.memory_space<vmem>>, vector<1x1x36x256xbf16>
    %314 = vector.shape_cast %313 : vector<1x1x36x256xbf16> to vector<36x256xbf16>
    %c2_395 = arith.constant 2 : index
    %c0_396 = arith.constant 0 : index
    %c0_397 = arith.constant 0 : index
    %315 = vector.load %arg4[%c2_395, %c0_396, %c0_397] : memref<3x8x36xbf16, #tpu.memory_space<vmem>>, vector<1x8x36xbf16>
    %316 = vector.shape_cast %315 : vector<1x8x36xbf16> to vector<8x36xbf16>
    %cst_398 = arith.constant dense<0.000000e+00> : vector<8x256xf32>
    %317 = tpu.matmul %316, %314, %cst_398 {dimension_numbers = #tpu.dot_dimension_numbers<[1], [0], [0], [1], [0, 0, 1, 1], [], []>} : vector<8x36xbf16>, vector<36x256xbf16>, vector<8x256xf32> -> vector<8x256xf32>
    %318 = arith.addf %312, %317 : vector<8x256xf32>
    %c0_399 = arith.constant 0 : index
    %c3840 = arith.constant 3840 : index
    %319 = vector.load %arg8[%c0_399, %c3840] : memref<8x4096xf32, #tpu.memory_space<vmem>>, vector<8x256xf32>
    tpu.vector_store %arg8[%c0_399, %c3840], %318 {strides = array<i32>} : memref<8x4096xf32, #tpu.memory_space<vmem>>, vector<8x256xf32>,
    %c0_400 = arith.constant 0 : index
    %c0_401 = arith.constant 0 : index
    %320 = vector.load %arg8[%c0_400, %c0_401] : memref<8x4096xf32, #tpu.memory_space<vmem>>, vector<8x4096xf32>
    %321 = arith.truncf %320 : vector<8x4096xf32> to vector<8x4096xbf16>
    %c0_402 = arith.constant 0 : index
    %c0_403 = arith.constant 0 : index
    %c0_404 = arith.constant 0 : index
    %322 = vector.load %arg5[%c0_402, %c0_403, %c0_404] : memref<1x8x4096xbf16, #tpu.memory_space<vmem>>, vector<1x8x4096xbf16>
    %323 = vector.shape_cast %322 : vector<1x8x4096xbf16> to vector<8x4096xbf16>
    %324 = vector.shape_cast %321 : vector<8x4096xbf16> to vector<1x8x4096xbf16>
    tpu.vector_store %arg5[%c0_402, %c0_403, %c0_404], %324 {strides = array<i32>} : memref<1x8x4096xbf16, #tpu.memory_space<vmem>>, vector<1x8x4096xbf16>,
    %cst_405 = arith.constant dense<0.000000e+00> : vector<8xf32>
    %325 = vector.multi_reduction <add>, %320, %cst_405 [1] : vector<8x4096xf32> to vector<8xf32>
    %326 = vector.shape_cast %325 : vector<8xf32> to vector<8x1xf32>
    %cst_406 = arith.constant 2.44140625E-4 : f32
    %327 = vector.broadcast %cst_406 : f32 to vector<8x1xf32>
    %328 = arith.mulf %326, %327 : vector<8x1xf32>
    %329 = vector.broadcast %328 : vector<8x1xf32> to vector<8x4096xf32>
    %330 = arith.subf %320, %329 : vector<8x4096xf32>
    %c0_407 = arith.constant 0 : index
    %c0_408 = arith.constant 0 : index
    %c0_409 = arith.constant 0 : index
    %c0_410 = arith.constant 0 : index
    %331 = vector.load %arg6[%c0_407, %c0_408, %c0_409, %c0_410] : memref<1x1x8x1xf32, #tpu.memory_space<vmem>>, vector<1x1x8x1xf32>
    %332 = vector.shape_cast %331 : vector<1x1x8x1xf32> to vector<8x1xf32>
    %333 = vector.shape_cast %326 : vector<8x1xf32> to vector<1x1x8x1xf32>
    tpu.vector_store %arg6[%c0_407, %c0_408, %c0_409, %c0_410], %333 {strides = array<i32>} : memref<1x1x8x1xf32, #tpu.memory_space<vmem>>, vector<1x1x8x1xf32>,
    %334 = arith.mulf %330, %330 : vector<8x4096xf32>
    %cst_411 = arith.constant dense<0.000000e+00> : vector<8xf32>
    %335 = vector.multi_reduction <add>, %334, %cst_411 [1] : vector<8x4096xf32> to vector<8xf32>
    %336 = vector.shape_cast %335 : vector<8xf32> to vector<8x1xf32>
    %c0_412 = arith.constant 0 : index
    %c0_413 = arith.constant 0 : index
    %c0_414 = arith.constant 0 : index
    %c0_415 = arith.constant 0 : index
    %337 = vector.load %arg7[%c0_412, %c0_413, %c0_414, %c0_415] : memref<1x1x8x1xf32, #tpu.memory_space<vmem>>, vector<1x1x8x1xf32>
    %338 = vector.shape_cast %337 : vector<1x1x8x1xf32> to vector<8x1xf32>
    %339 = vector.shape_cast %336 : vector<8x1xf32> to vector<1x1x8x1xf32>
    tpu.vector_store %arg7[%c0_412, %c0_413, %c0_414, %c0_415], %339 {strides = array<i32>} : memref<1x1x8x1xf32, #tpu.memory_space<vmem>>, vector<1x1x8x1xf32>,
    return
  }
  func.func @transform_0(%arg0: i32, %arg1: i32) -> (i32, i32, i32, i32) {
    %c0_i32 = arith.constant 0 : i32
    %c0_i32_0 = arith.constant 0 : i32
    %c0_i32_1 = arith.constant 0 : i32
    return %arg0, %arg1, %c0_i32, %c0_i32_0 : i32, i32, i32, i32
  }
  func.func @transform_1(%arg0: i32, %arg1: i32) -> (i32, i32, i32, i32) {
    %c1_i32 = arith.constant 1 : i32
    %0 = arith.addi %arg1, %c1_i32 : i32
    %c8_i32 = arith.constant 8 : i32
    %1 = arith.muli %0, %c8_i32 : i32
    %c0_i32 = arith.constant 0 : i32
    %c0_i32_0 = arith.constant 0 : i32
    %c0_i32_1 = arith.constant 0 : i32
    return %arg0, %1, %c0_i32, %c0_i32_0 : i32, i32, i32, i32
  }
  func.func @transform_2(%arg0: i32, %arg1: i32) -> (i32, i32, i32) {
    %c0_i32 = arith.constant 0 : i32
    %c0_i32_0 = arith.constant 0 : i32
    %c0_i32_1 = arith.constant 0 : i32
    %c0_i32_2 = arith.constant 0 : i32
    return %c0_i32, %c0_i32_0, %c0_i32_1 : i32, i32, i32
  }
  func.func @transform_3(%arg0: i32, %arg1: i32) -> (i32, i32, i32) {
    %c0_i32 = arith.constant 0 : i32
    %c0_i32_0 = arith.constant 0 : i32
    return %arg0, %c0_i32, %arg1 : i32, i32, i32
  }
  func.func @transform_4(%arg0: i32, %arg1: i32) -> (i32, i32, i32, i32) {
    %c0_i32 = arith.constant 0 : i32
    %c0_i32_0 = arith.constant 0 : i32
    %c0_i32_1 = arith.constant 0 : i32
    return %arg0, %arg1, %c0_i32, %c0_i32_0 : i32, i32, i32, i32
  }
  func.func @transform_5(%arg0: i32, %arg1: i32) -> (i32, i32, i32, i32) {
    %c0_i32 = arith.constant 0 : i32
    %c0_i32_0 = arith.constant 0 : i32
    %c0_i32_1 = arith.constant 0 : i32
    return %arg0, %arg1, %c0_i32, %c0_i32_0 : i32, i32, i32, i32
  }
}

module attributes {stable_mosaic.version = 11 : i64} {
  func.func @norm_act_kernel(%arg0: i32, %arg1: i32, %arg2: memref<1x8x4096xbf16, #tpu.memory_space<vmem>>, %arg3: memref<1x8x1xf32, #tpu.memory_space<vmem>>, %arg4: memref<1x8x1xf32, #tpu.memory_space<vmem>>, %arg5: memref<1x8x4096xf32, #tpu.memory_space<vmem>>) attributes {dimension_semantics = [#tpu.dimension_semantics<parallel>, #tpu.dimension_semantics<parallel>], iteration_bounds = array<i64: 2, 1>, scalar_prefetch = 0 : i64, scratch_operands = 0 : i64, tpu.core_type = #tpu.core_type<tc>, window_params = [{transform_indices = @transform_0, window_bounds = array<i64: 1, 8, 4096>}, {transform_indices = @transform_1, window_bounds = array<i64: 1, 8, 1>}, {transform_indices = @transform_2, window_bounds = array<i64: 1, 8, 1>}, {transform_indices = @transform_3, window_bounds = array<i64: 1, 8, 4096>}]} {
    %c0 = arith.constant 0 : index
    %c0_0 = arith.constant 0 : index
    %c0_1 = arith.constant 0 : index
    %0 = vector.load %arg2[%c0, %c0_0, %c0_1] : memref<1x8x4096xbf16, #tpu.memory_space<vmem>>, vector<1x8x4096xbf16>
    %1 = vector.shape_cast %0 : vector<1x8x4096xbf16> to vector<8x4096xbf16>
    %2 = arith.extf %1 : vector<8x4096xbf16> to vector<8x4096xf32>
    %c0_2 = arith.constant 0 : index
    %c0_3 = arith.constant 0 : index
    %c0_4 = arith.constant 0 : index
    %3 = vector.load %arg3[%c0_2, %c0_3, %c0_4] : memref<1x8x1xf32, #tpu.memory_space<vmem>>, vector<1x8x1xf32>
    %4 = vector.shape_cast %3 : vector<1x8x1xf32> to vector<8x1xf32>
    %5 = vector.broadcast %4 : vector<8x1xf32> to vector<8x4096xf32>
    %6 = arith.mulf %2, %5 : vector<8x4096xf32>
    %c0_5 = arith.constant 0 : index
    %c0_6 = arith.constant 0 : index
    %c0_7 = arith.constant 0 : index
    %7 = vector.load %arg4[%c0_5, %c0_6, %c0_7] : memref<1x8x1xf32, #tpu.memory_space<vmem>>, vector<1x8x1xf32>
    %8 = vector.shape_cast %7 : vector<1x8x1xf32> to vector<8x1xf32>
    %9 = vector.broadcast %8 : vector<8x1xf32> to vector<8x4096xf32>
    %10 = arith.addf %6, %9 : vector<8x4096xf32>
    %cst = arith.constant 0.000000e+00 : f32
    %11 = vector.broadcast %cst : f32 to vector<8x4096xf32>
    %12 = arith.cmpf oge, %10, %11 : vector<8x4096xf32>
    %cst_8 = arith.constant 0.00999999977 : f32
    %13 = vector.broadcast %cst_8 : f32 to vector<8x4096xf32>
    %14 = arith.mulf %13, %10 : vector<8x4096xf32>
    %15 = arith.select %12, %10, %14 : vector<8x4096xi1>, vector<8x4096xf32>
    %c0_9 = arith.constant 0 : index
    %c0_10 = arith.constant 0 : index
    %c0_11 = arith.constant 0 : index
    %16 = vector.load %arg5[%c0_9, %c0_10, %c0_11] : memref<1x8x4096xf32, #tpu.memory_space<vmem>>, vector<1x8x4096xf32>
    %17 = vector.shape_cast %16 : vector<1x8x4096xf32> to vector<8x4096xf32>
    %18 = vector.shape_cast %15 : vector<8x4096xf32> to vector<1x8x4096xf32>
    tpu.vector_store %arg5[%c0_9, %c0_10, %c0_11], %18 {strides = array<i32>} : memref<1x8x4096xf32, #tpu.memory_space<vmem>>, vector<1x8x4096xf32>,
    return
  }
  func.func @transform_0(%arg0: i32, %arg1: i32) -> (i32, i32, i32) {
    %c0_i32 = arith.constant 0 : i32
    %c0_i32_0 = arith.constant 0 : i32
    return %arg0, %c0_i32, %arg1 : i32, i32, i32
  }
  func.func @transform_1(%arg0: i32, %arg1: i32) -> (i32, i32, i32) {
    %c0_i32 = arith.constant 0 : i32
    %c0_i32_0 = arith.constant 0 : i32
    %c0_i32_1 = arith.constant 0 : i32
    return %arg0, %c0_i32, %c0_i32_0 : i32, i32, i32
  }
  func.func @transform_2(%arg0: i32, %arg1: i32) -> (i32, i32, i32) {
    %c0_i32 = arith.constant 0 : i32
    %c0_i32_0 = arith.constant 0 : i32
    %c0_i32_1 = arith.constant 0 : i32
    return %arg0, %c0_i32, %c0_i32_0 : i32, i32, i32
  }
  func.func @transform_3(%arg0: i32, %arg1: i32) -> (i32, i32, i32) {
    %c0_i32 = arith.constant 0 : i32
    %c0_i32_0 = arith.constant 0 : i32
    return %arg0, %c0_i32, %arg1 : i32, i32, i32
  }
}

</mosaic_0001>

<bundles_post_ra>
// kernel: conv_block_forward.3
= control target key start
LH: loop header
LB: loop body
LE: loop exit
PB: predicated region body
PF: predicated region fallthrough
CT: control target
= control target key end

     0   :  { %s693_s12 = smov 0   ;;  %s695_s13 = smov 0   ;;  %s939_s0 = inlined_call_operand.vmem [shape: bf16[2,8,4096], index: 0, kind: input, shape index: {}]   ;;  %s940_s1 = inlined_call_operand.vmem [shape: f32[2,8,1], index: 1, kind: input, shape index: {}]   ;;  %s941_s2 = inlined_call_operand.vmem [shape: f32[2,8,1], index: 2, kind: input, shape index: {}]   ;;  %s942_s3 = inlined_call_operand.vmem [shape: f32[2,8,4096], index: 3, kind: output, shape index: {}]  }
   0x1   :  { %s697_s14 = smov 0  }
   0x2 LB: > { %s25_s15 = sadd.s32 1, %s666_s13  ;;  %p611_p0 = scmp.ge.s32.totalorder %s670_s14, 1  ;;  %s670_s14 = sphi %s697_s14, %s13_s14   ;;  %s666_s13 = sphi %s695_s13, %s944_s13   ;;  %s662_s12 = sphi %s693_s12, %s943_s12  }
   0x3   : > { %p27_p1 = scmp.ge.s32.totalorder %s25_s15, 2  ;;  %p176_p2 = scmp.lt.s32.totalorder %s670_s14, 3 }
   0x5   : > { %s946_s15 = smov (%p27_p1, %s25_s15), 0  ;;  %p177_p3 = pnand %p611_p0, %p176_p2 }
   0x6   : > { %p217_p4 = scmp.lt.s32.totalorder (!%p177_p3), %s662_s12, 1 }
   0x7   : > { %180 = sbr.rel (%p177_p3) target bundleno = 176 (0xb0), region = 32 }
   0xc   : > { %v672_v0 = vmov 0   ;;  %s948_s12 = smov (!%p217_p4, %s662_s12), 1 }
   0xd   : > { %647 = vset.pattern.permute.xlu0 %v672_v0  ;;  %s614_s16 = sshll.u32 %s948_s12, 3  ;;  %s620_s23 = sshll.u32 %s948_s12, 7 }
   0xe   : > { %s229_s19 = scalar_lea.vmem %s940_s1, %s614_s16  ;;  %s233_s22 = scalar_lea.vmem %s941_s2, %s614_s16 }
   0xf   : > { %v292_v1 = vld [vmem:[%s229_s19] sm:$0xff]  ;;  %s724_s26 = scalar_lea.vmem %s939_s0, %s620_s23  ;;  %s621_s27 = sshll.u32 %s948_s12, 8 }
  0x10   : > { %295 = vperm.xlu0 %647, %v292_v1   ;;  %v330_v2 = vld [vmem:[%s233_s22] sm:$0xff]  ;;  %v245_v5 = vld [vmem:[%s724_s26 + $0x8] sm:$0xff]  ;;  %v246_v6 = vld [vmem:[%s724_s26 + $0x10] sm:$0xff]  ;;  %s794_s30 = scalar_lea.vmem %s942_s3, %s621_s27 }
  0x11   : > { %v244_v4 = vld [vmem:[%s724_s26] sm:$0xff]  ;;  %v247_v7 = vld [vmem:[%s724_s26 + $0x18] sm:$0xff]  ;;  %v249_v9 = vld [vmem:[%s724_s26 + $0x28] sm:$0xff]  ;;  %v262_v14 = vunpack.c.l.bf16 %v245_v5  ;;  %v263_v17 = vunpack.c.h.bf16 %v245_v5  ;;  %v264_v18 = vunpack.c.l.bf16 %v246_v6  ;;  %v265_v19 = vunpack.c.h.bf16 %v246_v6 }
  0x12   : > { %v248_v8 = vld [vmem:[%s724_s26 + $0x20] sm:$0xff]  ;;  %v250_v10 = vld [vmem:[%s724_s26 + $0x30] sm:$0xff]  ;;  %v251_v11 = vld [vmem:[%s724_s26 + $0x38] sm:$0xff]  ;;  %v260_v12 = vunpack.c.l.bf16 %v244_v4  ;;  %v261_v13 = vunpack.c.h.bf16 %v244_v4  ;;  %v266_v20 = vunpack.c.l.bf16 %v247_v7  ;;  %v267_v23 = vunpack.c.h.bf16 %v247_v7 }
  0x13   : > { %v252_v15 = vld [vmem:[%s724_s26 + $0x40] sm:$0xff]  ;;  %v253_v16 = vld [vmem:[%s724_s26 + $0x48] sm:$0xff]  ;;  %v254_v21 = vld [vmem:[%s724_s26 + $0x50] sm:$0xff]  ;;  %v268_v24 = vunpack.c.l.bf16 %v248_v8  ;;  %v269_v25 = vunpack.c.h.bf16 %v248_v8  ;;  %v270_v26 = vunpack.c.l.bf16 %v249_v9  ;;  %v271_v29 = vunpack.c.h.bf16 %v249_v9 }
  0x14   : > { %v255_v22 = vld [vmem:[%s724_s26 + $0x58] sm:$0xff]  ;;  %v256_v27 = vld [vmem:[%s724_s26 + $0x60] sm:$0xff]  ;;  %v742_v28 = vld [vmem:[%s724_s26 + $0x68] sm:$0xff]  ;;  %v272_v30 = vunpack.c.l.bf16 %v250_v10  ;;  %v273_v31 = vunpack.c.h.bf16 %v250_v10  ;;  %v274_v32 = vunpack.c.l.bf16 %v251_v11  ;;  %v275_v34 = vunpack.c.h.bf16 %v251_v11 }
  0x15   : > { %v745_v33 = vld [vmem:[%s724_s26 + $0x70] sm:$0xff]  ;;  %v276_v35 = vunpack.c.l.bf16 %v252_v15  ;;  %v277_v36 = vunpack.c.h.bf16 %v252_v15  ;;  %v278_v37 = vunpack.c.l.bf16 %v253_v16  ;;  %v748_v38 = vld [vmem:[%s724_s26 + $0x78] sm:$0xff]  ;;  %v279_v39 = vunpack.c.h.bf16 %v253_v16 }
  0x16   : > { %v280_v40 = vunpack.c.l.bf16 %v254_v21  ;;  %v281_v41 = vunpack.c.h.bf16 %v254_v21  ;;  %v282_v42 = vunpack.c.l.bf16 %v255_v22  ;;  %v283_v43 = vunpack.c.h.bf16 %v255_v22 }
  0x17   : > { %v284_v44 = vunpack.c.l.bf16 %v256_v27  ;;  %v285_v45 = vunpack.c.h.bf16 %v256_v27  ;;  %v286_v46 = vunpack.c.l.bf16 %v742_v28  ;;  %v287_v48 = vunpack.c.h.bf16 %v742_v28 }
  0x18   : > { %333 = vperm.xlu0 %647, %v330_v2   ;;  %v288_v49 = vunpack.c.l.bf16 %v745_v33  ;;  %v289_v50 = vunpack.c.h.bf16 %v745_v33  ;;  %v290_v52 = vunpack.c.l.bf16 %v748_v38  ;;  %v291_v53 = vunpack.c.h.bf16 %v748_v38 }
  0x82   : > { %v726_v3 = vpop.permute.xlu0 %295 }
  0x83   : > { %v298_v51 = vmul.f32 %v726_v3, %v260_v12  ;;  %v299_v54 = vmul.f32 %v726_v3, %v261_v13  ;;  %v300_v55 = vmul.f32 %v726_v3, %v262_v14  ;;  %v301_v56 = vmul.f32 %v726_v3, %v263_v17 }
  0x84   : > { %v302_v57 = vmul.f32 %v726_v3, %v264_v18  ;;  %v303_v58 = vmul.f32 %v726_v3, %v265_v19  ;;  %v304_v60 = vmul.f32 %v726_v3, %v266_v20  ;;  %v305_v61 = vmul.f32 %v726_v3, %v267_v23 }
  0x85   : > { %v306_v62 = vmul.f32 %v726_v3, %v268_v24  ;;  %v307_v63 = vmul.f32 %v726_v3, %v269_v25  ;;  %v308_v0 = vmul.f32 %v726_v3, %v270_v26  ;;  %v309_v1 = vmul.f32 %v726_v3, %v271_v29 }
  0x86   : > { %v310_v2 = vmul.f32 %v726_v3, %v272_v30  ;;  %v311_v4 = vmul.f32 %v726_v3, %v273_v31  ;;  %v312_v5 = vmul.f32 %v726_v3, %v274_v32  ;;  %v776_v6 = vmul.f32 %v726_v3, %v275_v34 }
  0x87   : > { %v779_v7 = vmul.f32 %v726_v3, %v276_v35  ;;  %v782_v8 = vmul.f32 %v726_v3, %v277_v36  ;;  %v785_v9 = vmul.f32 %v726_v3, %v278_v37  ;;  %v788_v10 = vmul.f32 %v726_v3, %v279_v39 }
  0x88   : > { %v797_v12 = vmul.f32 %v726_v3, %v280_v40  ;;  %v800_v13 = vmul.f32 %v726_v3, %v281_v41  ;;  %v804_v16 = vmul.f32 %v726_v3, %v282_v42  ;;  %v807_v17 = vmul.f32 %v726_v3, %v283_v43 }
  0x89   : > { %v810_v18 = vmul.f32 %v726_v3, %v284_v44  ;;  %v814_v20 = vmul.f32 %v726_v3, %v285_v45  ;;  %v817_v21 = vmul.f32 %v726_v3, %v286_v46  ;;  %v821_v24 = vmul.f32 %v726_v3, %v287_v48 }
  0x8a   : > { %v751_v47 = vpop.permute.xlu0 %333  ;;  %v824_v25 = vmul.f32 %v726_v3, %v288_v49  ;;  %v829_v28 = vmul.f32 %v726_v3, %v289_v50  ;;  %v833_v31 = vmul.f32 %v726_v3, %v290_v52  ;;  %v837_v34 = vmul.f32 %v726_v3, %v291_v53 }
  0x8b   : > { %v336_v59 = vadd.f32 %v751_v47, %v298_v51  ;;  %v337_v11 = vadd.f32 %v751_v47, %v299_v54  ;;  %v338_v14 = vadd.f32 %v751_v47, %v300_v55  ;;  %v339_v19 = vadd.f32 %v751_v47, %v301_v56 }
  0x8c   : > { %v340_v22 = vadd.f32 %v751_v47, %v302_v57  ;;  %v341_v26 = vadd.f32 %v751_v47, %v303_v58  ;;  %v342_v29 = vadd.f32 %v751_v47, %v304_v60  ;;  %v343_v32 = vadd.f32 %v751_v47, %v305_v61 }
  0x8d   : > { %vm368_vm0 = vcmp.ge.f32.partialorder %v336_v59, 0.0  ;;  %v400_v15 = vmul.f32 0.01, %v336_v59  ;;  %v401_v27 = vmul.f32 0.01, %v337_v11  ;;  %vm369_vm1 = vcmp.ge.f32.partialorder %v337_v11, 0.0 }
  0x8e   : > { %v402_v30 = vmul.f32 0.01, %v338_v14  ;;  %vm370_vm2 = vcmp.ge.f32.partialorder %v338_v14, 0.0  ;;  %v403_v33 = vmul.f32 0.01, %v339_v19  ;;  %v344_v35 = vadd.f32 %v751_v47, %v306_v62 }
  0x8f   : > { %v432_v23 = vsel %vm368_vm0, %v336_v59, %v400_v15  ;;  %vm371_vm3 = vcmp.ge.f32.partialorder %v339_v19, 0.0  ;;  %v404_v36 = vmul.f32 0.01, %v340_v22  ;;  %v345_v37 = vadd.f32 %v751_v47, %v307_v63 }
  0x90   : > { %464 = vst [vmem:[%s794_s30] sm:$0xff] %v432_v23  ;;  %vm372_vm4 = vcmp.ge.f32.partialorder %v340_v22, 0.0  ;;  %v405_v38 = vmul.f32 0.01, %v341_v26  ;;  %v433_v39 = vsel %vm369_vm1, %v337_v11, %v401_v27  ;;  %v346_v40 = vadd.f32 %v751_v47, %v308_v0 }
  0x91   : > { %vm373_vm5 = vcmp.ge.f32.partialorder %v341_v26, 0.0  ;;  %v406_v41 = vmul.f32 0.01, %v342_v29  ;;  %v434_v42 = vsel %vm370_vm2, %v338_v14, %v402_v30  ;;  %v347_v43 = vadd.f32 %v751_v47, %v309_v1  ;;  %465 = vst [vmem:[%s794_s30 + $0x8] sm:$0xff] %v433_v39 }
  0x92   : > { %vm374_vm6 = vcmp.ge.f32.partialorder %v342_v29, 0.0  ;;  %v407_v3 = vmul.f32 0.01, %v343_v32  ;;  %v435_v44 = vsel %vm371_vm3, %v339_v19, %v403_v33  ;;  %v348_v45 = vadd.f32 %v751_v47, %v310_v2  ;;  %466 = vst [vmem:[%s794_s30 + $0x10] sm:$0xff] %v434_v42 }
  0x93   : > { %vm375_vm7 = vcmp.ge.f32.partialorder %v343_v32, 0.0  ;;  %v408_v46 = vmul.f32 0.01, %v344_v35  ;;  %v436_v48 = vsel %vm372_vm4, %v340_v22, %v404_v36  ;;  %v349_v49 = vadd.f32 %v751_v47, %v311_v4  ;;  %467 = vst [vmem:[%s794_s30 + $0x18] sm:$0xff] %v435_v44 }
  0x94   : > { %vm376_vm8 = vcmp.ge.f32.partialorder %v344_v35, 0.0  ;;  %v409_v50 = vmul.f32 0.01, %v345_v37  ;;  %v437_v51 = vsel %vm373_vm5, %v341_v26, %v405_v38  ;;  %v350_v52 = vadd.f32 %v751_v47, %v312_v5  ;;  %468 = vst [vmem:[%s794_s30 + $0x20] sm:$0xff] %v436_v48 }
  0x95   : > { %vm377_vm9 = vcmp.ge.f32.partialorder %v345_v37, 0.0  ;;  %v410_v53 = vmul.f32 0.01, %v346_v40  ;;  %v438_v54 = vsel %vm374_vm6, %v342_v29, %v406_v41  ;;  %v351_v55 = vadd.f32 %v751_v47, %v776_v6  ;;  %469 = vst [vmem:[%s794_s30 + $0x28] sm:$0xff] %v437_v51 }
  0x96   : > { %vm378_vm10 = vcmp.ge.f32.partialorder %v346_v40, 0.0  ;;  %v411_v56 = vmul.f32 0.01, %v347_v43  ;;  %v439_v57 = vsel %vm375_vm7, %v343_v32, %v407_v3  ;;  %v352_v58 = vadd.f32 %v751_v47, %v779_v7  ;;  %470 = vst [vmem:[%s794_s30 + $0x30] sm:$0xff] %v438_v54 }
  0x97   : > { %vm379_vm11 = vcmp.ge.f32.partialorder %v347_v43, 0.0  ;;  %v412_v59 = vmul.f32 0.01, %v348_v45  ;;  %v440_v60 = vsel %vm376_vm8, %v344_v35, %v408_v46  ;;  %v353_v61 = vadd.f32 %v751_v47, %v782_v8  ;;  %471 = vst [vmem:[%s794_s30 + $0x38] sm:$0xff] %v439_v57 }
  0x98   : > { %vm380_vm12 = vcmp.ge.f32.partialorder %v348_v45, 0.0  ;;  %v413_v62 = vmul.f32 0.01, %v349_v49  ;;  %v441_v63 = vsel %vm377_vm9, %v345_v37, %v409_v50  ;;  %v354_v0 = vadd.f32 %v751_v47, %v785_v9  ;;  %472 = vst [vmem:[%s794_s30 + $0x40] sm:$0xff] %v440_v60 }
  0x99   : > { %vm381_vm13 = vcmp.ge.f32.partialorder %v349_v49, 0.0  ;;  %v414_v1 = vmul.f32 0.01, %v350_v52  ;;  %v442_v2 = vsel %vm378_vm10, %v346_v40, %v410_v53  ;;  %v355_v4 = vadd.f32 %v751_v47, %v788_v10  ;;  %473 = vst [vmem:[%s794_s30 + $0x48] sm:$0xff] %v441_v63 }
  0x9a   : > { %vm382_vm14 = vcmp.ge.f32.partialorder %v350_v52, 0.0  ;;  %v415_v5 = vmul.f32 0.01, %v351_v55  ;;  %v443_v6 = vsel %vm379_vm11, %v347_v43, %v411_v56  ;;  %v356_v7 = vadd.f32 %v751_v47, %v797_v12  ;;  %474 = vst [vmem:[%s794_s30 + $0x50] sm:$0xff] %v442_v2 }
  0x9b   : > { %vm383_vm15 = vcmp.ge.f32.partialorder %v351_v55, 0.0  ;;  %v416_v8 = vmul.f32 0.01, %v352_v58  ;;  %v444_v9 = vsel %vm380_vm12, %v348_v45, %v412_v59  ;;  %v357_v11 = vadd.f32 %v751_v47, %v800_v13  ;;  %475 = vst [vmem:[%s794_s30 + $0x58] sm:$0xff] %v443_v6 }
  0x9c   : > { %vm384_vm0 = vcmp.ge.f32.partialorder %v352_v58, 0.0  ;;  %v417_v10 = vmul.f32 0.01, %v353_v61  ;;  %v445_v14 = vsel %vm381_vm13, %v349_v49, %v413_v62  ;;  %v358_v15 = vadd.f32 %v751_v47, %v804_v16  ;;  %476 = vst [vmem:[%s794_s30 + $0x60] sm:$0xff] %v444_v9 }
  0x9d   : > { %vm385_vm1 = vcmp.ge.f32.partialorder %v353_v61, 0.0  ;;  %v418_v12 = vmul.f32 0.01, %v354_v0  ;;  %v446_v19 = vsel %vm382_vm14, %v350_v52, %v414_v1  ;;  %v359_v22 = vadd.f32 %v751_v47, %v807_v17  ;;  %477 = vst [vmem:[%s794_s30 + $0x68] sm:$0xff] %v445_v14 }
  0x9e   : > { %vm386_vm2 = vcmp.ge.f32.partialorder %v354_v0, 0.0  ;;  %v419_v13 = vmul.f32 0.01, %v355_v4  ;;  %v447_v23 = vsel %vm383_vm15, %v351_v55, %v415_v5  ;;  %v360_v26 = vadd.f32 %v751_v47, %v810_v18  ;;  %478 = vst [vmem:[%s794_s30 + $0x70] sm:$0xff] %v446_v19 }
  0x9f   : > { %vm387_vm3 = vcmp.ge.f32.partialorder %v355_v4, 0.0  ;;  %v420_v16 = vmul.f32 0.01, %v356_v7  ;;  %v448_v27 = vsel %vm384_vm0, %v352_v58, %v416_v8  ;;  %v361_v29 = vadd.f32 %v751_v47, %v814_v20  ;;  %479 = vst [vmem:[%s794_s30 + $0x78] sm:$0xff] %v447_v23 }
  0xa0   : > { %vm388_vm4 = vcmp.ge.f32.partialorder %v356_v7, 0.0  ;;  %v421_v17 = vmul.f32 0.01, %v357_v11  ;;  %v449_v30 = vsel %vm385_vm1, %v353_v61, %v417_v10  ;;  %v362_v32 = vadd.f32 %v751_v47, %v817_v21  ;;  %480 = vst [vmem:[%s794_s30 + $0x80] sm:$0xff] %v448_v27 }
  0xa1   : > { %vm389_vm5 = vcmp.ge.f32.partialorder %v357_v11, 0.0  ;;  %v422_v18 = vmul.f32 0.01, %v358_v15  ;;  %v450_v33 = vsel %vm386_vm2, %v354_v0, %v418_v12  ;;  %v363_v35 = vadd.f32 %v751_v47, %v821_v24  ;;  %481 = vst [vmem:[%s794_s30 + $0x88] sm:$0xff] %v449_v30 }
  0xa2   : > { %vm390_vm6 = vcmp.ge.f32.partialorder %v358_v15, 0.0  ;;  %v423_v20 = vmul.f32 0.01, %v359_v22  ;;  %v451_v36 = vsel %vm387_vm3, %v355_v4, %v419_v13  ;;  %v364_v37 = vadd.f32 %v751_v47, %v824_v25  ;;  %482 = vst [vmem:[%s794_s30 + $0x90] sm:$0xff] %v450_v33 }
  0xa3   : > { %vm391_vm7 = vcmp.ge.f32.partialorder %v359_v22, 0.0  ;;  %v424_v21 = vmul.f32 0.01, %v360_v26  ;;  %v452_v38 = vsel %vm388_vm4, %v356_v7, %v420_v16  ;;  %v365_v39 = vadd.f32 %v751_v47, %v829_v28  ;;  %483 = vst [vmem:[%s794_s30 + $0x98] sm:$0xff] %v451_v36 }
  0xa4   : > { %vm392_vm8 = vcmp.ge.f32.partialorder %v360_v26, 0.0  ;;  %v425_v24 = vmul.f32 0.01, %v361_v29  ;;  %v453_v40 = vsel %vm389_vm5, %v357_v11, %v421_v17  ;;  %v366_v41 = vadd.f32 %v751_v47, %v833_v31  ;;  %484 = vst [vmem:[%s794_s30 + $0xa0] sm:$0xff] %v452_v38 }
  0xa5   : > { %vm393_vm9 = vcmp.ge.f32.partialorder %v361_v29, 0.0  ;;  %v426_v25 = vmul.f32 0.01, %v362_v32  ;;  %v454_v42 = vsel %vm390_vm6, %v358_v15, %v422_v18  ;;  %v367_v43 = vadd.f32 %v751_v47, %v837_v34  ;;  %485 = vst [vmem:[%s794_s30 + $0xa8] sm:$0xff] %v453_v40 }
  0xa6   : > { %vm394_vm10 = vcmp.ge.f32.partialorder %v362_v32, 0.0  ;;  %v427_v28 = vmul.f32 0.01, %v363_v35  ;;  %v455_v3 = vsel %vm391_vm7, %v359_v22, %v423_v20  ;;  %vm395_vm11 = vcmp.ge.f32.partialorder %v363_v35, 0.0  ;;  %486 = vst [vmem:[%s794_s30 + $0xb0] sm:$0xff] %v454_v42 }
  0xa7   : > { %v428_v44 = vmul.f32 0.01, %v364_v37  ;;  %v456_v31 = vsel %vm392_vm8, %v360_v26, %v424_v21  ;;  %vm396_vm12 = vcmp.ge.f32.partialorder %v364_v37, 0.0  ;;  %v429_v45 = vmul.f32 0.01, %v365_v39  ;;  %487 = vst [vmem:[%s794_s30 + $0xb8] sm:$0xff] %v455_v3 }
  0xa8   : > { %v457_v46 = vsel %vm393_vm9, %v361_v29, %v425_v24  ;;  %vm397_vm13 = vcmp.ge.f32.partialorder %v365_v39, 0.0  ;;  %v430_v47 = vmul.f32 0.01, %v366_v41  ;;  %v458_v34 = vsel %vm394_vm10, %v362_v32, %v426_v25  ;;  %488 = vst [vmem:[%s794_s30 + $0xc0] sm:$0xff] %v456_v31 }
  0xa9   : > { %vm398_vm14 = vcmp.ge.f32.partialorder %v366_v41, 0.0  ;;  %v431_v48 = vmul.f32 0.01, %v367_v43  ;;  %v459_v49 = vsel %vm395_vm11, %v363_v35, %v427_v28  ;;  %vm399_vm15 = vcmp.ge.f32.partialorder %v367_v43, 0.0  ;;  %489 = vst [vmem:[%s794_s30 + $0xc8] sm:$0xff] %v457_v46 }
  0xaa   : > { %v460_v50 = vsel %vm396_vm12, %v364_v37, %v428_v44  ;;  %v461_v51 = vsel %vm397_vm13, %v365_v39, %v429_v45  ;;  %490 = vst [vmem:[%s794_s30 + $0xd0] sm:$0xff] %v458_v34  ;;  %v462_v52 = vsel %vm398_vm14, %v366_v41, %v430_v47 }
  0xab   : > { %491 = vst [vmem:[%s794_s30 + $0xd8] sm:$0xff] %v459_v49  ;;  %v463_v53 = vsel %vm399_vm15, %v367_v43, %v431_v48 }
  0xac   : > { %492 = vst [vmem:[%s794_s30 + $0xe0] sm:$0xff] %v460_v50 }
  0xad   : > { %493 = vst [vmem:[%s794_s30 + $0xe8] sm:$0xff] %v461_v51 }
  0xae   : > { %494 = vst [vmem:[%s794_s30 + $0xf0] sm:$0xff] %v462_v52 }
  0xaf   : > { %495 = vst [vmem:[%s794_s30 + $0xf8] sm:$0xff] %v463_v53 }
  0xb0 PF: > { %s13_s14 = sadd.s32 1, %s670_s14   ;;  %s943_s12 = smov %s666_s13 }
  0xb1   : > { %p10_p5 = scmp.ge.s32.totalorder %s13_s14, 4   ;;  %s944_s13 = smov %s946_s15 }
  0xb3   :  { %12 = sbr.rel (!%p10_p5) target bundleno = 2 (0x2), region = 68 }

// kernel: conv_block_forward.2
= control target key start
LH: loop header
LB: loop body
LE: loop exit
PB: predicated region body
PF: predicated region fallthrough
CT: control target
= control target key end

     0   :  { %s5441_s18 = smov 0   ;;  %s5443_s19 = smov 0   ;;  %s6482_s0 = inlined_call_operand.vmem [shape: bf16[2,18,36,256], index: 0, kind: input, shape index: {}, may-alias: {0,1}]   ;;  %s6483_s1 = inlined_call_operand.vmem [shape: bf16[2,18,36,256], index: 1, kind: input, shape index: {}, may-alias: {0,1}]   ;;  %s6484_s2 = inlined_call_operand.vmem [shape: bf16[3,8,36], index: 2, kind: input, shape index: {}]   ;;  %s6485_s3 = inlined_call_operand.vmem [shape: bf16[2,8,4096], index: 3, kind: output, shape index: {0}]   ;;  %s6486_s4 = inlined_call_operand.vmem [shape: f32[2,1,8,1], index: 4, kind: output, shape index: {1}]   ;;  %s6487_s5 = inlined_call_operand.vmem [shape: f32[2,1,8,1], index: 5, kind: output, shape index: {2}]  }
   0x1   :  { %s5445_s20 = smov 0  }
   0x2 LB: > { %s28_s21 = sadd.s32 1, %s5405_s19  ;;  %p4035_p0 = scmp.ge.s32.totalorder %s5409_s20, 1  ;;  %s5409_s20 = sphi %s5445_s20, %s16_s20   ;;  %s5405_s19 = sphi %s5443_s19, %s6489_s19   ;;  %s5401_s18 = sphi %s5441_s18, %s6488_s18  }
   0x3   : > { %p30_p1 = scmp.ge.s32.totalorder %s28_s21, 2  ;;  %p256_p2 = scmp.lt.s32.totalorder %s5409_s20, 3 }
   0x5   : > { %s6491_s21 = smov (%p30_p1, %s28_s21), 0  ;;  %p257_p3 = pnand %p4035_p0, %p256_p2 }
   0x6   : > { %p332_p4 = scmp.lt.s32.totalorder (!%p257_p3), %s5401_s18, 1 }
   0x7   : > { %260 = sbr.rel (%p257_p3) target bundleno = 841 (0x349), region = 32 }
   0xc   : > { %s6493_s18 = smov (!%p332_p4, %s5401_s18), 1  ;;  %vm431_vm0 = vcmask 1041408   ;;  %v4047_v46 = vld [vmem:[%s6484_s2 + $0x4] sm:$0xf]  ;;  %vm427_vm1 = vcmask 293888   ;;  %vm3770_vm2 = vcmask 7168  }
   0xd   : > { %s5360_s22 = smul.u32 720, %s6493_s18  ;;  %v393_v56 = vld [vmem:[%s6484_s2] sm:$0xf]  ;;  %s5167_s23 = sshll.u32 %s6493_s18, 7 }
   0xe   : > { %s5823_s6 = scalar_lea.vmem %s6485_s3, %s5167_s23  ;;  %s4040_s11 = sshll.u32 %s6493_s18, 3 }
   0xf   : > { %s5467_s25 = scalar_lea.vmem %s6482_s0, %s5360_s22  ;;  %s5166_s7 = sadd.s32 640, %s5360_s22 }
  0x10   : > { %v4046_v0 = vld [vmem:[%s5467_s25 + $0x48] sm:$0x33]  ;;  %v392_v1 = vld [vmem:[%s5467_s25 + $0x20] sm:$0x33]  ;;  %v4058_v6 = vld [vmem:[%s5467_s25 + $0x38] sm:$0xf]  ;;  %s6197_s13 = scalar_lea.vmem %s6483_s1, %s5166_s7  ;;  %s386_s15 = scalar_lea.vmem %s6487_s5, %s4040_s11 }
  0x11   : > { %v415_v2 = vunpack.c.l.b16 %v4046_v0  ;;  %v416_v3 = vunpack.c.h.b16 %v4046_v0  ;;  %v477_v4 = vunpack.c.l.b16 %v392_v1  ;;  %v478_v5 = vunpack.c.h.b16 %v392_v1  ;;  %v5175_v7 = vld [vmem:[%s5467_s25 + $0x3c] sm:$0xf0]  ;;  %v5174_v12 = vld [vmem:[%s5467_s25 + $0x3c] sm:$0xf]  ;;  %v4060_v13 = vld [vmem:[%s5467_s25 + $0x40] sm:$0xf0] }
  0x12   : > { %v4076_v14 = vld [vmem:[%s5467_s25 + $0x10] sm:$0xf]  ;;  %v5171_v15 = vld [vmem:[%s5467_s25 + $0x14] sm:$0xf0]  ;;  %v5170_v16 = vld [vmem:[%s5467_s25 + $0x14] sm:$0xf]  ;;  %v4059_v23 = vor.u32 %v5175_v7, %v4058_v6  ;;  %v4063_v24 = vor.u32 %v5174_v12, %v4060_v13 }
  0x13   : > { %v421_v8 = vpack.c.b16 %v415_v2, %v415_v2  ;;  %v422_v9 = vpack.c.b16 %v416_v3, %v416_v3  ;;  %v483_v10 = vpack.c.b16 %v477_v4, %v477_v4  ;;  %v484_v11 = vpack.c.b16 %v478_v5, %v478_v5  ;;  %v4078_v17 = vld [vmem:[%s5467_s25 + $0x18] sm:$0xf0]  ;;  %v4050_v22 = vld [vmem:[%s5467_s25 + $0x28] sm:$0xf]  ;;  %v5173_v25 = vld [vmem:[%s5467_s25 + $0x2c] sm:$0xf0] }
  0x14   : > { %v5172_v26 = vld [vmem:[%s5467_s25 + $0x2c] sm:$0xf]  ;;  %v4117_v27 = vld [vmem:[%s5467_s25 + $0x70] sm:$0x33]  ;;  %v4077_v28 = vor.u32 %v5171_v15, %v4076_v14  ;;  %v4081_v29 = vor.u32 %v5170_v16, %v4078_v17  ;;  %v4068_v31 = vld [vmem:[%s5467_s25] sm:$0xf]  ;;  %v4051_v42 = vor.u32 %v5173_v25, %v4050_v22 }
  0x15   : > { %v433_v18 = vsel %vm431_vm0, %v421_v8, 0  ;;  %v436_v19 = vsel %vm431_vm0, %v422_v9, 0  ;;  %v493_v20 = vsel %vm431_vm0, %v483_v10, 0  ;;  %v496_v21 = vsel %vm431_vm0, %v484_v11, 0  ;;  %v4052_v30 = vld [vmem:[%s5467_s25 + $0x30] sm:$0xf0] }
  0x16   : > { %443 = vmatpush.bf16.msra.mxu0 %v433_v18  ;;  %456 = vmatpush.bf16.msra.mxu1 %v436_v19  ;;  %v621_v32 = vunpack.c.l.b16 %v4117_v27  ;;  %v622_v33 = vunpack.c.h.b16 %v4117_v27  ;;  %v4088_v34 = vld [vmem:[%s5467_s25 + $0x70] sm:$0x33]  ;;  %v5169_v35 = vld [vmem:[%s5467_s25 + $0x4] sm:$0xf0]  ;;  %v5168_v36 = vld [vmem:[%s5467_s25 + $0x4] sm:$0xf]  ;;  %v4055_v43 = vor.u32 %v5172_v26, %v4052_v30 }
  0x17   : > { %503 = vmatpush.bf16.msra.mxu2 %v493_v20  ;;  %516 = vmatpush.bf16.msra.mxu3 %v496_v21  ;;  %v4070_v37 = vld [vmem:[%s5467_s25 + $0x8] sm:$0xf0]  ;;  %v545_v38 = vunpack.c.l.b16 %v4088_v34  ;;  %v546_v39 = vunpack.c.h.b16 %v4088_v34  ;;  %v4069_v44 = vor.u32 %v5169_v35, %v4068_v31  ;;  %v4129_v49 = vld [vmem:[%s5467_s25 + $0x60] sm:$0xf]  ;;  %v5187_v50 = vld [vmem:[%s5467_s25 + $0x64] sm:$0xf0] }
  0x18   : > { %v627_v40 = vpack.c.b16 %v621_v32, %v621_v32  ;;  %v628_v41 = vpack.c.b16 %v622_v33, %v622_v33  ;;  %v4073_v45 = vor.u32 %v5168_v36, %v4070_v37  ;;  %v5186_v51 = vld [vmem:[%s5467_s25 + $0x64] sm:$0xf]  ;;  %v4131_v54 = vld [vmem:[%s5467_s25 + $0x68] sm:$0xf0]  ;;  %v4159_v55 = vld [vmem:[%s5467_s25 + $0x98] sm:$0x33]  ;;  %v4130_v1 = vor.u32 %v5187_v50, %v4129_v49 }
  0x19   : > { %v551_v47 = vpack.c.b16 %v545_v38, %v545_v38  ;;  %v552_v48 = vpack.c.b16 %v546_v39, %v546_v39  ;;  %v748_v57 = vunpack.c.l.b16 %v4159_v55  ;;  %v749_v58 = vunpack.c.h.b16 %v4159_v55  ;;  %v4112_v59 = vld [vmem:[%s5467_s25 + $0x48] sm:$0x33]  ;;  %v4100_v60 = vld [vmem:[%s5467_s25 + $0x60] sm:$0xf]  ;;  %v5178_v62 = vld [vmem:[%s5467_s25 + $0x64] sm:$0xf] }
  0x1a   : > { %444 = vmatpush.bf16.msra.mxu0 %v4059_v23  ;;  %457 = vmatpush.bf16.msra.mxu1 %v4063_v24  ;;  %v637_v52 = vsel %vm431_vm0, %v627_v40, 0  ;;  %v640_v53 = vsel %vm431_vm0, %v628_v41, 0  ;;  %v5179_v61 = vld [vmem:[%s5467_s25 + $0x64] sm:$0xf0]  ;;  %v4134_v2 = vor.u32 %v5186_v51, %v4131_v54  ;;  %v4102_v3 = vld [vmem:[%s5467_s25 + $0x68] sm:$0xf0]  ;;  %v681_v8 = vunpack.c.l.b16 %v4112_v59 }
  0x1b   : > { %504 = vmatpush.bf16.msra.mxu2 %v4077_v28  ;;  %517 = vmatpush.bf16.msra.mxu3 %v4081_v29  ;;  %v561_v63 = vsel %vm431_vm0, %v551_v47, 0  ;;  %v564_v0 = vsel %vm431_vm0, %v552_v48, 0  ;;  %v4121_v4 = vld [vmem:[%s5467_s25 + $0x50] sm:$0xf]  ;;  %v5185_v5 = vld [vmem:[%s5467_s25 + $0x54] sm:$0xf0]  ;;  %v682_v9 = vunpack.c.h.b16 %v4112_v59  ;;  %v754_v10 = vpack.c.b16 %v748_v57, %v748_v57 }
  0x1c   : > { %v5184_v6 = vld [vmem:[%s5467_s25 + $0x54] sm:$0xf]  ;;  %v4123_v7 = vld [vmem:[%s5467_s25 + $0x58] sm:$0xf0]  ;;  %v755_v11 = vpack.c.b16 %v749_v58, %v749_v58  ;;  %v4101_v12 = vor.u32 %v5179_v61, %v4100_v60  ;;  %v4105_v13 = vor.u32 %v5178_v62, %v4102_v3  ;;  %v4092_v14 = vld [vmem:[%s5467_s25 + $0x50] sm:$0xf]  ;;  %v4122_v15 = vor.u32 %v5185_v5, %v4121_v4 }
  0x1d   : > { %v5177_v16 = vld [vmem:[%s5467_s25 + $0x54] sm:$0xf0]  ;;  %v5176_v17 = vld [vmem:[%s5467_s25 + $0x54] sm:$0xf]  ;;  %v4094_v18 = vld [vmem:[%s5467_s25 + $0x58] sm:$0xf0]  ;;  %v4126_v19 = vor.u32 %v5184_v6, %v4123_v7  ;;  %v687_v20 = vpack.c.b16 %v681_v8, %v681_v8  ;;  %v688_v21 = vpack.c.b16 %v682_v9, %v682_v9 }
  0x1e   : > { %445 = vmatpush.bf16.msra.mxu0 %v4051_v42  ;;  %458 = vmatpush.bf16.msra.mxu1 %v4055_v43  ;;  %v4171_v22 = vld [vmem:[%s5467_s25 + $0x88] sm:$0xf]  ;;  %v5191_v23 = vld [vmem:[%s5467_s25 + $0x8c] sm:$0xf0]  ;;  %v764_v24 = vsel %vm431_vm0, %v754_v10, 0  ;;  %v767_v25 = vsel %vm431_vm0, %v755_v11, 0  ;;  %v4093_v28 = vor.u32 %v5177_v16, %v4092_v14  ;;  %v4097_v29 = vor.u32 %v5176_v17, %v4094_v18 }
  0x1f   : > { %505 = vmatpush.bf16.msra.mxu2 %v4069_v44  ;;  %518 = vmatpush.bf16.msra.mxu3 %v4073_v45  ;;  %v5190_v26 = vld [vmem:[%s5467_s25 + $0x8c] sm:$0xf]  ;;  %v4173_v27 = vld [vmem:[%s5467_s25 + $0x90] sm:$0xf0]  ;;  %v4147_v31 = vld [vmem:[%s5467_s25 + $0x38] sm:$0xf]  ;;  %v4172_v36 = vor.u32 %v5191_v23, %v4171_v22 }
  0x20   : > { %v4183_v30 = vld [vmem:[%s5467_s25 + $0x70] sm:$0x33]  ;;  %v5183_v32 = vld [vmem:[%s5467_s25 + $0x3c] sm:$0xf0]  ;;  %v4188_v33 = vld [vmem:[%s5467_s25 + $0x98] sm:$0x33]  ;;  %v4176_v37 = vor.u32 %v5190_v26, %v4173_v27 }
  0x21   : > { %4064 = vmatmul.msk.bf16.vlgmr.msra.gmra.mxu0 %vm427_vm1, %v4047_v46  ;;  %4065 = vmatmul.msk.bf16.vlgmr.msra.gmra.mxu1 %vm427_vm1, %v4047_v46  ;;  %v697_v34 = vsel %vm431_vm0, %v687_v20, 0  ;;  %v700_v35 = vsel %vm431_vm0, %v688_v21, 0  ;;  %v5182_v38 = vld [vmem:[%s5467_s25 + $0x3c] sm:$0xf]  ;;  %v4149_v39 = vld [vmem:[%s5467_s25 + $0x40] sm:$0xf0]  ;;  %v884_v40 = vunpack.c.l.b16 %v4183_v30  ;;  %v885_v41 = vunpack.c.h.b16 %v4183_v30 }
  0x22   : > { %4082 = vmatmul.msk.bf16.vlgmr.msra.gmra.mxu2 %vm427_vm1, %v393_v56  ;;  %4083 = vmatmul.msk.bf16.vlgmr.msra.gmra.mxu3 %vm427_vm1, %v393_v56  ;;  %v4163_v42 = vld [vmem:[%s5467_s25 + $0x78] sm:$0xf]  ;;  %v5189_v43 = vld [vmem:[%s5467_s25 + $0x7c] sm:$0xf0]  ;;  %v824_v44 = vunpack.c.l.b16 %v4188_v33  ;;  %v825_v45 = vunpack.c.h.b16 %v4188_v33  ;;  %v4148_v46 = vor.u32 %v5183_v32, %v4147_v31  ;;  %v4152_v47 = vor.u32 %v5182_v38, %v4149_v39  ;;  %v4139_v48 = vld [vmem:[%s5467_s25 + $0x28] sm:$0xf] }
  0x23   : > { %647 = vmatpush.bf16.msrb.mxu2 %v637_v52  ;;  %660 = vmatpush.bf16.msrb.mxu3 %v640_v53  ;;  %v5188_v49 = vld [vmem:[%s5467_s25 + $0x7c] sm:$0xf]  ;;  %v4165_v50 = vld [vmem:[%s5467_s25 + $0x80] sm:$0xf0]  ;;  %v5181_v51 = vld [vmem:[%s5467_s25 + $0x2c] sm:$0xf0]  ;;  %v890_v55 = vpack.c.b16 %v884_v40, %v884_v40  ;;  %v891_v56 = vpack.c.b16 %v885_v41, %v885_v41  ;;  %v4164_v58 = vor.u32 %v5189_v43, %v4163_v42 }
  0x24   : > { %571 = vmatpush.bf16.msrb.mxu0 %v561_v63  ;;  %584 = vmatpush.bf16.msrb.mxu1 %v564_v0  ;;  %v5180_v52 = vld [vmem:[%s5467_s25 + $0x2c] sm:$0xf]  ;;  %v4141_v53 = vld [vmem:[%s5467_s25 + $0x30] sm:$0xf0]  ;;  %v4089_v54 = vld [vmem:[%s6484_s2 + $0x8] sm:$0xf]  ;;  %v4168_v59 = vor.u32 %v5188_v49, %v4165_v50  ;;  %v830_v60 = vpack.c.b16 %v824_v44, %v824_v44  ;;  %v831_v61 = vpack.c.b16 %v825_v45, %v825_v45 }
  0x25   : > { %v4118_v57 = vld [vmem:[%s6484_s2 + $0x4] sm:$0xf]  ;;  %v4140_v62 = vor.u32 %v5181_v51, %v4139_v48  ;;  %v4144_v63 = vor.u32 %v5180_v52, %v4141_v53  ;;  %v4218_v0 = vld [vmem:[%s5467_s25 + $0x60] sm:$0xf]  ;;  %v4220_v3 = vld [vmem:[%s5467_s25 + $0x68] sm:$0xf0] }
  0x26   : > { %v900_v4 = vsel %vm431_vm0, %v890_v55, 0  ;;  %v903_v5 = vsel %vm431_vm0, %v891_v56, 0  ;;  %v4200_v6 = vld [vmem:[%s5467_s25 + $0x88] sm:$0xf]  ;;  %v5199_v7 = vld [vmem:[%s5467_s25 + $0x8c] sm:$0xf0] }
  0x27   : > { %648 = vmatpush.bf16.msrb.mxu2 %v4130_v1  ;;  %661 = vmatpush.bf16.msrb.mxu3 %v4134_v2  ;;  %v5195_v1 = vld [vmem:[%s5467_s25 + $0x64] sm:$0xf0]  ;;  %v5194_v2 = vld [vmem:[%s5467_s25 + $0x64] sm:$0xf]  ;;  %v840_v8 = vsel %vm431_vm0, %v830_v60, 0  ;;  %v843_v9 = vsel %vm431_vm0, %v831_v61, 0  ;;  %v4201_v18 = vor.u32 %v5199_v7, %v4200_v6 }
  0x28   : > { %572 = vmatpush.bf16.msrb.mxu0 %v4101_v12  ;;  %585 = vmatpush.bf16.msrb.mxu1 %v4105_v13  ;;  %v5198_v10 = vld [vmem:[%s5467_s25 + $0x8c] sm:$0xf]  ;;  %v4202_v11 = vld [vmem:[%s5467_s25 + $0x90] sm:$0xf0]  ;;  %v4210_v12 = vld [vmem:[%s5467_s25 + $0x50] sm:$0xf]  ;;  %v4219_v13 = vor.u32 %v5195_v1, %v4218_v0  ;;  %v4223_v14 = vor.u32 %v5194_v2, %v4220_v3 }
  0x29   : > { %v4192_v16 = vld [vmem:[%s5467_s25 + $0x78] sm:$0xf]  ;;  %v4259_v17 = vld [vmem:[%s5467_s25 + $0xc0] sm:$0x33]  ;;  %v5192_v20 = vld [vmem:[%s5467_s25 + $0x54] sm:$0xf] }
  0x2a   : > { %v4212_v21 = vld [vmem:[%s5467_s25 + $0x58] sm:$0xf0]  ;;  %v4230_v22 = vld [vmem:[%s5467_s25 + $0xc0] sm:$0x33]  ;;  %v1027_v26 = vunpack.c.l.b16 %v4259_v17  ;;  %v1028_v27 = vunpack.c.h.b16 %v4259_v17  ;;  %v4160_v39 = vld [vmem:[%s6484_s2 + $0x8] sm:$0xf] }
  0x2b   : > { %649 = vmatpush.bf16.msrb.mxu2 %v4122_v15  ;;  %662 = vmatpush.bf16.msrb.mxu3 %v4126_v19  ;;  %v5193_v15 = vld [vmem:[%s5467_s25 + $0x54] sm:$0xf0]  ;;  %v4205_v19 = vor.u32 %v5198_v10, %v4202_v11  ;;  %v5197_v23 = vld [vmem:[%s5467_s25 + $0x7c] sm:$0xf0]  ;;  %v951_v30 = vunpack.c.l.b16 %v4230_v22  ;;  %v952_v31 = vunpack.c.h.b16 %v4230_v22  ;;  %v4271_v40 = vld [vmem:[%s5467_s25 + $0xb0] sm:$0xf] }
  0x2c   : > { %573 = vmatpush.bf16.msrb.mxu0 %v4093_v28  ;;  %586 = vmatpush.bf16.msrb.mxu1 %v4097_v29  ;;  %v4211_v28 = vor.u32 %v5193_v15, %v4210_v12  ;;  %v4215_v29 = vor.u32 %v5192_v20, %v4212_v21  ;;  %v4193_v32 = vor.u32 %v5197_v23, %v4192_v16  ;;  %v601_v38 = vld [vmem:[%s6484_s2] sm:$0xf]  ;;  %v5211_v41 = vld [vmem:[%s5467_s25 + $0xb4] sm:$0xf0]  ;;  %v5210_v42 = vld [vmem:[%s5467_s25 + $0xb4] sm:$0xf] }
  0x2d   : > { %v4273_v43 = vld [vmem:[%s5467_s25 + $0xb8] sm:$0xf0]  ;;  %v5202_v50 = vld [vmem:[%s5467_s25 + $0xb4] sm:$0xf]  ;;  %v4272_v52 = vor.u32 %v5211_v41, %v4271_v40  ;;  %v5209_v55 = vld [vmem:[%s5467_s25 + $0xa4] sm:$0xf0] }
  0x2e   : > { %v4244_v51 = vld [vmem:[%s5467_s25 + $0xb8] sm:$0xf0]  ;;  %v4276_v53 = vor.u32 %v5210_v42, %v4273_v43  ;;  %v4234_v56 = vld [vmem:[%s5467_s25 + $0xa0] sm:$0xf]  ;;  %v5208_v60 = vld [vmem:[%s5467_s25 + $0xa4] sm:$0xf] }
  0x2f   : > { %774 = vmatpush.bf16.msra.mxu2 %v764_v24  ;;  %787 = vmatpush.bf16.msra.mxu3 %v767_v25  ;;  %v5196_v24 = vld [vmem:[%s5467_s25 + $0x7c] sm:$0xf]  ;;  %v4194_v25 = vld [vmem:[%s5467_s25 + $0x80] sm:$0xf0]  ;;  %v4265_v61 = vld [vmem:[%s5467_s25 + $0xa8] sm:$0xf0] }
  0x30   : > { %707 = vmatpush.bf16.msra.mxu0 %v697_v34  ;;  %720 = vmatpush.bf16.msra.mxu1 %v700_v35  ;;  %v4197_v33 = vor.u32 %v5196_v24, %v4194_v25  ;;  %v1033_v34 = vpack.c.b16 %v1027_v26, %v1027_v26  ;;  %v1034_v35 = vpack.c.b16 %v1028_v27, %v1028_v27  ;;  %v4301_v0 = vld [vmem:[%s5467_s25 + $0xe8] sm:$0x33]  ;;  %v4254_v1 = vld [vmem:[%s5467_s25 + $0x98] sm:$0x33]  ;;  %v804_v15 = vld [vmem:[%s6484_s2] sm:$0xf] }
  0x31   : > { %4106 = vmatmul.msk.bf16.vlgmr.msrb.gmra.mxu0 %vm427_vm1, %v4089_v54  ;;  %4107 = vmatmul.msk.bf16.vlgmr.msrb.gmra.mxu1 %vm427_vm1, %v4089_v54  ;;  %v4263_v54 = vld [vmem:[%s5467_s25 + $0xa0] sm:$0xf]  ;;  %v4268_v3 = vor.u32 %v5208_v60, %v4265_v61  ;;  %v1154_v6 = vunpack.c.l.b16 %v4301_v0  ;;  %v1155_v7 = vunpack.c.h.b16 %v4301_v0  ;;  %v4313_v16 = vld [vmem:[%s5467_s25 + $0xd8] sm:$0xf]  ;;  %v4289_v22 = vld [vmem:[%s5467_s25 + $0x88] sm:$0xf] }
  0x32   : > { %4135 = vmatmul.msk.bf16.vlgmr.msrb.gmra.mxu2 %vm427_vm1, %v4118_v57  ;;  %4136 = vmatmul.msk.bf16.vlgmr.msrb.gmra.mxu3 %vm427_vm1, %v4118_v57  ;;  %v1043_v44 = vsel %vm431_vm0, %v1033_v34, 0  ;;  %v1046_v45 = vsel %vm431_vm0, %v1034_v35, 0  ;;  %v4264_v2 = vor.u32 %v5209_v55, %v4263_v54  ;;  %v5215_v17 = vld [vmem:[%s5467_s25 + $0xdc] sm:$0xf0]  ;;  %v5207_v23 = vld [vmem:[%s5467_s25 + $0x8c] sm:$0xf0] }
  0x33   : > { %775 = vmatpush.bf16.msra.mxu2 %v4172_v36  ;;  %788 = vmatpush.bf16.msra.mxu3 %v4176_v37  ;;  %v957_v36 = vpack.c.b16 %v951_v30, %v951_v30  ;;  %v958_v37 = vpack.c.b16 %v952_v31, %v952_v31  ;;  %v1160_v10 = vpack.c.b16 %v1154_v6, %v1154_v6  ;;  %v5206_v26 = vld [vmem:[%s5467_s25 + $0x8c] sm:$0xf]  ;;  %v4291_v27 = vld [vmem:[%s5467_s25 + $0x90] sm:$0xf0]  ;;  %v4305_v30 = vld [vmem:[%s5467_s25 + $0xc8] sm:$0xf] }
  0x34   : > { %708 = vmatpush.bf16.msra.mxu0 %v4148_v46  ;;  %721 = vmatpush.bf16.msra.mxu1 %v4152_v47  ;;  %v4242_v46 = vld [vmem:[%s5467_s25 + $0xb0] sm:$0xf]  ;;  %v5203_v47 = vld [vmem:[%s5467_s25 + $0xb4] sm:$0xf0]  ;;  %v1161_v11 = vpack.c.b16 %v1155_v7, %v1155_v7  ;;  %v4294_v34 = vor.u32 %v5206_v26, %v4291_v27  ;;  %v5205_v35 = vld [vmem:[%s5467_s25 + $0x7c] sm:$0xf0] }
  0x35   : > { %v967_v48 = vsel %vm431_vm0, %v957_v36, 0  ;;  %v970_v49 = vsel %vm431_vm0, %v958_v37, 0  ;;  %v4243_v57 = vor.u32 %v5203_v47, %v4242_v46  ;;  %v1170_v20 = vsel %vm431_vm0, %v1160_v10, 0  ;;  %v5213_v31 = vld [vmem:[%s5467_s25 + $0xcc] sm:$0xf0] }
  0x36   : > { %v1173_v21 = vsel %vm431_vm0, %v1161_v11, 0  ;;  %v5212_v36 = vld [vmem:[%s5467_s25 + $0xcc] sm:$0xf]  ;;  %v4307_v37 = vld [vmem:[%s5467_s25 + $0xd0] sm:$0xf0]  ;;  %v4306_v42 = vor.u32 %v5213_v31, %v4305_v30 }
  0x37   : > { %776 = vmatpush.bf16.msra.mxu2 %v4164_v58  ;;  %789 = vmatpush.bf16.msra.mxu3 %v4168_v59  ;;  %v4247_v58 = vor.u32 %v5202_v50, %v4244_v51  ;;  %v5201_v59 = vld [vmem:[%s5467_s25 + $0xa4] sm:$0xf0]  ;;  %v4325_v40 = vld [vmem:[%s5467_s25 + $0xc0] sm:$0x33]  ;;  %v4310_v43 = vor.u32 %v5212_v36, %v4307_v37  ;;  %v5221_v11 = vld [vmem:[%s5467_s25 + $0xcc] sm:$0xf0] }
  0x38   : > { %709 = vmatpush.bf16.msra.mxu0 %v4140_v62  ;;  %722 = vmatpush.bf16.msra.mxu1 %v4144_v63  ;;  %v5200_v62 = vld [vmem:[%s5467_s25 + $0xa4] sm:$0xf]  ;;  %v4236_v63 = vld [vmem:[%s5467_s25 + $0xa8] sm:$0xf0]  ;;  %v1290_v46 = vunpack.c.l.b16 %v4325_v40  ;;  %v1291_v47 = vunpack.c.h.b16 %v4325_v40  ;;  %v4231_v54 = vld [vmem:[%s6484_s2 + $0x8] sm:$0xf] }
  0x39   : > { %v4330_v41 = vld [vmem:[%s5467_s25 + $0xe8] sm:$0x33]  ;;  %v4260_v55 = vld [vmem:[%s6484_s2 + $0x4] sm:$0xf]  ;;  %v4352_v6 = vld [vmem:[%s5467_s25 + $0xa0] sm:$0xf] }
  0x3a   : > { %v1296_v50 = vpack.c.b16 %v1290_v46, %v1290_v46  ;;  %v1297_v51 = vpack.c.b16 %v1291_v47, %v1291_v47  ;;  %v5217_v7 = vld [vmem:[%s5467_s25 + $0xa4] sm:$0xf0]  ;;  %v1007_v30 = vld [vmem:[%s6484_s2] sm:$0xf]  ;;  %v4405_v46 = vld [vmem:[%s5467_s25 + $0xf0] sm:$0xf] }
  0x3b   : > { %910 = vmatpush.bf16.msrb.mxu2 %v900_v4  ;;  %923 = vmatpush.bf16.msrb.mxu3 %v903_v5  ;;  %v4235_v4 = vor.u32 %v5201_v59, %v4234_v56  ;;  %v4239_v5 = vor.u32 %v5200_v62, %v4236_v63  ;;  %v4360_v56 = vld [vmem:[%s5467_s25 + $0xb0] sm:$0xf]  ;;  %v4362_v59 = vld [vmem:[%s5467_s25 + $0xb8] sm:$0xf0]  ;;  %v4342_v62 = vld [vmem:[%s5467_s25 + $0xd8] sm:$0xf] }
  0x3c   : > { %850 = vmatpush.bf16.msrb.mxu0 %v840_v8  ;;  %863 = vmatpush.bf16.msrb.mxu1 %v843_v9  ;;  %v1087_v8 = vunpack.c.l.b16 %v4254_v1  ;;  %v1088_v9 = vunpack.c.h.b16 %v4254_v1  ;;  %v1306_v60 = vsel %vm431_vm0, %v1296_v50, 0  ;;  %v1309_v61 = vsel %vm431_vm0, %v1297_v51, 0  ;;  %v5223_v63 = vld [vmem:[%s5467_s25 + $0xdc] sm:$0xf0]  ;;  %v4302_v31 = vld [vmem:[%s6484_s2 + $0x8] sm:$0xf] }
  0x3d   : > { %v5233_v47 = vld [vmem:[%s5467_s25 + $0xf4] sm:$0xf0] }
  0x3e   : > { %v1093_v12 = vpack.c.b16 %v1087_v8, %v1087_v8  ;;  %v4334_v8 = vld [vmem:[%s5467_s25 + $0xc8] sm:$0xf]  ;;  %v5225_v51 = vld [vmem:[%s5467_s25 + $0xf4] sm:$0xf0] }
  0x3f   : > { %911 = vmatpush.bf16.msrb.mxu2 %v4219_v13  ;;  %924 = vmatpush.bf16.msrb.mxu3 %v4223_v14  ;;  %v1094_v13 = vpack.c.b16 %v1088_v9, %v1088_v9  ;;  %v4189_v14 = vld [vmem:[%s6484_s2 + $0x4] sm:$0xf]  ;;  %v4343_v9 = vor.u32 %v5223_v63, %v4342_v62 }
  0x40   : > { %851 = vmatpush.bf16.msrb.mxu0 %v4201_v18  ;;  %864 = vmatpush.bf16.msrb.mxu1 %v4205_v19  ;;  %v5214_v18 = vld [vmem:[%s5467_s25 + $0xdc] sm:$0xf]  ;;  %v4315_v19 = vld [vmem:[%s5467_s25 + $0xe0] sm:$0xf0]  ;;  %v1103_v24 = vsel %vm431_vm0, %v1093_v12, 0 }
  0x41   : > { %4153 = vmatmul.msk.bf16.vlgmr.msra.gmra.mxu0 %vm427_vm1, %v601_v38  ;;  %4154 = vmatmul.msk.bf16.vlgmr.msra.gmra.mxu1 %vm427_vm1, %v601_v38  ;;  %v1106_v25 = vsel %vm431_vm0, %v1094_v13, 0  ;;  %v5204_v38 = vld [vmem:[%s5467_s25 + $0x7c] sm:$0xf]  ;;  %v5216_v12 = vld [vmem:[%s5467_s25 + $0xa4] sm:$0xf] }
  0x42   : > { %4177 = vmatmul.msk.bf16.vlgmr.msra.gmra.mxu2 %vm427_vm1, %v4160_v39  ;;  %4178 = vmatmul.msk.bf16.vlgmr.msra.gmra.mxu3 %vm427_vm1, %v4160_v39  ;;  %v4283_v39 = vld [vmem:[%s5467_s25 + $0x80] sm:$0xf0]  ;;  %v4354_v13 = vld [vmem:[%s5467_s25 + $0xa8] sm:$0xf0] }
  0x43   : > { %912 = vmatpush.bf16.msrb.mxu2 %v4211_v28  ;;  %925 = vmatpush.bf16.msrb.mxu3 %v4215_v29  ;;  %v4314_v28 = vor.u32 %v5215_v17, %v4313_v16  ;;  %v4318_v29 = vor.u32 %v5214_v18, %v4315_v19  ;;  %v4401_v16 = vld [vmem:[%s5467_s25 + $0x110] sm:$0x33]  ;;  %v4353_v18 = vor.u32 %v5217_v7, %v4352_v6  ;;  %v4331_v6 = vld [vmem:[%s6484_s2 + $0x4] sm:$0xf]  ;;  %v1210_v7 = vld [vmem:[%s6484_s2] sm:$0xf] }
  0x44   : > { %852 = vmatpush.bf16.msrb.mxu0 %v4193_v32  ;;  %865 = vmatpush.bf16.msrb.mxu1 %v4197_v33  ;;  %v4281_v32 = vld [vmem:[%s5467_s25 + $0x78] sm:$0xf]  ;;  %v4290_v33 = vor.u32 %v5207_v23, %v4289_v22  ;;  %v4372_v17 = vld [vmem:[%s5467_s25 + $0x110] sm:$0x33]  ;;  %v4357_v19 = vor.u32 %v5216_v12, %v4354_v13  ;;  %v1433_v22 = vunpack.c.l.b16 %v4401_v16  ;;  %v1434_v23 = vunpack.c.h.b16 %v4401_v16 }
  0x46   : > { %v1439_v26 = vpack.c.b16 %v1433_v22, %v1433_v22  ;;  %v1440_v27 = vpack.c.b16 %v1434_v23, %v1434_v23  ;;  %v5237_v23 = vld [vmem:[%s5467_s25 + $0x11c] sm:$0xf0] }
  0x47   : > { %1053 = vmatpush.bf16.msra.mxu2 %v1043_v44  ;;  %1066 = vmatpush.bf16.msra.mxu3 %v1046_v45  ;;  %v4282_v44 = vor.u32 %v5205_v35, %v4281_v32  ;;  %v4286_v45 = vor.u32 %v5204_v38, %v4283_v39  ;;  %v4413_v32 = vld [vmem:[%s5467_s25 + $0x100] sm:$0xf]  ;;  %v4415_v35 = vld [vmem:[%s5467_s25 + $0x108] sm:$0xf0]  ;;  %v5227_v39 = vld [vmem:[%s5467_s25 + $0x104] sm:$0xf0] }
  0x48   : > { %977 = vmatpush.bf16.msra.mxu0 %v967_v48  ;;  %990 = vmatpush.bf16.msra.mxu1 %v970_v49  ;;  %v1230_v48 = vunpack.c.l.b16 %v4330_v41  ;;  %v1231_v49 = vunpack.c.h.b16 %v4330_v41  ;;  %v1449_v36 = vsel %vm431_vm0, %v1439_v26, 0  ;;  %v1452_v37 = vsel %vm431_vm0, %v1440_v27, 0  ;;  %v4384_v38 = vld [vmem:[%s5467_s25 + $0x100] sm:$0xf] }
  0x4b   : > { %1054 = vmatpush.bf16.msra.mxu2 %v4272_v52  ;;  %1067 = vmatpush.bf16.msra.mxu3 %v4276_v53  ;;  %v1236_v52 = vpack.c.b16 %v1230_v48, %v1230_v48  ;;  %v1237_v53 = vpack.c.b16 %v1231_v49, %v1231_v49  ;;  %v4376_v48 = vld [vmem:[%s5467_s25 + $0xf0] sm:$0xf]  ;;  %v4385_v49 = vor.u32 %v5227_v39, %v4384_v38 }
  0x4c   : > { %978 = vmatpush.bf16.msra.mxu0 %v4243_v57  ;;  %991 = vmatpush.bf16.msra.mxu1 %v4247_v58  ;;  %v5219_v57 = vld [vmem:[%s5467_s25 + $0xb4] sm:$0xf0]  ;;  %v5218_v58 = vld [vmem:[%s5467_s25 + $0xb4] sm:$0xf] }
  0x4d   : > { %v1246_v0 = vsel %vm431_vm0, %v1236_v52, 0  ;;  %v1249_v1 = vsel %vm431_vm0, %v1237_v53, 0  ;;  %v5232_v52 = vld [vmem:[%s5467_s25 + $0xf4] sm:$0xf]  ;;  %v4407_v53 = vld [vmem:[%s5467_s25 + $0xf8] sm:$0xf0] }
  0x4f   : > { %1055 = vmatpush.bf16.msra.mxu2 %v4264_v2  ;;  %1068 = vmatpush.bf16.msra.mxu3 %v4268_v3  ;;  %v5222_v2 = vld [vmem:[%s5467_s25 + $0xdc] sm:$0xf]  ;;  %v4344_v3 = vld [vmem:[%s5467_s25 + $0xe0] sm:$0xf0] }
  0x50   : > { %979 = vmatpush.bf16.msra.mxu0 %v4235_v4  ;;  %992 = vmatpush.bf16.msra.mxu1 %v4239_v5  ;;  %v4361_v4 = vor.u32 %v5219_v57, %v4360_v56  ;;  %v4365_v5 = vor.u32 %v5218_v58, %v4362_v59  ;;  %v4347_v10 = vor.u32 %v5222_v2, %v4344_v3  ;;  %v4443_v56 = vld [vmem:[%s5467_s25 + $0x138] sm:$0x33]  ;;  %v4396_v57 = vld [vmem:[%s5467_s25 + $0xe8] sm:$0x33] }
  0x51   : > { %4206 = vmatmul.msk.bf16.vlgmr.msrb.gmra.mxu0 %vm427_vm1, %v4189_v14  ;;  %4207 = vmatmul.msk.bf16.vlgmr.msrb.gmra.mxu1 %vm427_vm1, %v4189_v14  ;;  %v5220_v14 = vld [vmem:[%s5467_s25 + $0xcc] sm:$0xf]  ;;  %v4406_v58 = vor.u32 %v5233_v47, %v4405_v46  ;;  %v4410_v59 = vor.u32 %v5232_v52, %v4407_v53  ;;  %v1560_v62 = vunpack.c.l.b16 %v4443_v56  ;;  %v1561_v63 = vunpack.c.h.b16 %v4443_v56  ;;  %v4373_v46 = vld [vmem:[%s6484_s2 + $0x8] sm:$0xf]  ;;  %v4402_v47 = vld [vmem:[%s6484_s2 + $0x4] sm:$0xf] }
  0x52   : > { %4224 = vmatmul.msk.bf16.vlgmr.msrb.gmra.mxu2 %vm427_vm1, %v804_v15  ;;  %4225 = vmatmul.msk.bf16.vlgmr.msrb.gmra.mxu3 %vm427_vm1, %v804_v15  ;;  %v4336_v15 = vld [vmem:[%s5467_s25 + $0xd0] sm:$0xf0]  ;;  %v4502_v52 = vld [vmem:[%s5467_s25 + $0x100] sm:$0xf]  ;;  %v5243_v53 = vld [vmem:[%s5467_s25 + $0x104] sm:$0xf0] }
  0x53   : > { %1180 = vmatpush.bf16.msrb.mxu2 %v1170_v20  ;;  %1193 = vmatpush.bf16.msrb.mxu3 %v1173_v21  ;;  %v4335_v20 = vor.u32 %v5221_v11, %v4334_v8  ;;  %v4339_v21 = vor.u32 %v5220_v14, %v4336_v15  ;;  %v1566_v2 = vpack.c.b16 %v1560_v62, %v1560_v62  ;;  %v4455_v8 = vld [vmem:[%s5467_s25 + $0x128] sm:$0xf]  ;;  %v4457_v11 = vld [vmem:[%s5467_s25 + $0x130] sm:$0xf0]  ;;  %v4431_v14 = vld [vmem:[%s5467_s25 + $0xd8] sm:$0xf] }
  0x54   : > { %1113 = vmatpush.bf16.msrb.mxu0 %v1103_v24  ;;  %1126 = vmatpush.bf16.msrb.mxu1 %v1106_v25  ;;  %v1357_v24 = vunpack.c.l.b16 %v4372_v17  ;;  %v1358_v25 = vunpack.c.h.b16 %v4372_v17  ;;  %v1567_v3 = vpack.c.b16 %v1561_v63, %v1561_v63  ;;  %v5231_v15 = vld [vmem:[%s5467_s25 + $0xdc] sm:$0xf0]  ;;  %v4484_v56 = vld [vmem:[%s5467_s25 + $0x128] sm:$0xf]  ;;  %v5241_v63 = vld [vmem:[%s5467_s25 + $0xf4] sm:$0xf0] }
  0x55   : > { %v1576_v12 = vsel %vm431_vm0, %v1566_v2, 0  ;;  %v4432_v26 = vor.u32 %v5231_v15, %v4431_v14 }
  0x56   : > { %v1579_v13 = vsel %vm431_vm0, %v1567_v3, 0 }
  0x57   : > { %1181 = vmatpush.bf16.msrb.mxu2 %v4314_v28  ;;  %1194 = vmatpush.bf16.msrb.mxu3 %v4318_v29  ;;  %v1363_v28 = vpack.c.b16 %v1357_v24, %v1357_v24  ;;  %v1364_v29 = vpack.c.b16 %v1358_v25, %v1358_v25  ;;  %v4423_v24 = vld [vmem:[%s5467_s25 + $0xc8] sm:$0xf]  ;;  %v4467_v25 = vld [vmem:[%s5467_s25 + $0x110] sm:$0x33] }
  0x58   : > { %1114 = vmatpush.bf16.msrb.mxu0 %v4290_v33  ;;  %1127 = vmatpush.bf16.msrb.mxu1 %v4294_v34  ;;  %v5235_v33 = vld [vmem:[%s5467_s25 + $0x104] sm:$0xf0]  ;;  %v5234_v34 = vld [vmem:[%s5467_s25 + $0x104] sm:$0xf] }
  0x59   : > { %v1373_v40 = vsel %vm431_vm0, %v1363_v28, 0  ;;  %v1376_v41 = vsel %vm431_vm0, %v1364_v29, 0  ;;  %v5236_v28 = vld [vmem:[%s5467_s25 + $0x11c] sm:$0xf]  ;;  %v4449_v29 = vld [vmem:[%s5467_s25 + $0x120] sm:$0xf0] }
  0x5b   : > { %1182 = vmatpush.bf16.msrb.mxu2 %v4306_v42  ;;  %1195 = vmatpush.bf16.msrb.mxu3 %v4310_v43  ;;  %v5226_v42 = vld [vmem:[%s5467_s25 + $0x104] sm:$0xf]  ;;  %v4386_v43 = vld [vmem:[%s5467_s25 + $0x108] sm:$0xf0] }
  0x5c   : > { %1115 = vmatpush.bf16.msrb.mxu0 %v4282_v44  ;;  %1128 = vmatpush.bf16.msrb.mxu1 %v4286_v45  ;;  %v4414_v44 = vor.u32 %v5235_v33, %v4413_v32  ;;  %v4418_v45 = vor.u32 %v5234_v34, %v4415_v35  ;;  %v4389_v50 = vor.u32 %v5226_v42, %v4386_v43  ;;  %v5228_v32 = vld [vmem:[%s5467_s25 + $0xcc] sm:$0xf]  ;;  %v4425_v33 = vld [vmem:[%s5467_s25 + $0xd0] sm:$0xf0]  ;;  %v1696_v34 = vunpack.c.l.b16 %v4467_v25 }
  0x5d   : > { %v1697_v35 = vunpack.c.h.b16 %v4467_v25  ;;  %v4444_v25 = vld [vmem:[%s6484_s2 + $0x8] sm:$0xf] }
  0x5e   : > { %v1702_v42 = vpack.c.b16 %v1696_v34, %v1696_v34  ;;  %v4526_v34 = vld [vmem:[%s5467_s25 + $0x150] sm:$0xf] }
  0x5f   : > { %v1703_v43 = vpack.c.b16 %v1697_v35, %v1697_v35  ;;  %v5251_v35 = vld [vmem:[%s5467_s25 + $0x154] sm:$0xf0] }
  0x61   : > { %4248 = vmatmul.msk.bf16.vlgmr.msra.gmra.mxu0 %vm427_vm1, %v4231_v54  ;;  %4249 = vmatmul.msk.bf16.vlgmr.msra.gmra.mxu1 %vm427_vm1, %v4231_v54  ;;  %v5224_v54 = vld [vmem:[%s5467_s25 + $0xf4] sm:$0xf] }
  0x62   : > { %4277 = vmatmul.msk.bf16.vlgmr.msra.gmra.mxu2 %vm427_vm1, %v4260_v55  ;;  %4278 = vmatmul.msk.bf16.vlgmr.msra.gmra.mxu3 %vm427_vm1, %v4260_v55  ;;  %v4378_v55 = vld [vmem:[%s5467_s25 + $0xf8] sm:$0xf0] }
  0x63   : > { %1316 = vmatpush.bf16.msra.mxu2 %v1306_v60  ;;  %1329 = vmatpush.bf16.msra.mxu3 %v1309_v61  ;;  %v4377_v60 = vor.u32 %v5225_v51, %v4376_v48  ;;  %v4381_v61 = vor.u32 %v5224_v54, %v4378_v55  ;;  %v1712_v48 = vsel %vm431_vm0, %v1702_v42, 0  ;;  %v5242_v54 = vld [vmem:[%s5467_s25 + $0x104] sm:$0xf]  ;;  %v4504_v55 = vld [vmem:[%s5467_s25 + $0x108] sm:$0xf0] }
  0x64   : > { %1256 = vmatpush.bf16.msra.mxu0 %v1246_v0  ;;  %1269 = vmatpush.bf16.msra.mxu1 %v1249_v1  ;;  %v1493_v0 = vunpack.c.l.b16 %v4396_v57  ;;  %v1494_v1 = vunpack.c.h.b16 %v4396_v57  ;;  %v5247_v57 = vld [vmem:[%s5467_s25 + $0x12c] sm:$0xf0]  ;;  %v4507_v62 = vor.u32 %v5242_v54, %v4504_v55  ;;  %v4518_v42 = vld [vmem:[%s5467_s25 + $0x140] sm:$0xf] }
  0x65   : > { %v4485_v2 = vor.u32 %v5247_v57, %v4484_v56 }
  0x67   : > { %1317 = vmatpush.bf16.msra.mxu2 %v4361_v4  ;;  %1330 = vmatpush.bf16.msra.mxu3 %v4365_v5  ;;  %v1499_v4 = vpack.c.b16 %v1493_v0, %v1493_v0  ;;  %v1500_v5 = vpack.c.b16 %v1494_v1, %v1494_v1  ;;  %v4476_v0 = vld [vmem:[%s5467_s25 + $0x118] sm:$0xf]  ;;  %v4543_v1 = vld [vmem:[%s5467_s25 + $0x160] sm:$0x33] }
  0x68   : > { %1257 = vmatpush.bf16.msra.mxu0 %v4343_v9  ;;  %1270 = vmatpush.bf16.msra.mxu1 %v4347_v10  ;;  %v5239_v9 = vld [vmem:[%s5467_s25 + $0x12c] sm:$0xf0]  ;;  %v5238_v10 = vld [vmem:[%s5467_s25 + $0x12c] sm:$0xf] }
  0x69   : > { %v1509_v16 = vsel %vm431_vm0, %v1499_v4, 0  ;;  %v1512_v17 = vsel %vm431_vm0, %v1500_v5, 0  ;;  %v4460_v22 = vor.u32 %v5238_v10, %v4457_v11  ;;  %v5240_v4 = vld [vmem:[%s5467_s25 + $0xf4] sm:$0xf]  ;;  %v4496_v5 = vld [vmem:[%s5467_s25 + $0xf8] sm:$0xf0]  ;;  %v1839_v10 = vunpack.c.l.b16 %v4543_v1 }
  0x6a   : > { %v1840_v11 = vunpack.c.h.b16 %v4543_v1 }
  0x6b   : > { %1318 = vmatpush.bf16.msra.mxu2 %v4353_v18  ;;  %1331 = vmatpush.bf16.msra.mxu3 %v4357_v19  ;;  %v5230_v18 = vld [vmem:[%s5467_s25 + $0xdc] sm:$0xf]  ;;  %v4433_v19 = vld [vmem:[%s5467_s25 + $0xe0] sm:$0xf0] }
  0x6c   : > { %1258 = vmatpush.bf16.msra.mxu0 %v4335_v20  ;;  %1271 = vmatpush.bf16.msra.mxu1 %v4339_v21  ;;  %v4447_v20 = vld [vmem:[%s5467_s25 + $0x118] sm:$0xf]  ;;  %v4456_v21 = vor.u32 %v5239_v9, %v4455_v8  ;;  %v4436_v27 = vor.u32 %v5230_v18, %v4433_v19  ;;  %v5244_v8 = vld [vmem:[%s5467_s25 + $0x11c] sm:$0xf]  ;;  %v4478_v9 = vld [vmem:[%s5467_s25 + $0x120] sm:$0xf0]  ;;  %v1845_v18 = vpack.c.b16 %v1839_v10, %v1839_v10 }
  0x6d   : > { %v1846_v19 = vpack.c.b16 %v1840_v11, %v1840_v11  ;;  %v4473_v10 = vld [vmem:[%s6484_s2 + $0x4] sm:$0xf]  ;;  %v1616_v11 = vld [vmem:[%s6484_s2] sm:$0xf] }
  0x71   : > { %4295 = vmatmul.msk.bf16.vlgmr.msrb.gmra.mxu0 %vm427_vm1, %v1007_v30  ;;  %4296 = vmatmul.msk.bf16.vlgmr.msrb.gmra.mxu1 %vm427_vm1, %v1007_v30  ;;  %v4472_v30 = vld [vmem:[%s5467_s25 + $0x138] sm:$0x33] }
  0x72   : > { %4319 = vmatmul.msk.bf16.vlgmr.msrb.gmra.mxu2 %vm427_vm1, %v4302_v31  ;;  %4320 = vmatmul.msk.bf16.vlgmr.msrb.gmra.mxu3 %vm427_vm1, %v4302_v31  ;;  %v5229_v31 = vld [vmem:[%s5467_s25 + $0xcc] sm:$0xf0]  ;;  %v1636_v38 = vunpack.c.l.b16 %v4472_v30  ;;  %v1637_v39 = vunpack.c.h.b16 %v4472_v30 }
  0x73   : > { %1459 = vmatpush.bf16.msrb.mxu2 %v1449_v36  ;;  %1472 = vmatpush.bf16.msrb.mxu3 %v1452_v37  ;;  %v4448_v36 = vor.u32 %v5237_v23, %v4447_v20  ;;  %v4452_v37 = vor.u32 %v5236_v28, %v4449_v29  ;;  %v4555_v30 = vld [vmem:[%s5467_s25 + $0x150] sm:$0xf] }
  0x74   : > { %1383 = vmatpush.bf16.msrb.mxu0 %v1373_v40  ;;  %1396 = vmatpush.bf16.msrb.mxu1 %v1376_v41  ;;  %v4424_v40 = vor.u32 %v5229_v31, %v4423_v24  ;;  %v4428_v41 = vor.u32 %v5228_v32, %v4425_v33  ;;  %v1413_v24 = vld [vmem:[%s6484_s2] sm:$0xf]  ;;  %v5259_v31 = vld [vmem:[%s5467_s25 + $0x154] sm:$0xf0]  ;;  %v5258_v32 = vld [vmem:[%s5467_s25 + $0x154] sm:$0xf] }
  0x75   : > { %v4557_v33 = vld [vmem:[%s5467_s25 + $0x158] sm:$0xf0] }
  0x77   : > { %1460 = vmatpush.bf16.msrb.mxu2 %v4414_v44  ;;  %1473 = vmatpush.bf16.msrb.mxu3 %v4418_v45  ;;  %v1642_v44 = vpack.c.b16 %v1636_v38, %v1636_v38  ;;  %v1643_v45 = vpack.c.b16 %v1637_v39, %v1637_v39  ;;  %v4547_v38 = vld [vmem:[%s5467_s25 + $0x140] sm:$0xf]  ;;  %v4556_v39 = vor.u32 %v5259_v31, %v4555_v30  ;;  %v5261_v30 = vld [vmem:[%s5467_s25 + $0x16c] sm:$0xf0] }
  0x78   : > { %1384 = vmatpush.bf16.msrb.mxu0 %v4385_v49  ;;  %1397 = vmatpush.bf16.msrb.mxu1 %v4389_v50  ;;  %v1715_v49 = vsel %vm431_vm0, %v1703_v43, 0  ;;  %v4585_v43 = vld [vmem:[%s5467_s25 + $0x188] sm:$0x33]  ;;  %v4609_v31 = vld [vmem:[%s5467_s25 + $0x160] sm:$0x33] }
  0x79   : > { %v1652_v50 = vsel %vm431_vm0, %v1642_v44, 0  ;;  %v1655_v51 = vsel %vm431_vm0, %v1643_v45, 0  ;;  %v4527_v44 = vor.u32 %v5251_v35, %v4526_v34  ;;  %v1966_v56 = vunpack.c.l.b16 %v4585_v43  ;;  %v4565_v34 = vld [vmem:[%s5467_s25 + $0x118] sm:$0xf]  ;;  %v5260_v35 = vld [vmem:[%s5467_s25 + $0x16c] sm:$0xf] }
  0x7a   : > { %v1967_v57 = vunpack.c.h.b16 %v4585_v43 }
  0x7b   : > { %1461 = vmatpush.bf16.msrb.mxu2 %v4406_v58  ;;  %1474 = vmatpush.bf16.msrb.mxu3 %v4410_v59  ;;  %v5246_v58 = vld [vmem:[%s5467_s25 + $0x12c] sm:$0xf]  ;;  %v4486_v59 = vld [vmem:[%s5467_s25 + $0x130] sm:$0xf0] }
  0x7c   : > { %1385 = vmatpush.bf16.msrb.mxu0 %v4377_v60  ;;  %1398 = vmatpush.bf16.msrb.mxu1 %v4381_v61  ;;  %v4494_v60 = vld [vmem:[%s5467_s25 + $0xf0] sm:$0xf]  ;;  %v4503_v61 = vor.u32 %v5243_v53, %v4502_v52  ;;  %v4489_v3 = vor.u32 %v5246_v58, %v4486_v59  ;;  %v5248_v52 = vld [vmem:[%s5467_s25 + $0x144] sm:$0xf]  ;;  %v4520_v53 = vld [vmem:[%s5467_s25 + $0x148] sm:$0xf0]  ;;  %v1973_v1 = vpack.c.b16 %v1967_v57, %v1967_v57 }
  0x81   : > { %4348 = vmatmul.msk.bf16.vlgmr.msra.gmra.mxu0 %vm427_vm1, %v4331_v6  ;;  %4349 = vmatmul.msk.bf16.vlgmr.msra.gmra.mxu1 %vm427_vm1, %v4331_v6  ;;  %v4514_v6 = vld [vmem:[%s5467_s25 + $0x160] sm:$0x33] }
  0x82   : > { %4366 = vmatmul.msk.bf16.vlgmr.msra.gmra.mxu2 %vm427_vm1, %v1210_v7  ;;  %4367 = vmatmul.msk.bf16.vlgmr.msra.gmra.mxu3 %vm427_vm1, %v1210_v7  ;;  %v5245_v7 = vld [vmem:[%s5467_s25 + $0x11c] sm:$0xf0]  ;;  %v1763_v14 = vunpack.c.l.b16 %v4514_v6  ;;  %v1764_v15 = vunpack.c.h.b16 %v4514_v6 }
  0x83   : > { %1586 = vmatpush.bf16.msra.mxu2 %v1576_v12  ;;  %1599 = vmatpush.bf16.msra.mxu3 %v1579_v13  ;;  %v4495_v12 = vor.u32 %v5241_v63, %v4494_v60  ;;  %v4499_v13 = vor.u32 %v5240_v4, %v4496_v5  ;;  %v4523_v63 = vor.u32 %v5248_v52, %v4520_v53 }
  0x84   : > { %1519 = vmatpush.bf16.msra.mxu0 %v1509_v16  ;;  %1532 = vmatpush.bf16.msra.mxu1 %v1512_v17  ;;  %v4477_v16 = vor.u32 %v5245_v7, %v4476_v0  ;;  %v4481_v17 = vor.u32 %v5244_v8, %v4478_v9  ;;  %v1769_v20 = vpack.c.b16 %v1763_v14, %v1763_v14 }
  0x85   : > { %v1972_v0 = vpack.c.b16 %v1966_v56, %v1966_v56 }
  0x86   : > { %v1779_v28 = vsel %vm431_vm0, %v1769_v20, 0  ;;  %v5262_v20 = vld [vmem:[%s5467_s25 + $0x17c] sm:$0xf] }
  0x87   : > { %1587 = vmatpush.bf16.msra.mxu2 %v4456_v21  ;;  %1600 = vmatpush.bf16.msra.mxu3 %v4460_v22  ;;  %v1770_v21 = vpack.c.b16 %v1764_v15, %v1764_v15 }
  0x88   : > { %1520 = vmatpush.bf16.msra.mxu0 %v4432_v26  ;;  %1533 = vmatpush.bf16.msra.mxu1 %v4436_v27  ;;  %v1855_v26 = vsel %vm431_vm0, %v1845_v18, 0  ;;  %v1858_v27 = vsel %vm431_vm0, %v1846_v19, 0  ;;  %v4597_v18 = vld [vmem:[%s5467_s25 + $0x178] sm:$0xf]  ;;  %v5263_v19 = vld [vmem:[%s5467_s25 + $0x17c] sm:$0xf0] }
  0x89   : > { %v1782_v29 = vsel %vm431_vm0, %v1770_v21, 0  ;;  %v4599_v21 = vld [vmem:[%s5467_s25 + $0x180] sm:$0xf0] }
  0x8b   : > { %1588 = vmatpush.bf16.msra.mxu2 %v4448_v36  ;;  %1601 = vmatpush.bf16.msra.mxu3 %v4452_v37  ;;  %v5250_v36 = vld [vmem:[%s5467_s25 + $0x154] sm:$0xf]  ;;  %v4528_v37 = vld [vmem:[%s5467_s25 + $0x158] sm:$0xf0] }
  0x8c   : > { %1521 = vmatpush.bf16.msra.mxu0 %v4424_v40  ;;  %1534 = vmatpush.bf16.msra.mxu1 %v4428_v41  ;;  %v4560_v40 = vor.u32 %v5258_v32, %v4557_v33  ;;  %v5257_v41 = vld [vmem:[%s5467_s25 + $0x144] sm:$0xf0]  ;;  %v4531_v45 = vor.u32 %v5250_v36, %v4528_v37  ;;  %v4591_v36 = vld [vmem:[%s5467_s25 + $0x170] sm:$0xf0] }
  0x8d   : > { %v4548_v58 = vor.u32 %v5257_v41, %v4547_v38  ;;  %v4567_v41 = vld [vmem:[%s5467_s25 + $0x120] sm:$0xf0] }
  0x91   : > { %4390 = vmatmul.msk.bf16.vlgmr.msrb.gmra.mxu0 %vm427_vm1, %v4373_v46  ;;  %4391 = vmatmul.msk.bf16.vlgmr.msrb.gmra.mxu1 %vm427_vm1, %v4373_v46  ;;  %v5256_v46 = vld [vmem:[%s5467_s25 + $0x144] sm:$0xf] }
  0x92   : > { %4419 = vmatmul.msk.bf16.vlgmr.msrb.gmra.mxu2 %vm427_vm1, %v4402_v47  ;;  %4420 = vmatmul.msk.bf16.vlgmr.msrb.gmra.mxu3 %vm427_vm1, %v4402_v47  ;;  %v4549_v47 = vld [vmem:[%s5467_s25 + $0x148] sm:$0xf0] }
  0x93   : > { %1722 = vmatpush.bf16.msrb.mxu2 %v1712_v48  ;;  %1735 = vmatpush.bf16.msrb.mxu3 %v1715_v49  ;;  %v4538_v48 = vld [vmem:[%s5467_s25 + $0x138] sm:$0x33]  ;;  %v4552_v59 = vor.u32 %v5256_v46, %v4549_v47  ;;  %v4614_v46 = vld [vmem:[%s5467_s25 + $0x188] sm:$0x33] }
  0x94   : > { %1662 = vmatpush.bf16.msrb.mxu0 %v1652_v50  ;;  %1675 = vmatpush.bf16.msrb.mxu1 %v1655_v51  ;;  %v5249_v51 = vld [vmem:[%s5467_s25 + $0x144] sm:$0xf0]  ;;  %v1899_v60 = vunpack.c.l.b16 %v4538_v48  ;;  %v2043_v52 = vunpack.c.h.b16 %v4614_v46 }
  0x97   : > { %1723 = vmatpush.bf16.msrb.mxu2 %v4503_v61  ;;  %1736 = vmatpush.bf16.msrb.mxu3 %v4507_v62  ;;  %v1900_v61 = vunpack.c.h.b16 %v4538_v48  ;;  %v4519_v62 = vor.u32 %v5249_v51, %v4518_v42  ;;  %v4594_v48 = vor.u32 %v5260_v35, %v4591_v36  ;;  %v2042_v51 = vunpack.c.l.b16 %v4614_v46 }
  0x98   : > { %1663 = vmatpush.bf16.msrb.mxu0 %v4485_v2  ;;  %1676 = vmatpush.bf16.msrb.mxu1 %v4489_v3  ;;  %v1905_v2 = vpack.c.b16 %v1899_v60, %v1899_v60 }
  0x99   : > { %v1906_v3 = vpack.c.b16 %v1900_v61, %v1900_v61  ;;  %v2048_v57 = vpack.c.b16 %v2042_v51, %v2042_v51  ;;  %v4515_v61 = vld [vmem:[%s6484_s2 + $0x8] sm:$0xf] }
  0x9b   : > { %1724 = vmatpush.bf16.msrb.mxu2 %v4495_v12  ;;  %1737 = vmatpush.bf16.msrb.mxu3 %v4499_v13  ;;  %v1982_v12 = vsel %vm431_vm0, %v1972_v0, 0  ;;  %v1985_v13 = vsel %vm431_vm0, %v1973_v1, 0  ;;  %v4644_v1 = vld [vmem:[%s5467_s25 + $0x150] sm:$0xf] }
  0x9c   : > { %1664 = vmatpush.bf16.msrb.mxu0 %v4477_v16  ;;  %1677 = vmatpush.bf16.msrb.mxu1 %v4481_v17  ;;  %v1915_v16 = vsel %vm431_vm0, %v1905_v2, 0  ;;  %v1918_v17 = vsel %vm431_vm0, %v1906_v3, 0  ;;  %v5267_v2 = vld [vmem:[%s5467_s25 + $0x154] sm:$0xf0]  ;;  %v5266_v3 = vld [vmem:[%s5467_s25 + $0x154] sm:$0xf] }
  0x9e   : > { %v447_v22 = vpop.f32.mrf.mxu0  ;;  %v460_v23 = vpop.f32.mrf.mxu1 }
  0xa1   : > { %4437 = vmatmul.msk.bf16.vlgmr.msra.gmra.mxu0 %vm427_vm1, %v1413_v24  ;;  %4438 = vmatmul.msk.bf16.vlgmr.msra.gmra.mxu1 %vm427_vm1, %v1413_v24  ;;  %v5255_v24 = vld [vmem:[%s5467_s25 + $0x12c] sm:$0xf0] }
  0xa2   : > { %4461 = vmatmul.msk.bf16.vlgmr.msra.gmra.mxu2 %vm427_vm1, %v4444_v25  ;;  %4462 = vmatmul.msk.bf16.vlgmr.msra.gmra.mxu3 %vm427_vm1, %v4444_v25  ;;  %v5254_v25 = vld [vmem:[%s5467_s25 + $0x12c] sm:$0xf] }
  0xa3   : > { %1865 = vmatpush.bf16.msra.mxu2 %v1855_v26  ;;  %1878 = vmatpush.bf16.msra.mxu3 %v1858_v27  ;;  %v4575_v26 = vld [vmem:[%s5467_s25 + $0x130] sm:$0xf0]  ;;  %v4598_v27 = vor.u32 %v5263_v19, %v4597_v18  ;;  %v4618_v18 = vld [vmem:[%s5467_s25 + $0x168] sm:$0xf] }
  0xa4   : > { %1789 = vmatpush.bf16.msra.mxu0 %v1779_v28  ;;  %1802 = vmatpush.bf16.msra.mxu1 %v1782_v29  ;;  %v4602_v28 = vor.u32 %v5262_v20, %v4599_v21  ;;  %v4589_v29 = vld [vmem:[%s5467_s25 + $0x168] sm:$0xf]  ;;  %v4578_v33 = vor.u32 %v5254_v25, %v4575_v26  ;;  %v4685_v19 = vld [vmem:[%s5467_s25 + $0x1b0] sm:$0x33] }
  0xa5   : > { %v507_v49 = vpop.f32.mrf.mxu2  ;;  %v520_v50 = vpop.f32.mrf.mxu3  ;;  %v4590_v47 = vor.u32 %v5261_v30, %v4589_v29  ;;  %v4656_v25 = vld [vmem:[%s5467_s25 + $0x1b0] sm:$0x33]  ;;  %v5268_v29 = vld [vmem:[%s5467_s25 + $0x16c] sm:$0xf]  ;;  %v2245_v35 = vunpack.c.l.b16 %v4685_v19  ;;  %v2246_v36 = vunpack.c.h.b16 %v4685_v19  ;;  %v4662_v19 = vld [vmem:[%s5467_s25 + $0x198] sm:$0xf0] }
  0xa6   : > { %v449_v54 = vpop.f32.mrf.mxu0  ;;  %v462_v55 = vpop.f32.mrf.mxu1  ;;  %v508_v4 = vadd.f32 %v507_v49, %v447_v22  ;;  %v521_v5 = vadd.f32 %v520_v50, %v460_v23  ;;  %v4573_v22 = vld [vmem:[%s5467_s25 + $0x128] sm:$0xf]  ;;  %v4620_v30 = vld [vmem:[%s5467_s25 + $0x170] sm:$0xf0] }
  0xa7   : > { %1866 = vmatpush.bf16.msra.mxu2 %v4556_v39  ;;  %1879 = vmatpush.bf16.msra.mxu3 %v4560_v40  ;;  %v4574_v32 = vor.u32 %v5255_v24, %v4573_v22  ;;  %v5253_v39 = vld [vmem:[%s5467_s25 + $0x11c] sm:$0xf0]  ;;  %v5252_v40 = vld [vmem:[%s5467_s25 + $0x11c] sm:$0xf]  ;;  %v4638_v24 = vld [vmem:[%s5467_s25 + $0x148] sm:$0xf0] }
  0xa8   : > { %1790 = vmatpush.bf16.msra.mxu0 %v4527_v44  ;;  %1803 = vmatpush.bf16.msra.mxu1 %v4531_v45  ;;  %v2102_v44 = vunpack.c.l.b16 %v4609_v31  ;;  %v2103_v45 = vunpack.c.h.b16 %v4609_v31  ;;  %v4566_v49 = vor.u32 %v5253_v39, %v4565_v34  ;;  %v4570_v50 = vor.u32 %v5252_v40, %v4567_v41 }
  0xa9   : > { %v2169_v39 = vunpack.c.l.b16 %v4656_v25  ;;  %v2170_v40 = vunpack.c.h.b16 %v4656_v25 }
  0xaa   : > { %v2108_v53 = vpack.c.b16 %v2102_v44, %v2102_v44  ;;  %v2109_v54 = vpack.c.b16 %v2103_v45, %v2103_v45  ;;  %v2251_v44 = vpack.c.b16 %v2245_v35, %v2245_v35  ;;  %v2252_v45 = vpack.c.b16 %v2246_v36, %v2246_v36 }
  0xab   : > { %1867 = vmatpush.bf16.msra.mxu2 %v4548_v58  ;;  %1880 = vmatpush.bf16.msra.mxu3 %v4552_v59  ;;  %v2049_v58 = vpack.c.b16 %v2043_v52, %v2043_v52  ;;  %v2175_v46 = vpack.c.b16 %v2169_v39, %v2169_v39  ;;  %v1819_v52 = vld [vmem:[%s6484_s2] sm:$0xf] }
  0xac   : > { %1791 = vmatpush.bf16.msra.mxu0 %v4519_v62  ;;  %1804 = vmatpush.bf16.msra.mxu1 %v4523_v63  ;;  %v4544_v62 = vld [vmem:[%s6484_s2 + $0x4] sm:$0xf]  ;;  %v2118_v63 = vsel %vm431_vm0, %v2108_v53, 0  ;;  %v2121_v0 = vsel %vm431_vm0, %v2109_v54, 0  ;;  %v4586_v53 = vld [vmem:[%s6484_s2 + $0x8] sm:$0xf] }
  0xad   : > { %v509_v6 = vpop.f32.mrf.mxu2  ;;  %v522_v7 = vpop.f32.mrf.mxu3  ;;  %v2261_v54 = vsel %vm431_vm0, %v2251_v44, 0 }
  0xae   : > { %v575_v8 = vpop.f32.mrf.mxu0  ;;  %v588_v9 = vpop.f32.mrf.mxu1  ;;  %v5271_v6 = vld [vmem:[%s5467_s25 + $0x17c] sm:$0xf0]  ;;  %v2058_v7 = vsel %vm431_vm0, %v2048_v57, 0 }
  0xaf   : > { %v5812_v14 = vadd.f32 %v575_v8, %v508_v4  ;;  %v5814_v15 = vadd.f32 %v588_v9, %v521_v5  ;;  %v4646_v4 = vld [vmem:[%s5467_s25 + $0x158] sm:$0xf0]  ;;  %v4626_v5 = vld [vmem:[%s5467_s25 + $0x178] sm:$0xf]  ;;  %v2061_v8 = vsel %vm431_vm0, %v2049_v58, 0 }
  0xb0   : > { %v5270_v9 = vld [vmem:[%s5467_s25 + $0x17c] sm:$0xf]  ;;  %v4697_v58 = vld [vmem:[%s5467_s25 + $0x1a0] sm:$0xf] }
  0xb1   : > { %v3672_v23 = vpack.c.bf16 %v5814_v15, %v5812_v14  ;;  %4490 = vmatmul.msk.bf16.vlgmr.msrb.gmra.mxu0 %vm427_vm1, %v4473_v10  ;;  %4491 = vmatmul.msk.bf16.vlgmr.msrb.gmra.mxu1 %vm427_vm1, %v4473_v10  ;;  %v4628_v10 = vld [vmem:[%s5467_s25 + $0x180] sm:$0xf0] }
  0xb2   : > { %4508 = vmatmul.msk.bf16.vlgmr.msrb.gmra.mxu2 %vm427_vm1, %v1616_v11  ;;  %4509 = vmatmul.msk.bf16.vlgmr.msrb.gmra.mxu3 %vm427_vm1, %v1616_v11  ;;  %v4636_v11 = vld [vmem:[%s5467_s25 + $0x140] sm:$0xf]  ;;  %v4631_v22 = vor.u32 %v5270_v9, %v4628_v10  ;;  %v5280_v10 = vld [vmem:[%s5467_s25 + $0x194] sm:$0xf] }
  0xb3   : > { %3688 = vst [vmem:[%s5823_s6] sm:$0xff] %v3672_v23  ;;  %1992 = vmatpush.bf16.msrb.mxu2 %v1982_v12  ;;  %2005 = vmatpush.bf16.msrb.mxu3 %v1985_v13  ;;  %v4645_v12 = vor.u32 %v5267_v2, %v4644_v1  ;;  %v4649_v13 = vor.u32 %v5266_v3, %v4646_v4  ;;  %v5264_v23 = vld [vmem:[%s5467_s25 + $0x144] sm:$0xf]  ;;  %v4670_v1 = vld [vmem:[%s5467_s25 + $0x1a8] sm:$0xf0]  ;;  %v4689_v2 = vld [vmem:[%s5467_s25 + $0x190] sm:$0xf] }
  0xb4   : > { %1925 = vmatpush.bf16.msrb.mxu0 %v1915_v16  ;;  %1938 = vmatpush.bf16.msrb.mxu1 %v1918_v17  ;;  %v4627_v16 = vor.u32 %v5271_v6, %v4626_v5  ;;  %v5265_v17 = vld [vmem:[%s5467_s25 + $0x144] sm:$0xf0]  ;;  %v5281_v5 = vld [vmem:[%s5467_s25 + $0x194] sm:$0xf0]  ;;  %v4660_v6 = vld [vmem:[%s5467_s25 + $0x190] sm:$0xf] }
  0xb5   : > { %v651_v37 = vpop.f32.mrf.mxu2  ;;  %v664_v38 = vpop.f32.mrf.mxu3 }
  0xb6   : > { %v577_v42 = vpop.f32.mrf.mxu0  ;;  %v590_v43 = vpop.f32.mrf.mxu1 }
  0xb7   : > { %1993 = vmatpush.bf16.msrb.mxu2 %v4598_v27  ;;  %2006 = vmatpush.bf16.msrb.mxu3 %v4602_v28  ;;  %v5269_v28 = vld [vmem:[%s5467_s25 + $0x16c] sm:$0xf0]  ;;  %v4623_v43 = vor.u32 %v5268_v29, %v4620_v30 }
  0xb8   : > { %1926 = vmatpush.bf16.msrb.mxu0 %v4574_v32  ;;  %1939 = vmatpush.bf16.msrb.mxu1 %v4578_v33  ;;  %v4619_v42 = vor.u32 %v5269_v28, %v4618_v18  ;;  %v5272_v18 = vld [vmem:[%s5467_s25 + $0x194] sm:$0xf] }
  0xb9   : > { %v4665_v29 = vor.u32 %v5272_v18, %v4662_v19 }
  0xbb   : > { %1994 = vmatpush.bf16.msrb.mxu2 %v4590_v47  ;;  %2007 = vmatpush.bf16.msrb.mxu3 %v4594_v48  ;;  %v2176_v47 = vpack.c.b16 %v2170_v40, %v2170_v40 }
  0xbc   : > { %1927 = vmatpush.bf16.msrb.mxu0 %v4566_v49  ;;  %1940 = vmatpush.bf16.msrb.mxu1 %v4570_v50 }
  0xbd   : > { %v653_v55 = vpop.f32.mrf.mxu2  ;;  %v666_v56 = vpop.f32.mrf.mxu3  ;;  %v2188_v57 = vsel %vm431_vm0, %v2176_v47, 0 }
  0xbe   : > { %v711_v59 = vpop.f32.mrf.mxu0  ;;  %v724_v60 = vpop.f32.mrf.mxu1  ;;  %v2264_v55 = vsel %vm431_vm0, %v2252_v45, 0  ;;  %v2185_v56 = vsel %vm431_vm0, %v2175_v46, 0 }
  0xbf   : > { %v712_v20 = vadd.f32 %v711_v59, %v651_v37  ;;  %v725_v21 = vadd.f32 %v724_v60, %v664_v38  ;;  %v4637_v37 = vor.u32 %v5265_v17, %v4636_v11  ;;  %v4641_v38 = vor.u32 %v5264_v23, %v4638_v24  ;;  %v5283_v59 = vld [vmem:[%s5467_s25 + $0x1a4] sm:$0xf0]  ;;  %v5282_v60 = vld [vmem:[%s5467_s25 + $0x1a4] sm:$0xf]  ;;  %v4691_v11 = vld [vmem:[%s5467_s25 + $0x198] sm:$0xf0] }
  0xc0   : > { %v4698_v3 = vor.u32 %v5283_v59, %v4697_v58  ;;  %v5273_v17 = vld [vmem:[%s5467_s25 + $0x194] sm:$0xf0]  ;;  %v4690_v24 = vor.u32 %v5281_v5, %v4689_v2  ;;  %v4694_v25 = vor.u32 %v5280_v10, %v4691_v11  ;;  %v4717_v58 = vld [vmem:[%s5467_s25 + $0x180] sm:$0xf0]  ;;  %v4707_v2 = vld [vmem:[%s5467_s25 + $0x168] sm:$0xf] }
  0xc1   : > { %4532 = vmatmul.msk.bf16.vlgmr.msra.gmra.mxu0 %vm427_vm1, %v4515_v61  ;;  %4533 = vmatmul.msk.bf16.vlgmr.msra.gmra.mxu1 %vm427_vm1, %v4515_v61  ;;  %v4699_v61 = vld [vmem:[%s5467_s25 + $0x1a8] sm:$0xf0]  ;;  %v4661_v28 = vor.u32 %v5273_v17, %v4660_v6  ;;  %v4731_v59 = vld [vmem:[%s5467_s25 + $0x1b8] sm:$0xf] }
  0xc2   : > { %4561 = vmatmul.msk.bf16.vlgmr.msra.gmra.mxu2 %vm427_vm1, %v4544_v62  ;;  %4562 = vmatmul.msk.bf16.vlgmr.msra.gmra.mxu3 %vm427_vm1, %v4544_v62  ;;  %v4668_v62 = vld [vmem:[%s5467_s25 + $0x1a0] sm:$0xf]  ;;  %v4702_v4 = vor.u32 %v5282_v60, %v4699_v61 }
  0xc3   : > { %2128 = vmatpush.bf16.msra.mxu2 %v2118_v63  ;;  %2141 = vmatpush.bf16.msra.mxu3 %v2121_v0  ;;  %v5275_v63 = vld [vmem:[%s5467_s25 + $0x1a4] sm:$0xf0]  ;;  %v5274_v0 = vld [vmem:[%s5467_s25 + $0x1a4] sm:$0xf] }
  0xc4   : > { %2068 = vmatpush.bf16.msra.mxu0 %v2058_v7  ;;  %2081 = vmatpush.bf16.msra.mxu1 %v2061_v8  ;;  %v4727_v7 = vld [vmem:[%s5467_s25 + $0x1d8] sm:$0x33]  ;;  %v4669_v8 = vor.u32 %v5275_v63, %v4668_v62  ;;  %v4673_v9 = vor.u32 %v5274_v0, %v4670_v1  ;;  %v5285_v62 = vld [vmem:[%s5467_s25 + $0x1bc] sm:$0xf0]  ;;  %v4751_v63 = vld [vmem:[%s5467_s25 + $0x1b0] sm:$0x33] }
  0xc5   : > { %v778_v26 = vpop.f32.mrf.mxu2  ;;  %v791_v27 = vpop.f32.mrf.mxu3  ;;  %v2373_v23 = vunpack.c.h.b16 %v4727_v7  ;;  %v4732_v17 = vor.u32 %v5285_v62, %v4731_v59  ;;  %v5288_v59 = vld [vmem:[%s5467_s25 + $0x194] sm:$0xf] }
  0xc6   : > { %v5880_v31 = vadd.f32 %v778_v26, %v712_v20  ;;  %v5882_v32 = vadd.f32 %v791_v27, %v725_v21  ;;  %v713_v33 = vpop.f32.mrf.mxu0  ;;  %v726_v34 = vpop.f32.mrf.mxu1 }
  0xc7   : > { %2129 = vmatpush.bf16.msra.mxu2 %v4645_v12  ;;  %2142 = vmatpush.bf16.msra.mxu3 %v4649_v13  ;;  %v4680_v12 = vld [vmem:[%s5467_s25 + $0x188] sm:$0x33]  ;;  %v2379_v33 = vpack.c.b16 %v2373_v23, %v2373_v23 }
  0xc8   : > { %v3673_v41 = vpack.c.bf16 %v5882_v32, %v5880_v31  ;;  %2069 = vmatpush.bf16.msra.mxu0 %v4627_v16  ;;  %2082 = vmatpush.bf16.msra.mxu1 %v4631_v22  ;;  %v2372_v22 = vunpack.c.l.b16 %v4727_v7  ;;  %v2305_v26 = vunpack.c.l.b16 %v4680_v12  ;;  %v2306_v27 = vunpack.c.h.b16 %v4680_v12  ;;  %v5277_v7 = vld [vmem:[%s5467_s25 + $0x16c] sm:$0xf0] }
  0xc9   : > { %v2391_v45 = vsel %vm431_vm0, %v2379_v33, 0  ;;  %v2508_v12 = vunpack.c.l.b16 %v4751_v63  ;;  %v4708_v19 = vor.u32 %v5277_v7, %v4707_v2  ;;  %v4657_v33 = vld [vmem:[%s6484_s2 + $0x8] sm:$0xf]  ;;  %v4762_v2 = vld [vmem:[%s5467_s25 + $0x1c0] sm:$0xf0] }
  0xca   : > { %3689 = vst [vmem:[%s5823_s6 + $0x8] sm:$0xff] %v3673_v41  ;;  %v2378_v30 = vpack.c.b16 %v2372_v22, %v2372_v22  ;;  %v2311_v34 = vpack.c.b16 %v2305_v26, %v2305_v26  ;;  %v2312_v35 = vpack.c.b16 %v2306_v27, %v2306_v27 }
  0xcb   : > { %2130 = vmatpush.bf16.msra.mxu2 %v4637_v37  ;;  %2143 = vmatpush.bf16.msra.mxu3 %v4641_v38  ;;  %v2514_v23 = vpack.c.b16 %v2508_v12, %v2508_v12 }
  0xcc   : > { %2070 = vmatpush.bf16.msra.mxu0 %v4619_v42  ;;  %2083 = vmatpush.bf16.msra.mxu1 %v4623_v43  ;;  %v4615_v42 = vld [vmem:[%s6484_s2 + $0x4] sm:$0xf]  ;;  %v2022_v43 = vld [vmem:[%s6484_s2] sm:$0xf]  ;;  %v2388_v44 = vsel %vm431_vm0, %v2378_v30, 0 }
  0xcd   : > { %v780_v48 = vpop.f32.mrf.mxu2  ;;  %v793_v49 = vpop.f32.mrf.mxu3 }
  0xce   : > { %v854_v50 = vpop.f32.mrf.mxu0  ;;  %v867_v51 = vpop.f32.mrf.mxu1  ;;  %v2321_v48 = vsel %vm431_vm0, %v2311_v34, 0  ;;  %v2324_v49 = vsel %vm431_vm0, %v2312_v35, 0  ;;  %v4686_v34 = vld [vmem:[%s6484_s2 + $0x4] sm:$0xf]  ;;  %v2524_v35 = vsel %vm431_vm0, %v2514_v23, 0 }
  0xd1   : > { %4579 = vmatmul.msk.bf16.vlgmr.msrb.gmra.mxu0 %vm427_vm1, %v1819_v52  ;;  %4580 = vmatmul.msk.bf16.vlgmr.msrb.gmra.mxu1 %vm427_vm1, %v1819_v52  ;;  %v5286_v52 = vld [vmem:[%s5467_s25 + $0x1cc] sm:$0xf] }
  0xd2   : > { %4603 = vmatmul.msk.bf16.vlgmr.msrb.gmra.mxu2 %vm427_vm1, %v4586_v53  ;;  %4604 = vmatmul.msk.bf16.vlgmr.msrb.gmra.mxu3 %vm427_vm1, %v4586_v53  ;;  %v4741_v53 = vld [vmem:[%s5467_s25 + $0x1d0] sm:$0xf0] }
  0xd3   : > { %2271 = vmatpush.bf16.msrb.mxu2 %v2261_v54  ;;  %2284 = vmatpush.bf16.msrb.mxu3 %v2264_v55  ;;  %v4715_v54 = vld [vmem:[%s5467_s25 + $0x178] sm:$0xf]  ;;  %v4744_v61 = vor.u32 %v5286_v52, %v4741_v53 }
  0xd4   : > { %2195 = vmatpush.bf16.msrb.mxu0 %v2185_v56  ;;  %2208 = vmatpush.bf16.msrb.mxu1 %v2188_v57  ;;  %v5279_v56 = vld [vmem:[%s5467_s25 + $0x17c] sm:$0xf0]  ;;  %v5278_v57 = vld [vmem:[%s5467_s25 + $0x17c] sm:$0xf]  ;;  %v5289_v53 = vld [vmem:[%s5467_s25 + $0x194] sm:$0xf0] }
  0xd5   : > { %v914_v13 = vpop.f32.mrf.mxu2  ;;  %v927_v16 = vpop.f32.mrf.mxu3  ;;  %v4716_v0 = vor.u32 %v5279_v56, %v4715_v54  ;;  %v4720_v1 = vor.u32 %v5278_v57, %v4717_v58  ;;  %v4760_v54 = vld [vmem:[%s5467_s25 + $0x1b8] sm:$0xf] }
  0xd6   : > { %v856_v20 = vpop.f32.mrf.mxu0  ;;  %v869_v21 = vpop.f32.mrf.mxu1  ;;  %v915_v36 = vadd.f32 %v914_v13, %v854_v50  ;;  %v928_v37 = vadd.f32 %v927_v16, %v867_v51  ;;  %v4739_v50 = vld [vmem:[%s5467_s25 + $0x1c8] sm:$0xf]  ;;  %v5287_v51 = vld [vmem:[%s5467_s25 + $0x1cc] sm:$0xf0]  ;;  %v2509_v13 = vunpack.c.h.b16 %v4751_v63  ;;  %v4756_v16 = vld [vmem:[%s5467_s25 + $0x1d8] sm:$0x33] }
  0xd7   : > { %2272 = vmatpush.bf16.msrb.mxu2 %v4698_v3  ;;  %2285 = vmatpush.bf16.msrb.mxu3 %v4702_v4  ;;  %v4740_v60 = vor.u32 %v5287_v51, %v4739_v50  ;;  %v5284_v3 = vld [vmem:[%s5467_s25 + $0x1bc] sm:$0xf]  ;;  %v4733_v4 = vld [vmem:[%s5467_s25 + $0x1c0] sm:$0xf0]  ;;  %v2448_v21 = vunpack.c.l.b16 %v4756_v16  ;;  %v2449_v22 = vunpack.c.h.b16 %v4756_v16 }
  0xd8   : > { %2196 = vmatpush.bf16.msrb.mxu0 %v4669_v8  ;;  %2209 = vmatpush.bf16.msrb.mxu1 %v4673_v9  ;;  %v5276_v8 = vld [vmem:[%s5467_s25 + $0x16c] sm:$0xf]  ;;  %v4709_v9 = vld [vmem:[%s5467_s25 + $0x170] sm:$0xf0]  ;;  %v4736_v18 = vor.u32 %v5284_v3, %v4733_v4 }
  0xd9   : > { %v4712_v20 = vor.u32 %v5276_v8, %v4709_v9  ;;  %v2454_v27 = vpack.c.b16 %v2448_v21, %v2448_v21 }
  0xdb   : > { %2273 = vmatpush.bf16.msrb.mxu2 %v4690_v24  ;;  %2286 = vmatpush.bf16.msrb.mxu3 %v4694_v25  ;;  %v2515_v24 = vpack.c.b16 %v2509_v13, %v2509_v13 }
  0xdc   : > { %2197 = vmatpush.bf16.msrb.mxu0 %v4661_v28  ;;  %2210 = vmatpush.bf16.msrb.mxu1 %v4665_v29  ;;  %v2455_v28 = vpack.c.b16 %v2449_v22, %v2449_v22 }
  0xdd   : > { %v916_v38 = vpop.f32.mrf.mxu2  ;;  %v929_v39 = vpop.f32.mrf.mxu3 }
  0xde   : > { %v981_v40 = vpop.f32.mrf.mxu0  ;;  %v994_v41 = vpop.f32.mrf.mxu1  ;;  %v5291_v38 = vld [vmem:[%s5467_s25 + $0x1a4] sm:$0xf0]  ;;  %v5290_v39 = vld [vmem:[%s5467_s25 + $0x1a4] sm:$0xf] }
  0xdf   : > { %v5927_v46 = vadd.f32 %v981_v40, %v915_v36  ;;  %v5929_v47 = vadd.f32 %v994_v41, %v928_v37  ;;  %v2527_v36 = vsel %vm431_vm0, %v2515_v24, 0  ;;  %v4786_v37 = vld [vmem:[%s5467_s25 + $0x1a0] sm:$0xf]  ;;  %v4788_v40 = vld [vmem:[%s5467_s25 + $0x1a8] sm:$0xf0] }
  0xe0   : > { %v4768_v41 = vld [vmem:[%s5467_s25 + $0x1c8] sm:$0xf]  ;;  %v4787_v50 = vor.u32 %v5291_v38, %v4786_v37  ;;  %v4791_v51 = vor.u32 %v5290_v39, %v4788_v40  ;;  %v4841_v37 = vld [vmem:[%s5467_s25 + $0x1f8] sm:$0xf0]  ;;  %v4810_v38 = vld [vmem:[%s5467_s25 + $0x1f0] sm:$0xf] }
  0xe1   : > { %v3674_v55 = vpack.c.bf16 %v5929_v47, %v5927_v46  ;;  %4632 = vmatmul.msk.bf16.vlgmr.msra.gmra.mxu0 %vm427_vm1, %v4615_v42  ;;  %4633 = vmatmul.msk.bf16.vlgmr.msra.gmra.mxu1 %vm427_vm1, %v4615_v42  ;;  %v5295_v42 = vld [vmem:[%s5467_s25 + $0x1cc] sm:$0xf0]  ;;  %v5299_v39 = vld [vmem:[%s5467_s25 + $0x1f4] sm:$0xf0]  ;;  %v5298_v40 = vld [vmem:[%s5467_s25 + $0x1f4] sm:$0xf] }
  0xe2   : > { %4650 = vmatmul.msk.bf16.vlgmr.msra.gmra.mxu2 %vm427_vm1, %v2022_v43  ;;  %4651 = vmatmul.msk.bf16.vlgmr.msra.gmra.mxu3 %vm427_vm1, %v2022_v43  ;;  %v2464_v43 = vsel %vm431_vm0, %v2454_v27, 0  ;;  %v4769_v52 = vor.u32 %v5295_v42, %v4768_v41  ;;  %v4728_v27 = vld [vmem:[%s6484_s2 + $0x8] sm:$0xf]  ;;  %v4812_v41 = vld [vmem:[%s5467_s25 + $0x1f8] sm:$0xf0] }
  0xe3   : > { %3690 = vst [vmem:[%s5823_s6 + $0x10] sm:$0xff] %v3674_v55  ;;  %2398 = vmatpush.bf16.msra.mxu2 %v2388_v44  ;;  %2411 = vmatpush.bf16.msra.mxu3 %v2391_v45  ;;  %v2467_v44 = vsel %vm431_vm0, %v2455_v28, 0  ;;  %v5294_v45 = vld [vmem:[%s5467_s25 + $0x1cc] sm:$0xf]  ;;  %v4827_v55 = vld [vmem:[%s5467_s25 + $0x200] sm:$0x33] }
  0xe4   : > { %2331 = vmatpush.bf16.msra.mxu0 %v2321_v48  ;;  %2344 = vmatpush.bf16.msra.mxu1 %v2324_v49  ;;  %v4770_v48 = vld [vmem:[%s5467_s25 + $0x1d0] sm:$0xf0]  ;;  %v4778_v49 = vld [vmem:[%s5467_s25 + $0x190] sm:$0xf]  ;;  %v4831_v42 = vld [vmem:[%s5467_s25 + $0x1e0] sm:$0xf] }
  0xe5   : > { %v1057_v5 = vpop.f32.mrf.mxu2  ;;  %v1070_v6 = vpop.f32.mrf.mxu3  ;;  %v4773_v58 = vor.u32 %v5294_v45, %v4770_v48  ;;  %v4779_v9 = vor.u32 %v5289_v53, %v4778_v49  ;;  %v5305_v45 = vld [vmem:[%s5467_s25 + $0x1e4] sm:$0xf0]  ;;  %v4802_v48 = vld [vmem:[%s5467_s25 + $0x1e0] sm:$0xf]  ;;  %v4833_v53 = vld [vmem:[%s5467_s25 + $0x1e8] sm:$0xf0] }
  0xe6   : > { %v983_v10 = vpop.f32.mrf.mxu0  ;;  %v996_v11 = vpop.f32.mrf.mxu1  ;;  %v4869_v49 = vld [vmem:[%s5467_s25 + $0x228] sm:$0x33] }
  0xe7   : > { %2399 = vmatpush.bf16.msra.mxu2 %v4740_v60  ;;  %2412 = vmatpush.bf16.msra.mxu3 %v4744_v61  ;;  %v4780_v60 = vld [vmem:[%s5467_s25 + $0x198] sm:$0xf0]  ;;  %v4798_v61 = vld [vmem:[%s5467_s25 + $0x200] sm:$0x33] }
  0xe8   : > { %2332 = vmatpush.bf16.msra.mxu0 %v4716_v0  ;;  %2345 = vmatpush.bf16.msra.mxu1 %v4720_v1  ;;  %v5293_v0 = vld [vmem:[%s5467_s25 + $0x1bc] sm:$0xf0]  ;;  %v5292_v1 = vld [vmem:[%s5467_s25 + $0x1bc] sm:$0xf]  ;;  %v4783_v10 = vor.u32 %v5288_v59, %v4780_v60  ;;  %v2575_v11 = vunpack.c.l.b16 %v4798_v61  ;;  %v2576_v12 = vunpack.c.h.b16 %v4798_v61  ;;  %v4804_v59 = vld [vmem:[%s5467_s25 + $0x1e8] sm:$0xf0] }
  0xe9   : > { %v4761_v16 = vor.u32 %v5293_v0, %v4760_v54  ;;  %v4822_v54 = vld [vmem:[%s5467_s25 + $0x1d8] sm:$0x33]  ;;  %v4832_v0 = vor.u32 %v5305_v45, %v4831_v42  ;;  %v5309_v42 = vld [vmem:[%s5467_s25 + $0x20c] sm:$0xf0] }
  0xea   : > { %v2582_v21 = vpack.c.b16 %v2576_v12, %v2576_v12 }
  0xeb   : > { %2400 = vmatpush.bf16.msra.mxu2 %v4732_v17  ;;  %2413 = vmatpush.bf16.msra.mxu3 %v4736_v18  ;;  %v4765_v17 = vor.u32 %v5292_v1, %v4762_v2  ;;  %v2711_v2 = vunpack.c.l.b16 %v4822_v54 }
  0xec   : > { %2333 = vmatpush.bf16.msra.mxu0 %v4708_v19  ;;  %2346 = vmatpush.bf16.msra.mxu1 %v4712_v20  ;;  %v2581_v20 = vpack.c.b16 %v2575_v11, %v2575_v11 }
  0xed   : > { %v1059_v25 = vpop.f32.mrf.mxu2  ;;  %v1072_v26 = vpop.f32.mrf.mxu3 }
  0xee   : > { %v1117_v29 = vpop.f32.mrf.mxu0  ;;  %v1130_v30 = vpop.f32.mrf.mxu1  ;;  %v2225_v26 = vld [vmem:[%s6484_s2] sm:$0xf] }
  0xef   : > { %v1118_v56 = vadd.f32 %v1117_v29, %v1057_v5  ;;  %v1131_v57 = vadd.f32 %v1130_v30, %v1070_v6  ;;  %v2651_v5 = vunpack.c.l.b16 %v4827_v55  ;;  %v2652_v6 = vunpack.c.h.b16 %v4827_v55 }
  0xf0   : > { %v2591_v30 = vsel %vm431_vm0, %v2581_v20, 0  ;;  %v4757_v20 = vld [vmem:[%s6484_s2 + $0x4] sm:$0xf] }
  0xf1   : > { %4674 = vmatmul.msk.bf16.vlgmr.msrb.gmra.mxu0 %vm427_vm1, %v4657_v33  ;;  %4675 = vmatmul.msk.bf16.vlgmr.msrb.gmra.mxu1 %vm427_vm1, %v4657_v33  ;;  %v2657_v18 = vpack.c.b16 %v2651_v5, %v2651_v5  ;;  %v2658_v19 = vpack.c.b16 %v2652_v6, %v2652_v6  ;;  %v2594_v33 = vsel %vm431_vm0, %v2582_v21, 0  ;;  %v2428_v21 = vld [vmem:[%s6484_s2] sm:$0xf] }
  0xf2   : > { %4703 = vmatmul.msk.bf16.vlgmr.msrb.gmra.mxu2 %vm427_vm1, %v4686_v34  ;;  %4704 = vmatmul.msk.bf16.vlgmr.msrb.gmra.mxu3 %vm427_vm1, %v4686_v34  ;;  %v4839_v34 = vld [vmem:[%s5467_s25 + $0x1f0] sm:$0xf] }
  0xf3   : > { %2534 = vmatpush.bf16.msrb.mxu2 %v2524_v35  ;;  %2547 = vmatpush.bf16.msrb.mxu3 %v2527_v36  ;;  %v2667_v28 = vsel %vm431_vm0, %v2657_v18, 0  ;;  %v2670_v29 = vsel %vm431_vm0, %v2658_v19, 0  ;;  %v5307_v35 = vld [vmem:[%s5467_s25 + $0x1f4] sm:$0xf0]  ;;  %v5306_v36 = vld [vmem:[%s5467_s25 + $0x1f4] sm:$0xf] }
  0xf4   : > { %2474 = vmatpush.bf16.msrb.mxu0 %v2464_v43  ;;  %2487 = vmatpush.bf16.msrb.mxu1 %v2467_v44  ;;  %v4840_v43 = vor.u32 %v5307_v35, %v4839_v34  ;;  %v4844_v44 = vor.u32 %v5306_v36, %v4841_v37  ;;  %v4857_v34 = vld [vmem:[%s5467_s25 + $0x1c8] sm:$0xf]  ;;  %v5303_v36 = vld [vmem:[%s5467_s25 + $0x1cc] sm:$0xf0]  ;;  %v5302_v37 = vld [vmem:[%s5467_s25 + $0x1cc] sm:$0xf] }
  0xf5   : > { %v1184_v62 = vpop.f32.mrf.mxu2  ;;  %v1197_v63 = vpop.f32.mrf.mxu3 }
  0xf6   : > { %v5990_v3 = vadd.f32 %v1184_v62, %v1118_v56  ;;  %v5992_v4 = vadd.f32 %v1197_v63, %v1131_v57  ;;  %v1119_v7 = vpop.f32.mrf.mxu0  ;;  %v1132_v8 = vpop.f32.mrf.mxu1  ;;  %v5297_v57 = vld [vmem:[%s5467_s25 + $0x1e4] sm:$0xf0]  ;;  %v2778_v62 = vunpack.c.l.b16 %v4869_v49  ;;  %v2779_v63 = vunpack.c.h.b16 %v4869_v49  ;;  %v5308_v49 = vld [vmem:[%s5467_s25 + $0x20c] sm:$0xf] }
  0xf7   : > { %2535 = vmatpush.bf16.msrb.mxu2 %v4787_v50  ;;  %2548 = vmatpush.bf16.msrb.mxu3 %v4791_v51  ;;  %v4811_v50 = vor.u32 %v5299_v39, %v4810_v38  ;;  %v4815_v51 = vor.u32 %v5298_v40, %v4812_v41  ;;  %v2712_v7 = vunpack.c.h.b16 %v4822_v54  ;;  %v4803_v8 = vor.u32 %v5297_v57, %v4802_v48  ;;  %v4859_v38 = vld [vmem:[%s5467_s25 + $0x1d0] sm:$0xf0]  ;;  %v4873_v39 = vld [vmem:[%s5467_s25 + $0x208] sm:$0xf]  ;;  %v4849_v48 = vld [vmem:[%s5467_s25 + $0x1b8] sm:$0xf] }
  0xf8   : > { %v3675_v13 = vpack.c.bf16 %v5992_v4, %v5990_v3  ;;  %2475 = vmatpush.bf16.msrb.mxu0 %v4769_v52  ;;  %2488 = vmatpush.bf16.msrb.mxu1 %v4773_v58  ;;  %v5304_v52 = vld [vmem:[%s5467_s25 + $0x1e4] sm:$0xf]  ;;  %v2784_v6 = vpack.c.b16 %v2778_v62, %v2778_v62  ;;  %v4862_v45 = vor.u32 %v5302_v37, %v4859_v38  ;;  %v5300_v54 = vld [vmem:[%s5467_s25 + $0x1bc] sm:$0xf]  ;;  %v5313_v37 = vld [vmem:[%s5467_s25 + $0x1e4] sm:$0xf0] }
  0xf9   : > { %v5296_v58 = vld [vmem:[%s5467_s25 + $0x1e4] sm:$0xf]  ;;  %v4836_v1 = vor.u32 %v5304_v52, %v4833_v53  ;;  %v2718_v11 = vpack.c.b16 %v2712_v7, %v2712_v7  ;;  %v5301_v53 = vld [vmem:[%s5467_s25 + $0x1bc] sm:$0xf0]  ;;  %v4902_v38 = vld [vmem:[%s5467_s25 + $0x208] sm:$0xf] }
  0xfa   : > { %3691 = vst [vmem:[%s5823_s6 + $0x18] sm:$0xff] %v3675_v13  ;;  %v4807_v5 = vor.u32 %v5296_v58, %v4804_v59 }
  0xfb   : > { %2536 = vmatpush.bf16.msrb.mxu2 %v4779_v9  ;;  %2549 = vmatpush.bf16.msrb.mxu3 %v4783_v10  ;;  %v2785_v9 = vpack.c.b16 %v2779_v63, %v2779_v63  ;;  %v2717_v10 = vpack.c.b16 %v2711_v2, %v2711_v2  ;;  %v4850_v63 = vor.u32 %v5301_v53, %v4849_v48  ;;  %v5316_v53 = vld [vmem:[%s5467_s25 + $0x20c] sm:$0xf] }
  0xfc   : > { %2476 = vmatpush.bf16.msrb.mxu0 %v4761_v16  ;;  %2489 = vmatpush.bf16.msrb.mxu1 %v4765_v17 }
  0xfd   : > { %v1186_v22 = vpop.f32.mrf.mxu2  ;;  %v1199_v23 = vpop.f32.mrf.mxu3 }
  0xfe   : > { %v1260_v24 = vpop.f32.mrf.mxu0  ;;  %v1273_v25 = vpop.f32.mrf.mxu1  ;;  %v2794_v22 = vsel %vm431_vm0, %v2784_v6, 0  ;;  %v2797_v23 = vsel %vm431_vm0, %v2785_v9, 0 }
 0x101   : > { %4721 = vmatmul.msk.bf16.vlgmr.msra.gmra.mxu0 %vm427_vm1, %v2225_v26  ;;  %4722 = vmatmul.msk.bf16.vlgmr.msra.gmra.mxu1 %vm427_vm1, %v2225_v26  ;;  %v2727_v26 = vsel %vm431_vm0, %v2717_v10, 0 }
 0x102   : > { %4745 = vmatmul.msk.bf16.vlgmr.msra.gmra.mxu2 %vm427_vm1, %v4728_v27  ;;  %4746 = vmatmul.msk.bf16.vlgmr.msra.gmra.mxu3 %vm427_vm1, %v4728_v27  ;;  %v2730_v27 = vsel %vm431_vm0, %v2718_v11, 0 }
 0x103   : > { %2677 = vmatpush.bf16.msra.mxu2 %v2667_v28  ;;  %2690 = vmatpush.bf16.msra.mxu3 %v2670_v29  ;;  %v4881_v28 = vld [vmem:[%s5467_s25 + $0x218] sm:$0xf]  ;;  %v5311_v29 = vld [vmem:[%s5467_s25 + $0x21c] sm:$0xf0] }
 0x104   : > { %2601 = vmatpush.bf16.msra.mxu0 %v2591_v30  ;;  %2614 = vmatpush.bf16.msra.mxu1 %v2594_v33  ;;  %v5310_v30 = vld [vmem:[%s5467_s25 + $0x21c] sm:$0xf]  ;;  %v4883_v33 = vld [vmem:[%s5467_s25 + $0x220] sm:$0xf0]  ;;  %v4882_v40 = vor.u32 %v5311_v29, %v4881_v28 }
 0x105   : > { %v1320_v55 = vpop.f32.mrf.mxu2  ;;  %v1333_v56 = vpop.f32.mrf.mxu3  ;;  %v4886_v41 = vor.u32 %v5310_v30, %v4883_v33  ;;  %v5318_v29 = vld [vmem:[%s5467_s25 + $0x21c] sm:$0xf]  ;;  %v4912_v30 = vld [vmem:[%s5467_s25 + $0x220] sm:$0xf0]  ;;  %v4920_v33 = vld [vmem:[%s5467_s25 + $0x1e0] sm:$0xf] }
 0x106   : > { %v1262_v60 = vpop.f32.mrf.mxu0  ;;  %v1275_v61 = vpop.f32.mrf.mxu1  ;;  %v1321_v12 = vadd.f32 %v1320_v55, %v1260_v24  ;;  %v1334_v13 = vadd.f32 %v1333_v56, %v1273_v25  ;;  %v4851_v55 = vld [vmem:[%s5467_s25 + $0x1c0] sm:$0xf0] }
 0x107   : > { %2678 = vmatpush.bf16.msra.mxu2 %v4840_v43  ;;  %2691 = vmatpush.bf16.msra.mxu3 %v4844_v44  ;;  %v4893_v43 = vld [vmem:[%s5467_s25 + $0x200] sm:$0x33]  ;;  %v4858_v44 = vor.u32 %v5303_v36, %v4857_v34  ;;  %v4898_v60 = vld [vmem:[%s5467_s25 + $0x228] sm:$0x33]  ;;  %v4874_v61 = vor.u32 %v5309_v42, %v4873_v39  ;;  %v4969_v39 = vld [vmem:[%s5467_s25 + $0x250] sm:$0x33]  ;;  %v4915_v42 = vor.u32 %v5318_v29, %v4912_v30 }
 0x108   : > { %2602 = vmatpush.bf16.msra.mxu0 %v4811_v50  ;;  %2615 = vmatpush.bf16.msra.mxu1 %v4815_v51  ;;  %v4875_v50 = vld [vmem:[%s5467_s25 + $0x210] sm:$0xf0]  ;;  %v2914_v58 = vunpack.c.l.b16 %v4893_v43  ;;  %v2915_v59 = vunpack.c.h.b16 %v4893_v43  ;;  %v2855_v2 = vunpack.c.h.b16 %v4898_v60  ;;  %v5312_v43 = vld [vmem:[%s5467_s25 + $0x1e4] sm:$0xf]  ;;  %v4954_v29 = vld [vmem:[%s5467_s25 + $0x248] sm:$0xf0] }
 0x109   : > { %v4878_v62 = vor.u32 %v5308_v49, %v4875_v50  ;;  %v5317_v50 = vld [vmem:[%s5467_s25 + $0x20c] sm:$0xf0] }
 0x10a   : > { %v2920_v7 = vpack.c.b16 %v2914_v58, %v2914_v58  ;;  %v2861_v10 = vpack.c.b16 %v2855_v2, %v2855_v2  ;;  %v4973_v30 = vld [vmem:[%s5467_s25 + $0x230] sm:$0xf] }
 0x10b   : > { %2679 = vmatpush.bf16.msra.mxu2 %v4832_v0  ;;  %2692 = vmatpush.bf16.msra.mxu3 %v4836_v1  ;;  %v4854_v0 = vor.u32 %v5300_v54, %v4851_v55  ;;  %v2854_v1 = vunpack.c.l.b16 %v4898_v60  ;;  %v4904_v54 = vld [vmem:[%s5467_s25 + $0x210] sm:$0xf0] }
 0x10c   : > { %2603 = vmatpush.bf16.msra.mxu0 %v4803_v8  ;;  %2616 = vmatpush.bf16.msra.mxu1 %v4807_v5  ;;  %v2921_v8 = vpack.c.b16 %v2915_v59, %v2915_v59  ;;  %v2873_v28 = vsel %vm431_vm0, %v2861_v10, 0  ;;  %v4921_v59 = vor.u32 %v5313_v37, %v4920_v33  ;;  %v5011_v37 = vld [vmem:[%s5467_s25 + $0x278] sm:$0x33] }
 0x10d   : > { %v1322_v16 = vpop.f32.mrf.mxu2  ;;  %v1335_v17 = vpop.f32.mrf.mxu3  ;;  %v2860_v9 = vpack.c.b16 %v2854_v1, %v2854_v1  ;;  %v4907_v1 = vor.u32 %v5316_v53, %v4904_v54  ;;  %v3184_v54 = vunpack.c.l.b16 %v5011_v37 }
 0x10e   : > { %v1387_v18 = vpop.f32.mrf.mxu0  ;;  %v1400_v19 = vpop.f32.mrf.mxu1  ;;  %v4828_v16 = vld [vmem:[%s6484_s2 + $0x4] sm:$0xf]  ;;  %v2930_v17 = vsel %vm431_vm0, %v2920_v7, 0 }
 0x10f   : > { %v6037_v24 = vadd.f32 %v1387_v18, %v1321_v12  ;;  %v6039_v25 = vadd.f32 %v1400_v19, %v1334_v13  ;;  %v4799_v13 = vld [vmem:[%s6484_s2 + $0x8] sm:$0xf]  ;;  %v2933_v18 = vsel %vm431_vm0, %v2921_v8, 0  ;;  %v4928_v19 = vld [vmem:[%s5467_s25 + $0x1f0] sm:$0xf] }
 0x111   : > { %v3676_v35 = vpack.c.bf16 %v6039_v25, %v6037_v24  ;;  %4774 = vmatmul.msk.bf16.vlgmr.msrb.gmra.mxu0 %vm427_vm1, %v4757_v20  ;;  %4775 = vmatmul.msk.bf16.vlgmr.msrb.gmra.mxu1 %vm427_vm1, %v4757_v20  ;;  %v5315_v20 = vld [vmem:[%s5467_s25 + $0x1f4] sm:$0xf0] }
 0x112   : > { %4792 = vmatmul.msk.bf16.vlgmr.msrb.gmra.mxu2 %vm427_vm1, %v2428_v21  ;;  %4793 = vmatmul.msk.bf16.vlgmr.msrb.gmra.mxu3 %vm427_vm1, %v2428_v21  ;;  %v5314_v21 = vld [vmem:[%s5467_s25 + $0x1f4] sm:$0xf]  ;;  %v4929_v34 = vor.u32 %v5315_v20, %v4928_v19  ;;  %v4981_v20 = vld [vmem:[%s5467_s25 + $0x240] sm:$0xf] }
 0x113   : > { %3692 = vst [vmem:[%s5823_s6 + $0x20] sm:$0xff] %v3676_v35  ;;  %2804 = vmatpush.bf16.msrb.mxu2 %v2794_v22  ;;  %2817 = vmatpush.bf16.msrb.mxu3 %v2797_v23  ;;  %v4930_v22 = vld [vmem:[%s5467_s25 + $0x1f8] sm:$0xf0]  ;;  %v4910_v23 = vld [vmem:[%s5467_s25 + $0x218] sm:$0xf] }
 0x114   : > { %2737 = vmatpush.bf16.msrb.mxu0 %v2727_v26  ;;  %2750 = vmatpush.bf16.msrb.mxu1 %v2730_v27  ;;  %v5319_v26 = vld [vmem:[%s5467_s25 + $0x21c] sm:$0xf0]  ;;  %v2870_v27 = vsel %vm431_vm0, %v2860_v9, 0  ;;  %v4933_v35 = vor.u32 %v5314_v21, %v4930_v22  ;;  %v5331_v21 = vld [vmem:[%s5467_s25 + $0x244] sm:$0xf0] }
 0x115   : > { %v1463_v51 = vpop.f32.mrf.mxu2  ;;  %v1476_v52 = vpop.f32.mrf.mxu3  ;;  %v4911_v36 = vor.u32 %v5319_v26, %v4910_v23  ;;  %v5330_v22 = vld [vmem:[%s5467_s25 + $0x244] sm:$0xf]  ;;  %v4983_v23 = vld [vmem:[%s5467_s25 + $0x248] sm:$0xf0]  ;;  %v4952_v26 = vld [vmem:[%s5467_s25 + $0x240] sm:$0xf]  ;;  %v4982_v33 = vor.u32 %v5331_v21, %v4981_v20 }
 0x116   : > { %v1389_v56 = vpop.f32.mrf.mxu0  ;;  %v1402_v57 = vpop.f32.mrf.mxu1  ;;  %v5023_v20 = vld [vmem:[%s5467_s25 + $0x268] sm:$0xf]  ;;  %v5335_v21 = vld [vmem:[%s5467_s25 + $0x26c] sm:$0xf0] }
 0x117   : > { %2805 = vmatpush.bf16.msrb.mxu2 %v4882_v40  ;;  %2818 = vmatpush.bf16.msrb.mxu3 %v4886_v41 }
 0x118   : > { %2738 = vmatpush.bf16.msrb.mxu0 %v4858_v44  ;;  %2751 = vmatpush.bf16.msrb.mxu1 %v4862_v45  ;;  %v4922_v44 = vld [vmem:[%s5467_s25 + $0x1e8] sm:$0xf0]  ;;  %v4940_v45 = vld [vmem:[%s5467_s25 + $0x250] sm:$0x33] }
 0x119   : > { %v4925_v60 = vor.u32 %v5312_v43, %v4922_v44 }
 0x11b   : > { %2806 = vmatpush.bf16.msrb.mxu2 %v4874_v61  ;;  %2819 = vmatpush.bf16.msrb.mxu3 %v4878_v62  ;;  %v2981_v61 = vunpack.c.l.b16 %v4940_v45  ;;  %v2982_v62 = vunpack.c.h.b16 %v4940_v45  ;;  %v5321_v45 = vld [vmem:[%s5467_s25 + $0x234] sm:$0xf0] }
 0x11c   : > { %2739 = vmatpush.bf16.msrb.mxu0 %v4850_v63  ;;  %2752 = vmatpush.bf16.msrb.mxu1 %v4854_v0  ;;  %v4903_v0 = vor.u32 %v5317_v50, %v4902_v38 }
 0x11d   : > { %v1465_v5 = vpop.f32.mrf.mxu2  ;;  %v1478_v6 = vpop.f32.mrf.mxu3  ;;  %v2987_v8 = vpack.c.b16 %v2981_v61, %v2981_v61 }
 0x11e   : > { %v1523_v11 = vpop.f32.mrf.mxu0  ;;  %v1536_v12 = vpop.f32.mrf.mxu1  ;;  %v2988_v5 = vpack.c.b16 %v2982_v62, %v2982_v62  ;;  %v3190_v62 = vpack.c.b16 %v3184_v54, %v3184_v54 }
 0x11f   : > { %v1524_v40 = vadd.f32 %v1523_v11, %v1463_v51  ;;  %v1537_v41 = vadd.f32 %v1536_v12, %v1476_v52  ;;  %v3057_v51 = vunpack.c.l.b16 %v4969_v39  ;;  %v3058_v52 = vunpack.c.h.b16 %v4969_v39  ;;  %v2631_v12 = vld [vmem:[%s6484_s2] sm:$0xf] }
 0x120   : > { %v3000_v19 = vsel %vm431_vm0, %v2988_v5, 0 }
 0x121   : > { %4816 = vmatmul.msk.bf16.vlgmr.msra.gmra.mxu0 %vm427_vm1, %v4799_v13  ;;  %4817 = vmatmul.msk.bf16.vlgmr.msra.gmra.mxu1 %vm427_vm1, %v4799_v13  ;;  %v3063_v2 = vpack.c.b16 %v3057_v51, %v3057_v51  ;;  %v3064_v7 = vpack.c.b16 %v3058_v52, %v3058_v52  ;;  %v4870_v13 = vld [vmem:[%s6484_s2 + $0x8] sm:$0xf] }
 0x122   : > { %4845 = vmatmul.msk.bf16.vlgmr.msra.gmra.mxu2 %vm427_vm1, %v4828_v16  ;;  %4846 = vmatmul.msk.bf16.vlgmr.msra.gmra.mxu3 %vm427_vm1, %v4828_v16 }
 0x123   : > { %2940 = vmatpush.bf16.msra.mxu2 %v2930_v17  ;;  %2953 = vmatpush.bf16.msra.mxu3 %v2933_v18  ;;  %v3073_v16 = vsel %vm431_vm0, %v3063_v2, 0  ;;  %v3076_v17 = vsel %vm431_vm0, %v3064_v7, 0  ;;  %v2997_v18 = vsel %vm431_vm0, %v2987_v8, 0 }
 0x124   : > { %2880 = vmatpush.bf16.msra.mxu0 %v2870_v27  ;;  %2893 = vmatpush.bf16.msra.mxu1 %v2873_v28  ;;  %v5323_v27 = vld [vmem:[%s5467_s25 + $0x244] sm:$0xf0]  ;;  %v5322_v28 = vld [vmem:[%s5467_s25 + $0x244] sm:$0xf] }
 0x125   : > { %v1590_v48 = vpop.f32.mrf.mxu2  ;;  %v1603_v49 = vpop.f32.mrf.mxu3  ;;  %v4953_v38 = vor.u32 %v5323_v27, %v4952_v26  ;;  %v4957_v39 = vor.u32 %v5322_v28, %v4954_v29  ;;  %v4999_v26 = vld [vmem:[%s5467_s25 + $0x218] sm:$0xf]  ;;  %v5327_v28 = vld [vmem:[%s5467_s25 + $0x21c] sm:$0xf0]  ;;  %v5326_v29 = vld [vmem:[%s5467_s25 + $0x21c] sm:$0xf] }
 0x126   : > { %v6100_v55 = vadd.f32 %v1590_v48, %v1524_v40  ;;  %v6102_v56 = vadd.f32 %v1603_v49, %v1537_v41  ;;  %v1525_v57 = vpop.f32.mrf.mxu0  ;;  %v1538_v58 = vpop.f32.mrf.mxu1  ;;  %v5328_v40 = vld [vmem:[%s5467_s25 + $0x234] sm:$0xf]  ;;  %v4975_v41 = vld [vmem:[%s5467_s25 + $0x238] sm:$0xf0] }
 0x127   : > { %2941 = vmatpush.bf16.msra.mxu2 %v4929_v34  ;;  %2954 = vmatpush.bf16.msra.mxu3 %v4933_v35  ;;  %v4986_v34 = vor.u32 %v5330_v22, %v4983_v23  ;;  %v5329_v35 = vld [vmem:[%s5467_s25 + $0x234] sm:$0xf0]  ;;  %v5320_v48 = vld [vmem:[%s5467_s25 + $0x234] sm:$0xf]  ;;  %v4946_v49 = vld [vmem:[%s5467_s25 + $0x238] sm:$0xf0]  ;;  %v3185_v57 = vunpack.c.h.b16 %v5011_v37  ;;  %v4978_v51 = vor.u32 %v5328_v40, %v4975_v41 }
 0x128   : > { %v3677_v63 = vpack.c.bf16 %v6102_v56, %v6100_v55  ;;  %2881 = vmatpush.bf16.msra.mxu0 %v4911_v36  ;;  %2894 = vmatpush.bf16.msra.mxu1 %v4915_v42  ;;  %v4944_v36 = vld [vmem:[%s5467_s25 + $0x230] sm:$0xf]  ;;  %v4964_v42 = vld [vmem:[%s5467_s25 + $0x228] sm:$0x33]  ;;  %v4974_v58 = vor.u32 %v5329_v35, %v4973_v30  ;;  %v4949_v61 = vor.u32 %v5320_v48, %v4946_v49  ;;  %v5025_v23 = vld [vmem:[%s5467_s25 + $0x270] sm:$0xf0] }
 0x129   : > { %v3117_v52 = vunpack.c.l.b16 %v4964_v42  ;;  %v5334_v22 = vld [vmem:[%s5467_s25 + $0x26c] sm:$0xf]  ;;  %v5001_v30 = vld [vmem:[%s5467_s25 + $0x220] sm:$0xf0]  ;;  %v5035_v37 = vld [vmem:[%s5467_s25 + $0x250] sm:$0x33] }
 0x12a   : > { %3693 = vst [vmem:[%s5823_s6 + $0x28] sm:$0xff] %v3677_v63  ;;  %v3191_v63 = vpack.c.b16 %v3185_v57, %v3185_v57  ;;  %v5028_v35 = vor.u32 %v5334_v22, %v5025_v23  ;;  %v4991_v40 = vld [vmem:[%s5467_s25 + $0x208] sm:$0xf]  ;;  %v5332_v41 = vld [vmem:[%s5467_s25 + $0x25c] sm:$0xf]  ;;  %v3320_v54 = vunpack.c.l.b16 %v5035_v37  ;;  %v3321_v57 = vunpack.c.h.b16 %v5035_v37 }
 0x12b   : > { %2942 = vmatpush.bf16.msra.mxu2 %v4921_v59  ;;  %2955 = vmatpush.bf16.msra.mxu3 %v4925_v60  ;;  %v3118_v59 = vunpack.c.h.b16 %v4964_v42  ;;  %v4945_v60 = vor.u32 %v5321_v45, %v4944_v36  ;;  %v5333_v36 = vld [vmem:[%s5467_s25 + $0x25c] sm:$0xf0]  ;;  %v5017_v42 = vld [vmem:[%s5467_s25 + $0x260] sm:$0xf0]  ;;  %v5325_v45 = vld [vmem:[%s5467_s25 + $0x20c] sm:$0xf0] }
 0x12c   : > { %2882 = vmatpush.bf16.msra.mxu0 %v4903_v0  ;;  %2895 = vmatpush.bf16.msra.mxu1 %v4907_v1  ;;  %v3123_v0 = vpack.c.b16 %v3117_v52, %v3117_v52  ;;  %v5324_v48 = vld [vmem:[%s5467_s25 + $0x20c] sm:$0xf]  ;;  %v4993_v49 = vld [vmem:[%s5467_s25 + $0x210] sm:$0xf0]  ;;  %v5020_v52 = vor.u32 %v5332_v41, %v5017_v42  ;;  %v5343_v22 = vld [vmem:[%s5467_s25 + $0x26c] sm:$0xf0] }
 0x12d   : > { %v1592_v6 = vpop.f32.mrf.mxu2  ;;  %v1605_v9 = vpop.f32.mrf.mxu3  ;;  %v3124_v1 = vpack.c.b16 %v3118_v59, %v3118_v59  ;;  %v4992_v59 = vor.u32 %v5325_v45, %v4991_v40  ;;  %v3447_v37 = vld [vmem:[%s6197_s13 + $0x20] sm:$0x33]  ;;  %v5336_v41 = vld [vmem:[%s5467_s25 + $0x234] sm:$0xf]  ;;  %v5064_v42 = vld [vmem:[%s5467_s25 + $0x238] sm:$0xf0] }
 0x12e   : > { %v1666_v10 = vpop.f32.mrf.mxu0  ;;  %v1679_v11 = vpop.f32.mrf.mxu1  ;;  %v3371_v45 = vld [vmem:[%s6197_s13 + $0x20] sm:$0x33] }
 0x131   : > { %4863 = vmatmul.msk.bf16.vlgmr.msrb.gmra.mxu0 %vm427_vm1, %v2631_v12  ;;  %4864 = vmatmul.msk.bf16.vlgmr.msrb.gmra.mxu1 %vm427_vm1, %v2631_v12  ;;  %v4899_v12 = vld [vmem:[%s6484_s2 + $0x4] sm:$0xf] }
 0x132   : > { %4887 = vmatmul.msk.bf16.vlgmr.msrb.gmra.mxu2 %vm427_vm1, %v4870_v13  ;;  %4888 = vmatmul.msk.bf16.vlgmr.msrb.gmra.mxu3 %vm427_vm1, %v4870_v13  ;;  %v2834_v13 = vld [vmem:[%s6484_s2] sm:$0xf] }
 0x133   : > { %3083 = vmatpush.bf16.msrb.mxu2 %v3073_v16  ;;  %3096 = vmatpush.bf16.msrb.mxu3 %v3076_v17 }
 0x134   : > { %3007 = vmatpush.bf16.msrb.mxu0 %v2997_v18  ;;  %3020 = vmatpush.bf16.msrb.mxu1 %v3000_v19  ;;  %v3133_v18 = vsel %vm431_vm0, %v3123_v0, 0  ;;  %v3136_v19 = vsel %vm431_vm0, %v3124_v1, 0  ;;  %v3327_v0 = vpack.c.b16 %v3321_v57, %v3321_v57 }
 0x135   : > { %v1726_v43 = vpop.f32.mrf.mxu2  ;;  %v1739_v44 = vpop.f32.mrf.mxu3 }
 0x136   : > { %v1668_v50 = vpop.f32.mrf.mxu0  ;;  %v1681_v53 = vpop.f32.mrf.mxu1  ;;  %v1727_v2 = vadd.f32 %v1726_v43, %v1666_v10  ;;  %v1740_v7 = vadd.f32 %v1739_v44, %v1679_v11  ;;  %v3200_v10 = vsel %vm431_vm0, %v3190_v62, 0  ;;  %v3203_v11 = vsel %vm431_vm0, %v3191_v63, 0 }
 0x137   : > { %3084 = vmatpush.bf16.msrb.mxu2 %v4982_v33  ;;  %3097 = vmatpush.bf16.msrb.mxu3 %v4986_v34  ;;  %v5015_v33 = vld [vmem:[%s5467_s25 + $0x258] sm:$0xf]  ;;  %v5024_v34 = vor.u32 %v5335_v21, %v5023_v20  ;;  %v3326_v63 = vpack.c.b16 %v3320_v54, %v3320_v54  ;;  %v5072_v20 = vld [vmem:[%s5467_s25 + $0x248] sm:$0xf0]  ;;  %v5052_v21 = vld [vmem:[%s5467_s25 + $0x268] sm:$0xf] }
 0x138   : > { %3008 = vmatpush.bf16.msrb.mxu0 %v4953_v38  ;;  %3021 = vmatpush.bf16.msrb.mxu1 %v4957_v39  ;;  %v5000_v38 = vor.u32 %v5327_v28, %v4999_v26  ;;  %v5004_v39 = vor.u32 %v5326_v29, %v5001_v30  ;;  %v5054_v28 = vld [vmem:[%s5467_s25 + $0x270] sm:$0xf0]  ;;  %v5062_v29 = vld [vmem:[%s5467_s25 + $0x230] sm:$0xf]  ;;  %v5046_v54 = vld [vmem:[%s5467_s25 + $0x260] sm:$0xf0] }
 0x13b   : > { %3085 = vmatpush.bf16.msrb.mxu2 %v4974_v58  ;;  %3098 = vmatpush.bf16.msrb.mxu3 %v4978_v51  ;;  %v5040_v58 = vld [vmem:[%s5467_s25 + $0x278] sm:$0x33]  ;;  %v5016_v51 = vor.u32 %v5333_v36, %v5015_v33 }
 0x13c   : > { %3009 = vmatpush.bf16.msrb.mxu0 %v4945_v60  ;;  %3022 = vmatpush.bf16.msrb.mxu1 %v4949_v61  ;;  %v4996_v60 = vor.u32 %v5324_v48, %v4993_v49  ;;  %v3260_v61 = vunpack.c.l.b16 %v5040_v58  ;;  %v3261_v62 = vunpack.c.h.b16 %v5040_v58  ;;  %v5044_v36 = vld [vmem:[%s5467_s25 + $0x258] sm:$0xf] }
 0x13d   : > { %v1728_v8 = vpop.f32.mrf.mxu2  ;;  %v1741_v5 = vpop.f32.mrf.mxu3 }
 0x13e   : > { %v1793_v6 = vpop.f32.mrf.mxu0  ;;  %v1806_v9 = vpop.f32.mrf.mxu1  ;;  %v3267_v8 = vpack.c.b16 %v3261_v62, %v3261_v62  ;;  %v3387_v62 = vunpack.c.h.b16 %v3371_v45 }
 0x13f   : > { %v6147_v16 = vadd.f32 %v1793_v6, %v1727_v2  ;;  %v6149_v17 = vadd.f32 %v1806_v9, %v1740_v7  ;;  %v3266_v7 = vpack.c.b16 %v3260_v61, %v3260_v61  ;;  %v4941_v9 = vld [vmem:[%s6484_s2 + $0x8] sm:$0xf]  ;;  %v3386_v61 = vunpack.c.l.b16 %v3371_v45  ;;  %v5107_v45 = vld [vmem:[%s6197_s13 + $0x8] sm:$0xf0] }
 0x140   : > { %v3279_v26 = vsel %vm431_vm0, %v3267_v8, 0 }
 0x141   : > { %v3678_v27 = vpack.c.bf16 %v6149_v17, %v6147_v16  ;;  %4916 = vmatmul.msk.bf16.vlgmr.msra.gmra.mxu0 %vm427_vm1, %v4899_v12  ;;  %4917 = vmatmul.msk.bf16.vlgmr.msra.gmra.mxu1 %vm427_vm1, %v4899_v12  ;;  %v4970_v12 = vld [vmem:[%s6484_s2 + $0x4] sm:$0xf]  ;;  %v3276_v23 = vsel %vm431_vm0, %v3266_v7, 0  ;;  %v3392_v8 = vpack.c.b16 %v3386_v61, %v3386_v61 }
 0x142   : > { %4934 = vmatmul.msk.bf16.vlgmr.msra.gmra.mxu2 %vm427_vm1, %v2834_v13  ;;  %4935 = vmatmul.msk.bf16.vlgmr.msra.gmra.mxu3 %vm427_vm1, %v2834_v13  ;;  %v3336_v13 = vsel %vm431_vm0, %v3326_v63, 0 }
 0x143   : > { %3694 = vst [vmem:[%s5823_s6 + $0x30] sm:$0xff] %v3678_v27  ;;  %3210 = vmatpush.bf16.msra.mxu2 %v3200_v10  ;;  %3223 = vmatpush.bf16.msra.mxu3 %v3203_v11  ;;  %v3339_v10 = vsel %vm431_vm0, %v3327_v0, 0  ;;  %v5070_v11 = vld [vmem:[%s5467_s25 + $0x240] sm:$0xf]  ;;  %v5342_v27 = vld [vmem:[%s5467_s25 + $0x26c] sm:$0xf] }
 0x144   : > { %3143 = vmatpush.bf16.msra.mxu0 %v3133_v18  ;;  %3156 = vmatpush.bf16.msra.mxu1 %v3136_v19  ;;  %v5339_v18 = vld [vmem:[%s5467_s25 + $0x244] sm:$0xf0]  ;;  %v5338_v19 = vld [vmem:[%s5467_s25 + $0x244] sm:$0xf]  ;;  %v5057_v40 = vor.u32 %v5342_v27, %v5054_v28  ;;  %v5115_v27 = vld [vmem:[%s6197_s13 + $0x18] sm:$0xf0] }
 0x145   : > { %v1869_v43 = vpop.f32.mrf.mxu2  ;;  %v1882_v44 = vpop.f32.mrf.mxu3  ;;  %v5071_v30 = vor.u32 %v5339_v18, %v5070_v11  ;;  %v5075_v33 = vor.u32 %v5338_v19, %v5072_v20  ;;  %v5012_v11 = vld [vmem:[%s6484_s2 + $0x8] sm:$0xf]  ;;  %v3402_v20 = vsel %vm431_vm0, %v3392_v8, 0  ;;  %v5089_v28 = vld [vmem:[%s6197_s13 + $0x10] sm:$0xf] }
 0x146   : > { %v1795_v50 = vpop.f32.mrf.mxu0  ;;  %v1808_v53 = vpop.f32.mrf.mxu1 }
 0x147   : > { %3211 = vmatpush.bf16.msra.mxu2 %v5024_v34  ;;  %3224 = vmatpush.bf16.msra.mxu3 %v5028_v35  ;;  %v5053_v34 = vor.u32 %v5343_v22, %v5052_v21  ;;  %v5337_v35 = vld [vmem:[%s5467_s25 + $0x234] sm:$0xf0]  ;;  %v5341_v50 = vld [vmem:[%s5467_s25 + $0x25c] sm:$0xf0]  ;;  %v5340_v53 = vld [vmem:[%s5467_s25 + $0x25c] sm:$0xf] }
 0x148   : > { %3144 = vmatpush.bf16.msra.mxu0 %v5000_v38  ;;  %3157 = vmatpush.bf16.msra.mxu1 %v5004_v39  ;;  %v5045_v0 = vor.u32 %v5341_v50, %v5044_v36  ;;  %v5113_v22 = vld [vmem:[%s6197_s13 + $0x10] sm:$0xf] }
 0x14b   : > { %3212 = vmatpush.bf16.msra.mxu2 %v5016_v51  ;;  %3225 = vmatpush.bf16.msra.mxu3 %v5020_v52 }
 0x14c   : > { %3145 = vmatpush.bf16.msra.mxu0 %v4992_v59  ;;  %3158 = vmatpush.bf16.msra.mxu1 %v4996_v60  ;;  %v5063_v59 = vor.u32 %v5337_v35, %v5062_v29  ;;  %v5067_v60 = vor.u32 %v5336_v41, %v5064_v42  ;;  %v5347_v29 = vld [vmem:[%s6197_s13 + $0x14] sm:$0xf0]  ;;  %v5352_v42 = vld [vmem:[%s6197_s13 + $0x4] sm:$0xf] }
 0x14d   : > { %v1871_v1 = vpop.f32.mrf.mxu2  ;;  %v1884_v2 = vpop.f32.mrf.mxu3  ;;  %v5110_v61 = vor.u32 %v5352_v42, %v5107_v45  ;;  %v5357_v42 = vld [vmem:[%s6197_s13 + $0x2c] sm:$0xf0] }
 0x14e   : > { %v1929_v5 = vpop.f32.mrf.mxu0  ;;  %v1942_v6 = vpop.f32.mrf.mxu1  ;;  %v5049_v1 = vor.u32 %v5340_v53, %v5046_v54  ;;  %v5345_v53 = vld [vmem:[%s6197_s13 + $0x4] sm:$0xf0]  ;;  %v5344_v54 = vld [vmem:[%s6197_s13 + $0x4] sm:$0xf] }
 0x14f   : > { %v1930_v38 = vadd.f32 %v1929_v5, %v1869_v43  ;;  %v1943_v39 = vadd.f32 %v1942_v6, %v1882_v44  ;;  %v3462_v43 = vunpack.c.l.b16 %v3447_v37  ;;  %v3463_v44 = vunpack.c.h.b16 %v3447_v37  ;;  %v5353_v37 = vld [vmem:[%s6197_s13 + $0x4] sm:$0xf0] }
 0x150   : > { %v3393_v5 = vpack.c.b16 %v3387_v62, %v3387_v62 }
 0x151   : > { %4958 = vmatmul.msk.bf16.vlgmr.msrb.gmra.mxu0 %vm427_vm1, %v4941_v9  ;;  %4959 = vmatmul.msk.bf16.vlgmr.msrb.gmra.mxu1 %vm427_vm1, %v4941_v9  ;;  %v3468_v2 = vpack.c.b16 %v3462_v43, %v3462_v43  ;;  %v3469_v7 = vpack.c.b16 %v3463_v44, %v3463_v44 }
 0x152   : > { %4987 = vmatmul.msk.bf16.vlgmr.msrb.gmra.mxu2 %vm427_vm1, %v4970_v12  ;;  %4988 = vmatmul.msk.bf16.vlgmr.msrb.gmra.mxu3 %vm427_vm1, %v4970_v12  ;;  %v3405_v21 = vsel %vm431_vm0, %v3393_v5, 0 }
 0x153   : > { %3346 = vmatpush.bf16.msrb.mxu2 %v3336_v13  ;;  %3359 = vmatpush.bf16.msrb.mxu3 %v3339_v10  ;;  %v3037_v10 = vld [vmem:[%s6484_s2] sm:$0xf]  ;;  %v3478_v18 = vsel %vm431_vm0, %v3468_v2, 0  ;;  %v3481_v19 = vsel %vm431_vm0, %v3469_v7, 0 }
 0x154   : > { %3286 = vmatpush.bf16.msrb.mxu0 %v3276_v23  ;;  %3299 = vmatpush.bf16.msrb.mxu1 %v3279_v26  ;;  %v5355_v23 = vld [vmem:[%s6197_s13 + $0x14] sm:$0xf0]  ;;  %v5354_v26 = vld [vmem:[%s6197_s13 + $0x14] sm:$0xf] }
 0x155   : > { %v1996_v48 = vpop.f32.mrf.mxu2  ;;  %v2009_v49 = vpop.f32.mrf.mxu3  ;;  %v5114_v35 = vor.u32 %v5355_v23, %v5113_v22  ;;  %v5118_v36 = vor.u32 %v5354_v26, %v5115_v27 }
 0x156   : > { %v6217_v57 = vadd.f32 %v1996_v48, %v1930_v38  ;;  %v6219_v58 = vadd.f32 %v2009_v49, %v1943_v39  ;;  %v1931_v51 = vpop.f32.mrf.mxu0  ;;  %v1944_v52 = vpop.f32.mrf.mxu1  ;;  %v5081_v38 = vld [vmem:[%s6197_s13] sm:$0xf]  ;;  %v5143_v39 = vld [vmem:[%s6197_s13 + $0x48] sm:$0x33]  ;;  %v5101_v48 = vld [vmem:[%s5467_s25 + $0x278] sm:$0x33] }
 0x157   : > { %3347 = vmatpush.bf16.msrb.mxu2 %v5071_v30  ;;  %3360 = vmatpush.bf16.msrb.mxu3 %v5075_v33  ;;  %v5346_v30 = vld [vmem:[%s6197_s13 + $0x14] sm:$0xf]  ;;  %v5091_v33 = vld [vmem:[%s6197_s13 + $0x18] sm:$0xf0]  ;;  %v5083_v51 = vld [vmem:[%s6197_s13 + $0x8] sm:$0xf0]  ;;  %v3589_v44 = vunpack.c.l.b16 %v5143_v39  ;;  %v3522_v62 = vunpack.c.l.b16 %v5101_v48 }
 0x158   : > { %v3679_v63 = vpack.c.bf16 %v6219_v58, %v6217_v57  ;;  %3287 = vmatpush.bf16.msrb.mxu0 %v5053_v34  ;;  %3300 = vmatpush.bf16.msrb.mxu1 %v5057_v40  ;;  %v5105_v34 = vld [vmem:[%s6197_s13] sm:$0xf]  ;;  %v5090_v40 = vor.u32 %v5347_v29, %v5089_v28  ;;  %v5094_v41 = vor.u32 %v5346_v30, %v5091_v33  ;;  %v5155_v28 = vld [vmem:[%s6197_s13 + $0x38] sm:$0xf]  ;;  %v5358_v30 = vld [vmem:[%s6197_s13 + $0x3c] sm:$0xf] }
 0x159   : > { %v3595_v2 = vpack.c.b16 %v3589_v44, %v3589_v44  ;;  %v3528_v8 = vpack.c.b16 %v3522_v62, %v3522_v62  ;;  %v5359_v29 = vld [vmem:[%s6197_s13 + $0x3c] sm:$0xf0]  ;;  %v5157_v33 = vld [vmem:[%s6197_s13 + $0x40] sm:$0xf0] }
 0x15a   : > { %3695 = vst [vmem:[%s5823_s6 + $0x38] sm:$0xff] %v3679_v63  ;;  %v3523_v63 = vunpack.c.h.b16 %v5101_v48  ;;  %v5125_v44 = vld [vmem:[%s5467_s25 + $0x260] sm:$0xf0] }
 0x15b   : > { %3348 = vmatpush.bf16.msrb.mxu2 %v5063_v59  ;;  %3361 = vmatpush.bf16.msrb.mxu3 %v5067_v60  ;;  %v3590_v59 = vunpack.c.h.b16 %v5143_v39  ;;  %v5106_v60 = vor.u32 %v5353_v37, %v5105_v34  ;;  %v3538_v26 = vsel %vm431_vm0, %v3528_v8, 0  ;;  %v5131_v34 = vld [vmem:[%s5467_s25 + $0x268] sm:$0xf]  ;;  %v5350_v37 = vld [vmem:[%s5467_s25 + $0x26c] sm:$0xf]  ;;  %v5156_v39 = vor.u32 %v5359_v29, %v5155_v28 }
 0x15c   : > { %3288 = vmatpush.bf16.msrb.mxu0 %v5045_v0  ;;  %3301 = vmatpush.bf16.msrb.mxu1 %v5049_v1  ;;  %v5082_v0 = vor.u32 %v5345_v53, %v5081_v38  ;;  %v5086_v1 = vor.u32 %v5344_v54, %v5083_v51  ;;  %v3529_v5 = vpack.c.b16 %v3523_v63, %v3523_v63  ;;  %v5133_v38 = vld [vmem:[%s5467_s25 + $0x270] sm:$0xf0] }
 0x15d   : > { %v1998_v6 = vpop.f32.mrf.mxu2  ;;  %v2011_v9 = vpop.f32.mrf.mxu3  ;;  %v3596_v7 = vpack.c.b16 %v3590_v59, %v3590_v59  ;;  %v5136_v48 = vor.u32 %v5350_v37, %v5133_v38  ;;  %v5149_v53 = vld [vmem:[%s6197_s13 + $0x30] sm:$0xf0] }
 0x15e   : > { %v2072_v12 = vpop.f32.mrf.mxu0  ;;  %v2085_v13 = vpop.f32.mrf.mxu1  ;;  %v3541_v27 = vsel %vm431_vm0, %v3529_v5, 0  ;;  %v5078_v5 = vld [vmem:[%s6484_s2 + $0x8] sm:$0xf] }
 0x161   : > { %5005 = vmatmul.msk.bf16.vlgmr.msra.gmra.mxu0 %vm427_vm1, %v3037_v10  ;;  %5006 = vmatmul.msk.bf16.vlgmr.msra.gmra.mxu1 %vm427_vm1, %v3037_v10 }
 0x162   : > { %5029 = vmatmul.msk.bf16.vlgmr.msra.gmra.mxu2 %vm427_vm1, %v5012_v11  ;;  %5030 = vmatmul.msk.bf16.vlgmr.msra.gmra.mxu3 %vm427_vm1, %v5012_v11 }
 0x163   : > { %3488 = vmatpush.bf16.msra.mxu2 %v3478_v18  ;;  %3501 = vmatpush.bf16.msra.mxu3 %v3481_v19 }
 0x164   : > { %3412 = vmatpush.bf16.msra.mxu0 %v3402_v20  ;;  %3425 = vmatpush.bf16.msra.mxu1 %v3405_v21  ;;  %v5041_v20 = vld [vmem:[%s6484_s2 + $0x4] sm:$0xf]  ;;  %v3240_v21 = vld [vmem:[%s6484_s2] sm:$0xf] }
 0x165   : > { %v2132_v49 = vpop.f32.mrf.mxu2  ;;  %v2145_v50 = vpop.f32.mrf.mxu3 }
 0x166   : > { %v2074_v52 = vpop.f32.mrf.mxu0  ;;  %v2087_v43 = vpop.f32.mrf.mxu1  ;;  %v2133_v6 = vadd.f32 %v2132_v49, %v2072_v12  ;;  %v2146_v9 = vadd.f32 %v2145_v50, %v2085_v13  ;;  %v3605_v12 = vsel %vm431_vm0, %v3595_v2, 0  ;;  %v3608_v13 = vsel %vm431_vm0, %v3596_v7, 0  ;;  %v5123_v49 = vld [vmem:[%s5467_s25 + $0x258] sm:$0xf]  ;;  %v5356_v50 = vld [vmem:[%s6197_s13 + $0x2c] sm:$0xf] }
 0x167   : > { %3489 = vmatpush.bf16.msra.mxu2 %v5114_v35  ;;  %3502 = vmatpush.bf16.msra.mxu3 %v5118_v36  ;;  %v5351_v36 = vld [vmem:[%s5467_s25 + $0x26c] sm:$0xf0]  ;;  %v5349_v52 = vld [vmem:[%s5467_s25 + $0x25c] sm:$0xf0]  ;;  %v5348_v43 = vld [vmem:[%s5467_s25 + $0x25c] sm:$0xf]  ;;  %v5152_v62 = vor.u32 %v5356_v50, %v5149_v53 }
 0x168   : > { %3413 = vmatpush.bf16.msra.mxu0 %v5090_v40  ;;  %3426 = vmatpush.bf16.msra.mxu1 %v5094_v41  ;;  %v5160_v40 = vor.u32 %v5358_v30, %v5157_v33  ;;  %v5147_v41 = vld [vmem:[%s6197_s13 + $0x28] sm:$0xf]  ;;  %v5132_v45 = vor.u32 %v5351_v36, %v5131_v34  ;;  %v5124_v63 = vor.u32 %v5349_v52, %v5123_v49  ;;  %v3442_v30 = vld [vmem:[%s6484_s2] sm:$0xf]  ;;  %s379_s13 = scalar_lea.vmem %s6486_s4, %s4040_s11 }
 0x169   : > { %v5144_v33 = vld [vmem:[%s6484_s2 + $0x8] sm:$0xf] }
 0x16b   : > { %3490 = vmatpush.bf16.msra.mxu2 %v5106_v60  ;;  %3503 = vmatpush.bf16.msra.mxu3 %v5110_v61  ;;  %v5148_v61 = vor.u32 %v5357_v42, %v5147_v41 }
 0x16c   : > { %3414 = vmatpush.bf16.msra.mxu0 %v5082_v0  ;;  %3427 = vmatpush.bf16.msra.mxu1 %v5086_v1  ;;  %v5128_v0 = vor.u32 %v5348_v43, %v5125_v44 }
 0x16d   : > { %v2134_v10 = vpop.f32.mrf.mxu2  ;;  %v2147_v11 = vpop.f32.mrf.mxu3 }
 0x16e   : > { %v2199_v18 = vpop.f32.mrf.mxu0  ;;  %v2212_v19 = vpop.f32.mrf.mxu1 }
 0x16f   : > { %v6264_v22 = vadd.f32 %v2199_v18, %v2133_v6  ;;  %v6266_v23 = vadd.f32 %v2212_v19, %v2146_v9  ;;  %v5102_v6 = vld [vmem:[%s6484_s2 + $0x4] sm:$0xf] }
 0x171   : > { %v3680_v35 = vpack.c.bf16 %v6266_v23, %v6264_v22  ;;  %5058 = vmatmul.msk.bf16.vlgmr.msrb.gmra.mxu0 %vm427_vm1, %v5041_v20  ;;  %5059 = vmatmul.msk.bf16.vlgmr.msrb.gmra.mxu1 %vm427_vm1, %v5041_v20 }
 0x172   : > { %5076 = vmatmul.msk.bf16.vlgmr.msrb.gmra.mxu2 %vm427_vm1, %v3240_v21  ;;  %5077 = vmatmul.msk.bf16.vlgmr.msrb.gmra.mxu3 %vm427_vm1, %v3240_v21 }
 0x173   : > { %3696 = vst [vmem:[%s5823_s6 + $0x40] sm:$0xff] %v3680_v35  ;;  %3615 = vmatpush.bf16.msrb.mxu2 %v3605_v12  ;;  %3628 = vmatpush.bf16.msrb.mxu3 %v3608_v13 }
 0x174   : > { %3548 = vmatpush.bf16.msrb.mxu0 %v3538_v26  ;;  %3561 = vmatpush.bf16.msrb.mxu1 %v3541_v27 }
 0x175   : > { %v2275_v54 = vpop.f32.mrf.mxu2  ;;  %v2288_v51 = vpop.f32.mrf.mxu3 }
 0x176   : > { %v2201_v59 = vpop.f32.mrf.mxu0  ;;  %v2214_v60 = vpop.f32.mrf.mxu1 }
 0x177   : > { %3616 = vmatpush.bf16.msrb.mxu2 %v5156_v39  ;;  %3629 = vmatpush.bf16.msrb.mxu3 %v5160_v40 }
 0x178   : > { %3549 = vmatpush.bf16.msrb.mxu0 %v5132_v45  ;;  %3562 = vmatpush.bf16.msrb.mxu1 %v5136_v48 }
 0x17b   : > { %3617 = vmatpush.bf16.msrb.mxu2 %v5148_v61  ;;  %3630 = vmatpush.bf16.msrb.mxu3 %v5152_v62 }
 0x17c   : > { %3550 = vmatpush.bf16.msrb.mxu0 %v5124_v63  ;;  %3563 = vmatpush.bf16.msrb.mxu1 %v5128_v0 }
 0x17d   : > { %v2277_v1 = vpop.f32.mrf.mxu2  ;;  %v2290_v2 = vpop.f32.mrf.mxu3 }
 0x17e   : > { %v2335_v7 = vpop.f32.mrf.mxu0  ;;  %v2348_v8 = vpop.f32.mrf.mxu1 }
 0x17f   : > { %v2336_v9 = vadd.f32 %v2335_v7, %v2275_v54  ;;  %v2349_v10 = vadd.f32 %v2348_v8, %v2288_v51 }
 0x181   : > { %5095 = vmatmul.msk.bf16.vlgmr.msra.gmra.mxu0 %vm427_vm1, %v5078_v5  ;;  %5096 = vmatmul.msk.bf16.vlgmr.msra.gmra.mxu1 %vm427_vm1, %v5078_v5 }
 0x182   : > { %5119 = vmatmul.msk.bf16.vlgmr.msra.gmra.mxu2 %vm427_vm1, %v5102_v6  ;;  %5120 = vmatmul.msk.bf16.vlgmr.msra.gmra.mxu3 %vm427_vm1, %v5102_v6 }
 0x185   : > { %v2402_v11 = vpop.f32.mrf.mxu2  ;;  %v2415_v18 = vpop.f32.mrf.mxu3 }
 0x186   : > { %v6303_v19 = vadd.f32 %v2402_v11, %v2336_v9  ;;  %v6305_v20 = vadd.f32 %v2415_v18, %v2349_v10  ;;  %v2337_v21 = vpop.f32.mrf.mxu0  ;;  %v2350_v12 = vpop.f32.mrf.mxu1  ;;  %v3704_v18 = vadd.f32 %v5814_v15, %v5812_v14 }
 0x188   : > { %v3681_v13 = vpack.c.bf16 %v6305_v20, %v6303_v19  ;;  %v3705_v21 = vadd.f32 %v3704_v18, %v5880_v31 }
 0x18a   : > { %3697 = vst [vmem:[%s5823_s6 + $0x48] sm:$0xff] %v3681_v13 }
 0x18d   : > { %v2404_v26 = vpop.f32.mrf.mxu2  ;;  %v2417_v27 = vpop.f32.mrf.mxu3 }
 0x18e   : > { %v2478_v28 = vpop.f32.mrf.mxu0  ;;  %v2491_v29 = vpop.f32.mrf.mxu1 }
 0x191   : > { %5137 = vmatmul.msk.bf16.vlgmr.msrb.gmra.mxu0 %vm427_vm1, %v3442_v30  ;;  %5138 = vmatmul.msk.bf16.vlgmr.msrb.gmra.mxu1 %vm427_vm1, %v3442_v30 }
 0x192   : > { %5161 = vmatmul.msk.bf16.vlgmr.msrb.gmra.mxu2 %vm427_vm1, %v5144_v33  ;;  %5162 = vmatmul.msk.bf16.vlgmr.msrb.gmra.mxu3 %vm427_vm1, %v5144_v33 }
 0x195   : > { %v2538_v34 = vpop.f32.mrf.mxu2  ;;  %v2551_v35 = vpop.f32.mrf.mxu3 }
 0x196   : > { %v2480_v36 = vpop.f32.mrf.mxu0  ;;  %v2493_v37 = vpop.f32.mrf.mxu1  ;;  %v2539_v38 = vadd.f32 %v2538_v34, %v2478_v28  ;;  %v2552_v39 = vadd.f32 %v2551_v35, %v2491_v29  ;;  %v3706_v28 = vadd.f32 %v3705_v21, %v5882_v32 }
 0x198   : > { %v3707_v29 = vadd.f32 %v3706_v28, %v5927_v46 }
 0x19a   : > { %v3708_v36 = vadd.f32 %v3707_v29, %v5929_v47 }
 0x19d   : > { %v2540_v40 = vpop.f32.mrf.mxu2  ;;  %v2553_v41 = vpop.f32.mrf.mxu3 }
 0x19e   : > { %v2605_v42 = vpop.f32.mrf.mxu0  ;;  %v2618_v45 = vpop.f32.mrf.mxu1  ;;  %v3709_v41 = vadd.f32 %v3708_v36, %v5990_v3 }
 0x19f   : > { %v6320_v48 = vadd.f32 %v2605_v42, %v2539_v38  ;;  %v6322_v49 = vadd.f32 %v2618_v45, %v2552_v39 }
 0x1a0   : > { %v3710_v45 = vadd.f32 %v3709_v41, %v5992_v4 }
 0x1a1   : > { %v3682_v50 = vpack.c.bf16 %v6322_v49, %v6320_v48 }
 0x1a3   : > { %3698 = vst [vmem:[%s5823_s6 + $0x50] sm:$0xff] %v3682_v50 }
 0x1a5   : > { %v2681_v53 = vpop.f32.mrf.mxu2  ;;  %v2694_v54 = vpop.f32.mrf.mxu3 }
 0x1a6   : > { %v2607_v51 = vpop.f32.mrf.mxu0  ;;  %v2620_v52 = vpop.f32.mrf.mxu1 }
 0x1ad   : > { %v2683_v43 = vpop.f32.mrf.mxu2  ;;  %v2696_v44 = vpop.f32.mrf.mxu3 }
 0x1ae   : > { %v2741_v59 = vpop.f32.mrf.mxu0  ;;  %v2754_v60 = vpop.f32.mrf.mxu1 }
 0x1af   : > { %v2742_v61 = vadd.f32 %v2741_v59, %v2681_v53  ;;  %v2755_v62 = vadd.f32 %v2754_v60, %v2694_v54  ;;  %v3711_v54 = vadd.f32 %v3710_v45, %v6037_v24 }
 0x1b1   : > { %v3712_v43 = vadd.f32 %v3711_v54, %v6039_v25 }
 0x1b3   : > { %v3713_v44 = vadd.f32 %v3712_v43, %v6100_v55 }
 0x1b5   : > { %v2808_v63 = vpop.f32.mrf.mxu2  ;;  %v2821_v0 = vpop.f32.mrf.mxu3 }
 0x1b6   : > { %v6327_v1 = vadd.f32 %v2808_v63, %v2742_v61  ;;  %v6329_v2 = vadd.f32 %v2821_v0, %v2755_v62  ;;  %v2743_v7 = vpop.f32.mrf.mxu0  ;;  %v2756_v8 = vpop.f32.mrf.mxu1  ;;  %v3714_v63 = vadd.f32 %v3713_v44, %v6102_v56 }
 0x1b8   : > { %v3683_v5 = vpack.c.bf16 %v6329_v2, %v6327_v1  ;;  %v3715_v0 = vadd.f32 %v3714_v63, %v6147_v16 }
 0x1ba   : > { %3699 = vst [vmem:[%s5823_s6 + $0x58] sm:$0xff] %v3683_v5 }
 0x1bd   : > { %v2810_v6 = vpop.f32.mrf.mxu2  ;;  %v2823_v9 = vpop.f32.mrf.mxu3 }
 0x1be   : > { %v2884_v10 = vpop.f32.mrf.mxu0  ;;  %v2897_v11 = vpop.f32.mrf.mxu1  ;;  %v3716_v9 = vadd.f32 %v3715_v0, %v6149_v17 }
 0x1c5   : > { %v2944_v12 = vpop.f32.mrf.mxu2  ;;  %v2957_v13 = vpop.f32.mrf.mxu3 }
 0x1c6   : > { %v2886_v26 = vpop.f32.mrf.mxu0  ;;  %v2899_v27 = vpop.f32.mrf.mxu1  ;;  %v2945_v30 = vadd.f32 %v2944_v12, %v2884_v10  ;;  %v2958_v33 = vadd.f32 %v2957_v13, %v2897_v11  ;;  %v3717_v12 = vadd.f32 %v3716_v9, %v6217_v57 }
 0x1c8   : > { %v3718_v26 = vadd.f32 %v3717_v12, %v6219_v58 }
 0x1ca   : > { %v3719_v29 = vadd.f32 %v3718_v26, %v6264_v22 }
 0x1cd   : > { %v2946_v34 = vpop.f32.mrf.mxu2  ;;  %v2959_v35 = vpop.f32.mrf.mxu3 }
 0x1ce   : > { %v3011_v37 = vpop.f32.mrf.mxu0  ;;  %v3024_v38 = vpop.f32.mrf.mxu1  ;;  %v3720_v34 = vadd.f32 %v3719_v29, %v6266_v23 }
 0x1cf   : > { %v6340_v39 = vadd.f32 %v3011_v37, %v2945_v30  ;;  %v6342_v40 = vadd.f32 %v3024_v38, %v2958_v33 }
 0x1d0   : > { %v3721_v35 = vadd.f32 %v3720_v34, %v6303_v19 }
 0x1d1   : > { %v3684_v42 = vpack.c.bf16 %v6342_v40, %v6340_v39 }
 0x1d3   : > { %3700 = vst [vmem:[%s5823_s6 + $0x60] sm:$0xff] %v3684_v42  ;;  %v3722_v42 = vadd.f32 %v3721_v35, %v6305_v20 }
 0x1d5   : > { %v3087_v50 = vpop.f32.mrf.mxu2  ;;  %v3100_v53 = vpop.f32.mrf.mxu3  ;;  %v3723_v45 = vadd.f32 %v3722_v42, %v6320_v48 }
 0x1d6   : > { %v3013_v51 = vpop.f32.mrf.mxu0  ;;  %v3026_v52 = vpop.f32.mrf.mxu1 }
 0x1d7   : > { %v3724_v52 = vadd.f32 %v3723_v45, %v6322_v49 }
 0x1dd   : > { %v3089_v59 = vpop.f32.mrf.mxu2  ;;  %v3102_v60 = vpop.f32.mrf.mxu3 }
 0x1de   : > { %v3147_v61 = vpop.f32.mrf.mxu0  ;;  %v3160_v62 = vpop.f32.mrf.mxu1 }
 0x1df   : > { %v3148_v7 = vadd.f32 %v3147_v61, %v3087_v50  ;;  %v3161_v8 = vadd.f32 %v3160_v62, %v3100_v53  ;;  %v3725_v61 = vadd.f32 %v3724_v52, %v6327_v1 }
 0x1e1   : > { %v3726_v63 = vadd.f32 %v3725_v61, %v6329_v2 }
 0x1e5   : > { %v3214_v5 = vpop.f32.mrf.mxu2  ;;  %v3227_v6 = vpop.f32.mrf.mxu3 }
 0x1e6   : > { %v6355_v10 = vadd.f32 %v3214_v5, %v3148_v7  ;;  %v6357_v11 = vadd.f32 %v3227_v6, %v3161_v8  ;;  %v3149_v18 = vpop.f32.mrf.mxu0  ;;  %v3162_v21 = vpop.f32.mrf.mxu1  ;;  %v3727_v8 = vadd.f32 %v3726_v63, %v6340_v39 }
 0x1e8   : > { %v3685_v13 = vpack.c.bf16 %v6357_v11, %v6355_v10  ;;  %v3728_v9 = vadd.f32 %v3727_v8, %v6342_v40 }
 0x1ea   : > { %3701 = vst [vmem:[%s5823_s6 + $0x68] sm:$0xff] %v3685_v13  ;;  %v3729_v18 = vadd.f32 %v3728_v9, %v6355_v10 }
 0x1ed   : > { %v3216_v27 = vpop.f32.mrf.mxu2  ;;  %v3229_v28 = vpop.f32.mrf.mxu3 }
 0x1ee   : > { %v3290_v30 = vpop.f32.mrf.mxu0  ;;  %v3303_v33 = vpop.f32.mrf.mxu1  ;;  %v3730_v27 = vadd.f32 %v3729_v18, %v6357_v11 }
 0x1f5   : > { %v3350_v36 = vpop.f32.mrf.mxu2  ;;  %v3363_v37 = vpop.f32.mrf.mxu3 }
 0x1f6   : > { %v3292_v38 = vpop.f32.mrf.mxu0  ;;  %v3305_v41 = vpop.f32.mrf.mxu1  ;;  %v3351_v50 = vadd.f32 %v3350_v36, %v3290_v30  ;;  %v3364_v53 = vadd.f32 %v3363_v37, %v3303_v33 }
 0x1fd   : > { %v3352_v54 = vpop.f32.mrf.mxu2  ;;  %v3365_v51 = vpop.f32.mrf.mxu3 }
 0x1fe   : > { %v3416_v43 = vpop.f32.mrf.mxu0  ;;  %v3429_v44 = vpop.f32.mrf.mxu1 }
 0x1ff   : > { %v6370_v59 = vadd.f32 %v3416_v43, %v3351_v50  ;;  %v6372_v60 = vadd.f32 %v3429_v44, %v3364_v53 }
 0x201   : > { %v3686_v62 = vpack.c.bf16 %v6372_v60, %v6370_v59  ;;  %v3731_v28 = vadd.f32 %v3730_v27, %v6370_v59 }
 0x203   : > { %3702 = vst [vmem:[%s5823_s6 + $0x70] sm:$0xff] %v3686_v62  ;;  %v3732_v41 = vadd.f32 %v3731_v28, %v6372_v60 }
 0x205   : > { %v3492_v0 = vpop.f32.mrf.mxu2  ;;  %v3505_v7 = vpop.f32.mrf.mxu3 }
 0x206   : > { %v3418_v5 = vpop.f32.mrf.mxu0  ;;  %v3431_v6 = vpop.f32.mrf.mxu1 }
 0x20d   : > { %v3494_v21 = vpop.f32.mrf.mxu2  ;;  %v3507_v12 = vpop.f32.mrf.mxu3 }
 0x20e   : > { %v3552_v13 = vpop.f32.mrf.mxu0  ;;  %v3565_v26 = vpop.f32.mrf.mxu1 }
 0x20f   : > { %v3553_v29 = vadd.f32 %v3552_v13, %v3492_v0  ;;  %v3566_v30 = vadd.f32 %v3565_v26, %v3505_v7 }
 0x215   : > { %v3619_v33 = vpop.f32.mrf.mxu2  ;;  %v3632_v34 = vpop.f32.mrf.mxu3 }
 0x216   : > { %v6384_v35 = vadd.f32 %v3619_v33, %v3553_v29  ;;  %v6386_v36 = vadd.f32 %v3632_v34, %v3566_v30  ;;  %v3554_v37 = vpop.f32.mrf.mxu0  ;;  %v3567_v38 = vpop.f32.mrf.mxu1 }
 0x218   : > { %v3687_v42 = vpack.c.bf16 %v6386_v36, %v6384_v35  ;;  %v3733_v45 = vadd.f32 %v3732_v41, %v6384_v35 }
 0x21a   : > { %3703 = vst [vmem:[%s5823_s6 + $0x78] sm:$0xff] %v3687_v42  ;;  %v3734_v50 = vadd.f32 %v3733_v45, %v6386_v36 }
 0x21c   : > { %3735 = vadd.xlane.f32.xlu0 %v3734_v50 }
 0x21d   : > { %v3621_v53 = vpop.f32.mrf.mxu2  ;;  %v3634_v54 = vpop.f32.mrf.mxu3 }
 0x28f   : > { %v3736_v51 = vpop.xlane.xlu0 %3735 }
 0x290   : > { %3771 = vst.msk [vmem:[%s379_s13] sm:$0xff] %vm3770_vm2, %v3736_v51  ;;  %v6401_v52 = vmul.f32 0.00024414063, %v3736_v51 }
 0x292   : > { %v3738_v43 = vsub.f32 %v5812_v14, %v6401_v52  ;;  %v3739_v44 = vsub.f32 %v5814_v15, %v6401_v52  ;;  %v3740_v61 = vsub.f32 %v5880_v31, %v6401_v52  ;;  %v3741_v0 = vsub.f32 %v5882_v32, %v6401_v52 }
 0x293   : > { %v3742_v7 = vsub.f32 %v5927_v46, %v6401_v52  ;;  %v3743_v6 = vsub.f32 %v5929_v47, %v6401_v52  ;;  %v3744_v15 = vsub.f32 %v5990_v3, %v6401_v52  ;;  %v3745_v21 = vsub.f32 %v5992_v4, %v6401_v52 }
 0x294   : > { %v3772_v62 = vmul.f32 %v3738_v43, %v3738_v43  ;;  %v3773_v63 = vmul.f32 %v3739_v44, %v3739_v44  ;;  %v3774_v8 = vmul.f32 %v3740_v61, %v3740_v61  ;;  %v3775_v14 = vmul.f32 %v3741_v0, %v3741_v0 }
 0x295   : > { %v3776_v18 = vmul.f32 %v3742_v7, %v3742_v7  ;;  %v3777_v12 = vmul.f32 %v3743_v6, %v3743_v6  ;;  %v3746_v46 = vsub.f32 %v6037_v24, %v6401_v52  ;;  %v3778_v13 = vmul.f32 %v3744_v15, %v3744_v15 }
 0x296   : > { %v3804_v5 = vadd.f32 %v3773_v63, %v3772_v62  ;;  %v3747_v47 = vsub.f32 %v6039_v25, %v6401_v52  ;;  %v3779_v27 = vmul.f32 %v3745_v21, %v3745_v21  ;;  %v3748_v3 = vsub.f32 %v6100_v55, %v6401_v52 }
 0x297   : > { %v3780_v29 = vmul.f32 %v3746_v46, %v3746_v46  ;;  %v3749_v4 = vsub.f32 %v6102_v56, %v6401_v52  ;;  %v3750_v24 = vsub.f32 %v6147_v16, %v6401_v52  ;;  %v3751_v25 = vsub.f32 %v6149_v17, %v6401_v52 }
 0x298   : > { %v3805_v9 = vadd.f32 %v3804_v5, %v3774_v8  ;;  %v3781_v33 = vmul.f32 %v3747_v47, %v3747_v47  ;;  %v3782_v37 = vmul.f32 %v3748_v3, %v3748_v3  ;;  %v3752_v55 = vsub.f32 %v6217_v57, %v6401_v52 }
 0x299   : > { %v3783_v41 = vmul.f32 %v3749_v4, %v3749_v4  ;;  %v3784_v45 = vmul.f32 %v3750_v24, %v3750_v24  ;;  %v3753_v56 = vsub.f32 %v6219_v58, %v6401_v52  ;;  %v3785_v53 = vmul.f32 %v3751_v25, %v3751_v25 }
 0x29a   : > { %v3806_v31 = vadd.f32 %v3805_v9, %v3775_v14  ;;  %v3754_v16 = vsub.f32 %v6264_v22, %v6401_v52  ;;  %v3786_v51 = vmul.f32 %v3752_v55, %v3752_v55  ;;  %v3755_v17 = vsub.f32 %v6266_v23, %v6401_v52 }
 0x29b   : > { %v3787_v44 = vmul.f32 %v3753_v56, %v3753_v56  ;;  %v3756_v57 = vsub.f32 %v6303_v19, %v6401_v52  ;;  %v3757_v58 = vsub.f32 %v6305_v20, %v6401_v52  ;;  %v3758_v22 = vsub.f32 %v6320_v48, %v6401_v52 }
 0x29c   : > { %v3807_v32 = vadd.f32 %v3806_v31, %v3776_v18  ;;  %v3788_v62 = vmul.f32 %v3754_v16, %v3754_v16  ;;  %v3789_v0 = vmul.f32 %v3755_v17, %v3755_v17  ;;  %v3759_v23 = vsub.f32 %v6322_v49, %v6401_v52 }
 0x29d   : > { %v3790_v8 = vmul.f32 %v3756_v57, %v3756_v57  ;;  %v3791_v6 = vmul.f32 %v3757_v58, %v3757_v58  ;;  %v3760_v19 = vsub.f32 %v6327_v1, %v6401_v52  ;;  %v3792_v9 = vmul.f32 %v3758_v22, %v3758_v22 }
 0x29e   : > { %v3808_v26 = vadd.f32 %v3807_v32, %v3777_v12  ;;  %v3761_v20 = vsub.f32 %v6329_v2, %v6401_v52  ;;  %v3793_v18 = vmul.f32 %v3759_v23, %v3759_v23  ;;  %v3762_v48 = vsub.f32 %v6340_v39, %v6401_v52 }
 0x29f   : > { %v3794_v21 = vmul.f32 %v3760_v19, %v3760_v19  ;;  %v3763_v49 = vsub.f32 %v6342_v40, %v6401_v52  ;;  %v3764_v1 = vsub.f32 %v6355_v10, %v6401_v52  ;;  %v3765_v2 = vsub.f32 %v6357_v11, %v6401_v52 }
 0x2a0   : > { %v3809_v28 = vadd.f32 %v3808_v26, %v3778_v13  ;;  %v3795_v32 = vmul.f32 %v3761_v20, %v3761_v20  ;;  %v3796_v13 = vmul.f32 %v3762_v48, %v3762_v48  ;;  %v3766_v39 = vsub.f32 %v6370_v59, %v6401_v52 }
 0x2a1   : > { %v3797_v47 = vmul.f32 %v3763_v49, %v3763_v49  ;;  %v3767_v40 = vsub.f32 %v6372_v60, %v6401_v52  ;;  %v3768_v10 = vsub.f32 %v6384_v35, %v6401_v52  ;;  %v3769_v11 = vsub.f32 %v6386_v36, %v6401_v52 }
 0x2a2   : > { %v3810_v30 = vadd.f32 %v3809_v28, %v3779_v27  ;;  %v3798_v28 = vmul.f32 %v3764_v1, %v3764_v1  ;;  %v3800_v4 = vmul.f32 %v3766_v39, %v3766_v39 }
 0x2a4   : > { %v3811_v34 = vadd.f32 %v3810_v30, %v3780_v29  ;;  %v3799_v29 = vmul.f32 %v3765_v2, %v3765_v2 }
 0x2a6   : > { %v3812_v38 = vadd.f32 %v3811_v34, %v3781_v33  ;;  %v3801_v34 = vmul.f32 %v3767_v40, %v3767_v40 }
 0x2a8   : > { %v3813_v42 = vadd.f32 %v3812_v38, %v3782_v37  ;;  %v3802_v37 = vmul.f32 %v3768_v10, %v3768_v10  ;;  %v3803_v38 = vmul.f32 %v3769_v11, %v3769_v11 }
 0x2aa   : > { %v3814_v50 = vadd.f32 %v3813_v42, %v3783_v41 }
 0x2ac   : > { %v3815_v54 = vadd.f32 %v3814_v50, %v3784_v45 }
 0x2ae   : > { %v3816_v43 = vadd.f32 %v3815_v54, %v3785_v53 }
 0x2b0   : > { %v3817_v61 = vadd.f32 %v3816_v43, %v3786_v51 }
 0x2b2   : > { %v3818_v63 = vadd.f32 %v3817_v61, %v3787_v44 }
 0x2b4   : > { %v3819_v7 = vadd.f32 %v3818_v63, %v3788_v62 }
 0x2b6   : > { %v3820_v5 = vadd.f32 %v3819_v7, %v3789_v0 }
 0x2b8   : > { %v3821_v14 = vadd.f32 %v3820_v5, %v3790_v8 }
 0x2ba   : > { %v3822_v15 = vadd.f32 %v3821_v14, %v3791_v6 }
 0x2bc   : > { %v3823_v31 = vadd.f32 %v3822_v15, %v3792_v9 }
 0x2be   : > { %v3824_v12 = vadd.f32 %v3823_v31, %v3793_v18 }
 0x2c0   : > { %v3825_v46 = vadd.f32 %v3824_v12, %v3794_v21 }
 0x2c2   : > { %v3826_v26 = vadd.f32 %v3825_v46, %v3795_v32 }
 0x2c4   : > { %v3827_v27 = vadd.f32 %v3826_v26, %v3796_v13 }
 0x2c6   : > { %v3828_v3 = vadd.f32 %v3827_v27, %v3797_v47 }
 0x2c8   : > { %v3829_v30 = vadd.f32 %v3828_v3, %v3798_v28 }
 0x2ca   : > { %v3830_v33 = vadd.f32 %v3829_v30, %v3799_v29 }
 0x2cc   : > { %v3831_v24 = vadd.f32 %v3830_v33, %v3800_v4 }
 0x2ce   : > { %v3832_v59 = vadd.f32 %v3831_v24, %v3801_v34 }
 0x2d0   : > { %v3833_v25 = vadd.f32 %v3832_v59, %v3802_v37 }
 0x2d2   : > { %v3834_v41 = vadd.f32 %v3833_v25, %v3803_v38 }
 0x2d4   : > { %3835 = vadd.xlane.f32.xlu0 %v3834_v41 }
 0x347   : > { %v3836_v60 = vpop.xlane.xlu0 %3835 }
 0x348   : > { %3837 = vst.msk [vmem:[%s386_s15] sm:$0xff] %vm3770_vm2, %v3836_v60 }
 0x349 PF: > { %s16_s20 = sadd.s32 1, %s5409_s20   ;;  %s6488_s18 = smov %s5405_s19 }
 0x34a   : > { %p13_p5 = scmp.ge.s32.totalorder %s16_s20, 4   ;;  %s6489_s19 = smov %s6491_s21 }
 0x34c   :  { %15 = sbr.rel (!%p13_p5) target bundleno = 2 (0x2), region = 107 }

</bundles_post_ra>
